<compile_context>
chip_gen: v7x
topology: tpu7x:2x2x1
jax: 0.10.0
libtpu: 0.0.40
codegen_flags: <defaults>
</compile_context>

<pallas_src>
import jax
import jax.numpy as jnp
from jax.experimental import pallas as pl
from jax.experimental.pallas import tpu as pltpu

# Logical model dims and their 128-lane-padded counterparts.
IN_F, HID_F, OUT_F = 784, 800, 10
H, N = 896, 128                      # 896 = 7*128 (hidden), 128 = 1*128 (logit lanes)


def mlp_kernel(x_ref, w1_ref, b1_ref, w2_ref, b2_ref, w3_ref, b3_ref, out_ref):
    # One batch tile per grid step; weights/biases are VMEM-resident (constant
    # index_map).  bf16 operands drive the MXU, accumulation in f32, bias + ReLU on
    # the f32 accumulator, downcast only to feed the next matmul.
    x = x_ref[...].astype(jnp.bfloat16)                                   # (TB, 784)

    a1 = jnp.dot(x, w1_ref[...], preferred_element_type=jnp.float32)     # (TB, 896)
    h1 = jnp.maximum(a1 + b1_ref[...], 0.0).astype(jnp.bfloat16)         # Linear1+ReLU

    a2 = jnp.dot(h1, w2_ref[...], preferred_element_type=jnp.float32)    # (TB, 896)
    h2 = jnp.maximum(a2 + b2_ref[...], 0.0).astype(jnp.bfloat16)         # Linear2+ReLU

    a3 = jnp.dot(h2, w3_ref[...], preferred_element_type=jnp.float32)    # (TB, 128)
    h3 = jnp.maximum(a3 + b3_ref[...], 0.0)                              # Linear3+ReLU

    out_ref[...] = h3.astype(out_ref.dtype)


def _round_up(x, m):
    return (x + m - 1) // m * m


def _pad2(a, shape):
    out = jnp.zeros(shape, a.dtype)
    return out.at[: a.shape[0], : a.shape[1]].set(a)


def prepare_params(params):
    """One-time weight prep: zero-pad to lane-aligned shapes, cast weights to bf16.

    Call once at init; do NOT call per forward (that was the per-call HBM tax the
    perf review flagged).  Biases stay f32 (added on the f32 accumulator).
    """
    w1, b1, w2, b2, w3, b3 = params
    return (
        _pad2(w1, (IN_F, H)).astype(jnp.bfloat16),   # keep K=784 to match un-padded x
        _pad2(b1, (1, H)),
        _pad2(w2, (H, H)).astype(jnp.bfloat16),
        _pad2(b2, (1, H)),
        _pad2(w3, (H, N)).astype(jnp.bfloat16),
        _pad2(b3, (1, N)),
    )


@jax.jit
def mlp_forward(x, prepared_params):
    """x: (B, 784) float32.  prepared_params: output of prepare_params()."""
    w1_p, b1_p, w2_p, b2_p, w3_p, b3_p = prepared_params
    B = x.shape[0]

    # Batch tile: large enough to amortize per-grid-step overhead, multiple of 16 for
    # bf16 sublane packing.  Keep >=2 grid steps when the batch allows so the
    # "parallel" grid axis can be split across v7x's two TensorCores.
    TB = min(512, _round_up(B, 16))
    B_pad = _round_up(B, TB)
    if B_pad // TB < 2 and TB >= 256:
        TB = _round_up(TB // 2, 16)
        B_pad = _round_up(B, TB)

    if B_pad != B:
        x = jnp.zeros((B_pad, IN_F), x.dtype).at[:B, :].set(x)

    flops = 2 * B_pad * (IN_F * H + H * H + H * N)
    bytes_accessed = (
        B_pad * IN_F * 4
        + (w1_p.size + w2_p.size + w3_p.size) * 2
        + (b1_p.size + b2_p.size + b3_p.size) * 4
        + B_pad * N * 2
    )

    out = pl.pallas_call(
        mlp_kernel,
        out_shape=jax.ShapeDtypeStruct((B_pad, N), jnp.bfloat16),
        grid=(B_pad // TB,),
        in_specs=[
            pl.BlockSpec((TB, IN_F), lambda i: (i, 0)),   # x: one batch tile / step
            pl.BlockSpec((IN_F, H), lambda i: (0, 0)),    # weights/biases: resident
            pl.BlockSpec((1, H), lambda i: (0, 0)),
            pl.BlockSpec((H, H), lambda i: (0, 0)),
            pl.BlockSpec((1, H), lambda i: (0, 0)),
            pl.BlockSpec((H, N), lambda i: (0, 0)),
            pl.BlockSpec((1, N), lambda i: (0, 0)),
        ],
        out_specs=pl.BlockSpec((TB, N), lambda i: (i, 0)),
        compiler_params=pltpu.CompilerParams(
            dimension_semantics=("parallel",),            # shard batch tiles across TCs
            vmem_limit_bytes=32 << 20,                    # covers TB=512 f32 intermediates
        ),
        cost_estimate=pl.CostEstimate(
            flops=flops, transcendentals=0, bytes_accessed=bytes_accessed),
    )(x, w1_p, b1_p, w2_p, b2_p, w3_p, b3_p)

    return out[:B, :OUT_F].astype(jnp.float32)


def init_params(key):
    # Deterministic synthetic parameters matching the module's shapes, stored as
    # (in_features, out_features) so each layer is relu(x @ W + b).
    k1, k2, k3 = jax.random.split(key, 3)
    w1 = jax.random.normal(k1, (IN_F, HID_F), jnp.float32) * 0.05
    b1 = jnp.zeros((1, HID_F), jnp.float32)
    w2 = jax.random.normal(k2, (HID_F, HID_F), jnp.float32) * 0.05
    b2 = jnp.zeros((1, HID_F), jnp.float32)
    w3 = jax.random.normal(k3, (HID_F, OUT_F), jnp.float32) * 0.05
    b3 = jnp.zeros((1, OUT_F), jnp.float32)
    return (w1, b1, w2, b2, w3, b3)


if __name__ == "__main__":
    key = jax.random.PRNGKey(0)
    kx, kp = jax.random.split(key)

    B = 8
    x = jax.random.normal(kx, (B, IN_F), jnp.float32)   # flattened MNIST images
    params = init_params(kp)
    prepped = prepare_params(params)                     # weight prep happens ONCE

    out = mlp_forward(x, prepped)
    out = jax.block_until_ready(out)
    assert out.shape == (B, OUT_F)

    # Reference with the same numerics as the kernel (bf16 operands, f32 accumulate,
    # bf16 output rounding), eval-mode dropout == identity.
    w1, b1, w2, b2, w3, b3 = params
    xb = x.astype(jnp.bfloat16)
    w1b, w2b, w3b = (w.astype(jnp.bfloat16) for w in (w1, w2, w3))
    r = jnp.maximum(jnp.dot(xb, w1b, preferred_element_type=jnp.float32) + b1, 0.0)
    r = jnp.maximum(jnp.dot(r.astype(jnp.bfloat16), w2b,
                            preferred_element_type=jnp.float32) + b2, 0.0)
    r = jnp.maximum(jnp.dot(r.astype(jnp.bfloat16), w3b,
                            preferred_element_type=jnp.float32) + b3, 0.0)
    assert jnp.allclose(out, r, atol=1e-2, rtol=1e-2)

    # Coarse sanity check against the full-f32 math as well.
    f = jnp.maximum(x @ w1 + b1, 0.0)
    f = jnp.maximum(f @ w2 + b2, 0.0)
    f = jnp.maximum(f @ w3 + b3, 0.0)
    assert jnp.allclose(out, f, atol=5e-2, rtol=5e-2)

    print("KERNEL_OK")
</pallas_src>

<mosaic_0001>
module attributes {stable_mosaic.version = 11 : i64} {
  func.func @mlp_kernel(%arg0: i32, %arg1: memref<16x784xf32, #tpu.memory_space<vmem>>, %arg2: memref<784x896xbf16, #tpu.memory_space<vmem>>, %arg3: memref<1x896xf32, #tpu.memory_space<vmem>>, %arg4: memref<896x896xbf16, #tpu.memory_space<vmem>>, %arg5: memref<1x896xf32, #tpu.memory_space<vmem>>, %arg6: memref<896x128xbf16, #tpu.memory_space<vmem>>, %arg7: memref<1x128xf32, #tpu.memory_space<vmem>>, %arg8: memref<16x128xbf16, #tpu.memory_space<vmem>>) attributes {dimension_semantics = [#tpu.dimension_semantics<parallel>], iteration_bounds = array<i64: 1>, scalar_prefetch = 0 : i64, scratch_operands = 0 : i64, tpu.core_type = #tpu.core_type<tc>, window_params = [{transform_indices = @transform_0, window_bounds = array<i64: 16, 784>}, {pipeline_mode = #tpu.pipeline_mode<synchronous>, transform_indices = @transform_1, window_bounds = array<i64: 784, 896>}, {pipeline_mode = #tpu.pipeline_mode<synchronous>, transform_indices = @transform_2, window_bounds = array<i64: 1, 896>}, {pipeline_mode = #tpu.pipeline_mode<synchronous>, transform_indices = @transform_3, window_bounds = array<i64: 896, 896>}, {pipeline_mode = #tpu.pipeline_mode<synchronous>, transform_indices = @transform_4, window_bounds = array<i64: 1, 896>}, {pipeline_mode = #tpu.pipeline_mode<synchronous>, transform_indices = @transform_5, window_bounds = array<i64: 896, 128>}, {pipeline_mode = #tpu.pipeline_mode<synchronous>, transform_indices = @transform_6, window_bounds = array<i64: 1, 128>}, {transform_indices = @transform_7, window_bounds = array<i64: 16, 128>}]} {
    %c0 = arith.constant 0 : index
    %c0_0 = arith.constant 0 : index
    %0 = vector.load %arg1[%c0, %c0_0] : memref<16x784xf32, #tpu.memory_space<vmem>>, vector<16x784xf32>
    %1 = arith.truncf %0 : vector<16x784xf32> to vector<16x784xbf16>
    %c0_1 = arith.constant 0 : index
    %c0_2 = arith.constant 0 : index
    %2 = vector.load %arg2[%c0_1, %c0_2] : memref<784x896xbf16, #tpu.memory_space<vmem>>, vector<784x896xbf16>
    %cst = arith.constant dense<0.000000e+00> : vector<16x896xf32>
    %3 = tpu.matmul %1, %2, %cst {dimension_numbers = #tpu.dot_dimension_numbers<[1], [0], [0], [1], [0, 0, 1, 1], [], []>} : vector<16x784xbf16>, vector<784x896xbf16>, vector<16x896xf32> -> vector<16x896xf32>
    %c0_3 = arith.constant 0 : index
    %c0_4 = arith.constant 0 : index
    %4 = vector.load %arg3[%c0_3, %c0_4] : memref<1x896xf32, #tpu.memory_space<vmem>>, vector<1x896xf32>
    %5 = vector.broadcast %4 : vector<1x896xf32> to vector<16x896xf32>
    %6 = arith.addf %3, %5 : vector<16x896xf32>
    %cst_5 = arith.constant 0.000000e+00 : f32
    %7 = vector.broadcast %cst_5 : f32 to vector<16x896xf32>
    %8 = arith.maximumf %6, %7 : vector<16x896xf32>
    %9 = arith.truncf %8 : vector<16x896xf32> to vector<16x896xbf16>
    %c0_6 = arith.constant 0 : index
    %c0_7 = arith.constant 0 : index
    %10 = vector.load %arg4[%c0_6, %c0_7] : memref<896x896xbf16, #tpu.memory_space<vmem>>, vector<896x896xbf16>
    %cst_8 = arith.constant dense<0.000000e+00> : vector<16x896xf32>
    %11 = tpu.matmul %9, %10, %cst_8 {dimension_numbers = #tpu.dot_dimension_numbers<[1], [0], [0], [1], [0, 0, 1, 1], [], []>} : vector<16x896xbf16>, vector<896x896xbf16>, vector<16x896xf32> -> vector<16x896xf32>
    %c0_9 = arith.constant 0 : index
    %c0_10 = arith.constant 0 : index
    %12 = vector.load %arg5[%c0_9, %c0_10] : memref<1x896xf32, #tpu.memory_space<vmem>>, vector<1x896xf32>
    %13 = vector.broadcast %12 : vector<1x896xf32> to vector<16x896xf32>
    %14 = arith.addf %11, %13 : vector<16x896xf32>
    %cst_11 = arith.constant 0.000000e+00 : f32
    %15 = vector.broadcast %cst_11 : f32 to vector<16x896xf32>
    %16 = arith.maximumf %14, %15 : vector<16x896xf32>
    %17 = arith.truncf %16 : vector<16x896xf32> to vector<16x896xbf16>
    %c0_12 = arith.constant 0 : index
    %c0_13 = arith.constant 0 : index
    %18 = vector.load %arg6[%c0_12, %c0_13] : memref<896x128xbf16, #tpu.memory_space<vmem>>, vector<896x128xbf16>
    %cst_14 = arith.constant dense<0.000000e+00> : vector<16x128xf32>
    %19 = tpu.matmul %17, %18, %cst_14 {dimension_numbers = #tpu.dot_dimension_numbers<[1], [0], [0], [1], [0, 0, 1, 1], [], []>} : vector<16x896xbf16>, vector<896x128xbf16>, vector<16x128xf32> -> vector<16x128xf32>
    %c0_15 = arith.constant 0 : index
    %c0_16 = arith.constant 0 : index
    %20 = vector.load %arg7[%c0_15, %c0_16] : memref<1x128xf32, #tpu.memory_space<vmem>>, vector<1x128xf32>
    %21 = vector.broadcast %20 : vector<1x128xf32> to vector<16x128xf32>
    %22 = arith.addf %19, %21 : vector<16x128xf32>
    %cst_17 = arith.constant 0.000000e+00 : f32
    %23 = vector.broadcast %cst_17 : f32 to vector<16x128xf32>
    %24 = arith.maximumf %22, %23 : vector<16x128xf32>
    %25 = arith.truncf %24 : vector<16x128xf32> to vector<16x128xbf16>
    %c0_18 = arith.constant 0 : index
    %c0_19 = arith.constant 0 : index
    %26 = vector.load %arg8[%c0_18, %c0_19] : memref<16x128xbf16, #tpu.memory_space<vmem>>, vector<16x128xbf16>
    tpu.vector_store %arg8[%c0_18, %c0_19], %25 {strides = array<i32>} : memref<16x128xbf16, #tpu.memory_space<vmem>>, vector<16x128xbf16>,
    return
  }
  func.func @transform_0(%arg0: i32) -> (i32, i32) {
    %c0_i32 = arith.constant 0 : i32
    %c0_i32_0 = arith.constant 0 : i32
    return %arg0, %c0_i32 : i32, i32
  }
  func.func @transform_1(%arg0: i32) -> (i32, i32) {
    %c0_i32 = arith.constant 0 : i32
    %c0_i32_0 = arith.constant 0 : i32
    %c0_i32_1 = arith.constant 0 : i32
    return %c0_i32, %c0_i32_0 : i32, i32
  }
  func.func @transform_2(%arg0: i32) -> (i32, i32) {
    %c0_i32 = arith.constant 0 : i32
    %c0_i32_0 = arith.constant 0 : i32
    %c0_i32_1 = arith.constant 0 : i32
    return %c0_i32, %c0_i32_0 : i32, i32
  }
  func.func @transform_3(%arg0: i32) -> (i32, i32) {
    %c0_i32 = arith.constant 0 : i32
    %c0_i32_0 = arith.constant 0 : i32
    %c0_i32_1 = arith.constant 0 : i32
    return %c0_i32, %c0_i32_0 : i32, i32
  }
  func.func @transform_4(%arg0: i32) -> (i32, i32) {
    %c0_i32 = arith.constant 0 : i32
    %c0_i32_0 = arith.constant 0 : i32
    %c0_i32_1 = arith.constant 0 : i32
    return %c0_i32, %c0_i32_0 : i32, i32
  }
  func.func @transform_5(%arg0: i32) -> (i32, i32) {
    %c0_i32 = arith.constant 0 : i32
    %c0_i32_0 = arith.constant 0 : i32
    %c0_i32_1 = arith.constant 0 : i32
    return %c0_i32, %c0_i32_0 : i32, i32
  }
  func.func @transform_6(%arg0: i32) -> (i32, i32) {
    %c0_i32 = arith.constant 0 : i32
    %c0_i32_0 = arith.constant 0 : i32
    %c0_i32_1 = arith.constant 0 : i32
    return %c0_i32, %c0_i32_0 : i32, i32
  }
  func.func @transform_7(%arg0: i32) -> (i32, i32) {
    %c0_i32 = arith.constant 0 : i32
    %c0_i32_0 = arith.constant 0 : i32
    return %arg0, %c0_i32 : i32, i32
  }
}

</mosaic_0001>

<bundles_post_ra>
// kernel: mlp_forward.1
= control target key start
LH: loop header
LB: loop body
LE: loop exit
PB: predicated region body
PF: predicated region fallthrough
CT: control target
= control target key end

     0   :  { %12 = vsyncpa [#allocation3], 0  ;;  %s9643_s0 = inlined_call_operand.vmem [shape: f32[16,784], index: 0, kind: input, shape index: {}]   ;;  %s9644_s1 = inlined_call_operand.hbm [shape: bf16[784,896], index: 1, kind: input, shape index: {}]   ;;  %s9645_s2 = inlined_call_operand.hbm [shape: f32[1,896], index: 2, kind: input, shape index: {}]   ;;  %s9646_s3 = inlined_call_operand.hbm [shape: bf16[896,896], index: 3, kind: input, shape index: {}]   ;;  %s9647_s4 = inlined_call_operand.hbm [shape: f32[1,896], index: 4, kind: input, shape index: {}]   ;;  %s9648_s5 = inlined_call_operand.hbm [shape: bf16[896,128], index: 5, kind: input, shape index: {}]   ;;  %s9649_s6 = inlined_call_operand.hbm [shape: f32[1,128], index: 6, kind: input, shape index: {}]   ;;  %s9650_s7 = inlined_call_operand.vmem [shape: bf16[16,128], index: 7, kind: output, shape index: {}]  }
   0x1   :  { %13 = vsyncpa [#allocation5], 0 }
   0x2   :  { %14 = vsyncpa [#allocation8], 0 }
   0x3   :  { %15 = vsyncpa [#allocation11], 0  ;;  %s9288_s24 = smov [#allocation4]   ;;  %s9289_s26 = smov [#allocation7]  }
   0x4   :  { %s36_s25 = sshll.u32 %s9288_s24, 4  ;;  %s58_s27 = sshll.u32 %s9289_s26, 4  ;;  %s37_s25 = int_to_ptr.vmem [resolvable:$true] %s36_s25  ;;  %s59_s27 = int_to_ptr.vmem [resolvable:$true] %s58_s27 }
   0x5   :  { %s9148_s30 = scalar_lea.hbm %s9645_s2, 112 }
   0x6   :  { %p9149_p0 = scmp.ne.s32.totalorder %s9645_s2, %s9148_s30  ;;  %p9152_p1 = scmp.lt.u32.totalorder %s9148_s30, %s9645_s2 }
   0x8   :  { %p9154_p2 = pnand %p9152_p1, %p9149_p0 }
   0xa   :  { %9157 = shalt.err (!%p9154_p2)
}
   0xb   :  { %s9158_s12 = scalar_lea.vmem %s37_s25, 112  ;;  %s9162_s13 = scalar_lea.vmem %s37_s25, 128 }
   0xc   :  { %p9159_p3 = scmp.ne.s32.totalorder %s37_s25, %s9158_s12  ;;  %p9163_p4 = scmp.lt.s32.totalorder %s37_s25, %s37_s25 }
   0xd   :  { %p9164_p5 = scmp.lt.s32.totalorder %s9162_s13, %s9158_s12 }
   0xf   :  { %p9165_p6 = por %p9164_p5, %p9163_p4 }
  0x11   :  { %p9166_p7 = pnand %p9165_p6, %p9159_p3 }
  0x13   :  { %9169 = shalt.err (!%p9166_p7)
}
  0x14   :  { %39 = dma.hbm_to_vmem [thread:$0]  %s9645_s2, 112, %s37_s25, [#allocation5]  }
  0x15   :  { %s9170_s18 = scalar_lea.hbm %s9647_s4, 112 }
  0x16   :  { %p9171_p8 = scmp.ne.s32.totalorder %s9647_s4, %s9170_s18  ;;  %p9174_p9 = scmp.lt.u32.totalorder %s9170_s18, %s9647_s4 }
  0x18   :  { %p9176_p10 = pnand %p9174_p9, %p9171_p8 }
  0x1a   :  { %9179 = shalt.err (!%p9176_p10)
}
  0x1b   :  { %s9180_s23 = scalar_lea.vmem %s59_s27, 112  ;;  %s9184_s24 = scalar_lea.vmem %s59_s27, 128 }
  0x1c   :  { %p9181_p11 = scmp.ne.s32.totalorder %s59_s27, %s9180_s23  ;;  %p9185_p12 = scmp.lt.s32.totalorder %s59_s27, %s59_s27 }
  0x1d   :  { %p9186_p13 = scmp.lt.s32.totalorder %s9184_s24, %s9180_s23 }
  0x1f   :  { %p9187_p0 = por %p9186_p13, %p9185_p12 }
  0x21   :  { %p9188_p1 = pnand %p9187_p0, %p9181_p11 }
  0x23   :  { %9191 = shalt.err (!%p9188_p1)
}
  0x24   :  { %61 = dma.hbm_to_vmem [thread:$0]  %s9647_s4, 112, %s59_s27, [#allocation8]  }
  0x25   :  { %s9290_s26 = smov [#allocation2]   ;;  %s9192_s8 = scalar_lea.hbm %s9644_s1, 43904 }
  0x26   :  { %s23_s28 = sshll.u32 %s9290_s26, 4  ;;  %p9193_p2 = scmp.ne.s32.totalorder %s9644_s1, %s9192_s8  ;;  %s24_s28 = int_to_ptr.vmem [resolvable:$true] %s23_s28 }
  0x27   :  { %p9196_p3 = scmp.lt.u32.totalorder %s9192_s8, %s9644_s1 }
  0x29   :  { %p9198_p4 = pnand %p9196_p3, %p9193_p2 }
  0x2b   :  { %9201 = shalt.err (!%p9198_p4)
}
  0x2c   :  { %s9202_s13 = scalar_lea.vmem %s24_s28, 43904  ;;  %p9207_p6 = scmp.lt.s32.totalorder %s24_s28, %s24_s28 }
  0x2d   :  { %p9203_p5 = scmp.ne.s32.totalorder %s24_s28, %s9202_s13  ;;  %p9208_p7 = scmp.lt.s32.totalorder %s9202_s13, %s9202_s13 }
  0x2f   :  { %p9209_p8 = por %p9208_p7, %p9207_p6 }
  0x31   :  { %p9210_p9 = pnand %p9209_p8, %p9203_p5 }
  0x33   :  { %9213 = shalt.err (!%p9210_p9)
}
  0x34   :  { %s9291_s4 = smov 448   ;;  %s9292_s27 = smov 28  }
  0x35   :  { %29 = dma.hbm_to_vmem [thread:$0]  %s9644_s1, 43904, %s24_s28, [#allocation3], %s9291_s4, %s9291_s4, %s9292_s27  }
  0x36   :  { %s9293_s16 = smov [#allocation6]   ;;  %s9294_s18 = smov [#allocation9]  }
  0x37   :  { %s45_s17 = sshll.u32 %s9293_s16, 4  ;;  %s67_s19 = sshll.u32 %s9294_s18, 4  ;;  %s46_s17 = int_to_ptr.vmem [resolvable:$true] %s45_s17  ;;  %s68_s19 = int_to_ptr.vmem [resolvable:$true] %s67_s19 }
  0x38   :  { %s9214_s22 = scalar_lea.hbm %s9646_s3, 50176 }
  0x39   :  { %p9215_p10 = scmp.ne.s32.totalorder %s9646_s3, %s9214_s22  ;;  %p9218_p11 = scmp.lt.u32.totalorder %s9214_s22, %s9646_s3 }
  0x3b   :  { %p9220_p12 = pnand %p9218_p11, %p9215_p10 }
  0x3d   :  { %9223 = shalt.err (!%p9220_p12)
}
  0x3e   :  { %s9224_s1 = scalar_lea.vmem %s46_s17, 50176  ;;  %p9229_p0 = scmp.lt.s32.totalorder %s46_s17, %s46_s17 }
  0x3f   :  { %p9225_p13 = scmp.ne.s32.totalorder %s46_s17, %s9224_s1  ;;  %p9230_p1 = scmp.lt.s32.totalorder %s9224_s1, %s9224_s1 }
  0x41   :  { %p9231_p2 = por %p9230_p1, %p9229_p0 }
  0x43   :  { %p9232_p3 = pnand %p9231_p2, %p9225_p13 }
  0x45   :  { %9235 = shalt.err (!%p9232_p3)
}
  0x46   :  { %51 = dma.hbm_to_vmem [thread:$0]  %s9646_s3, 50176, %s46_s17, [#allocation5], %s9291_s4, %s9291_s4, %s9292_s27  }
  0x47   :  { %s9236_s8 = scalar_lea.hbm %s9648_s5, 7168 }
  0x48   :  { %p9237_p4 = scmp.ne.s32.totalorder %s9648_s5, %s9236_s8  ;;  %p9240_p5 = scmp.lt.u32.totalorder %s9236_s8, %s9648_s5 }
  0x4a   :  { %p9242_p6 = pnand %p9240_p5, %p9237_p4 }
  0x4c   :  { %9245 = shalt.err (!%p9242_p6)
}
  0x4d   :  { %s9246_s13 = scalar_lea.vmem %s68_s19, 7168  ;;  %p9251_p8 = scmp.lt.s32.totalorder %s68_s19, %s68_s19 }
  0x4e   :  { %p9247_p7 = scmp.ne.s32.totalorder %s68_s19, %s9246_s13  ;;  %p9252_p9 = scmp.lt.s32.totalorder %s9246_s13, %s9246_s13 }
  0x50   :  { %p9253_p10 = por %p9252_p9, %p9251_p8 }
  0x52   :  { %p9254_p11 = pnand %p9253_p10, %p9247_p7 }
  0x54   :  { %9257 = shalt.err (!%p9254_p11)
}
  0x55   :  { %s9295_s3 = smov 64   ;;  %s9296_s4 = smov 4  }
  0x56   :  { %73 = dma.hbm_to_vmem [thread:$0]  %s9648_s5, 7168, %s68_s19, [#allocation8], %s9295_s3, %s9295_s3, %s9296_s4  }
  0x57   :  { %s9297_s15 = smov [#allocation10]   ;;  %s9258_s20 = scalar_lea.hbm %s9649_s6, 16 }
  0x58   :  { %s80_s16 = sshll.u32 %s9297_s15, 4  ;;  %p9259_p12 = scmp.ne.s32.totalorder %s9649_s6, %s9258_s20  ;;  %s81_s16 = int_to_ptr.vmem [resolvable:$true] %s80_s16 }
  0x59   :  { %p9262_p13 = scmp.lt.u32.totalorder %s9258_s20, %s9649_s6 }
  0x5b   :  { %p9264_p0 = pnand %p9262_p13, %p9259_p12 }
  0x5d   :  { %9267 = shalt.err (!%p9264_p0)
}
  0x5e   :  { %s9268_s2 = scalar_lea.vmem %s81_s16, 16  ;;  %s9272_s5 = scalar_lea.vmem %s81_s16, 32 }
  0x5f   :  { %p9269_p1 = scmp.ne.s32.totalorder %s81_s16, %s9268_s2  ;;  %p9273_p2 = scmp.lt.s32.totalorder %s81_s16, %s81_s16 }
  0x60   :  { %p9274_p3 = scmp.lt.s32.totalorder %s9272_s5, %s9268_s2 }
  0x62   :  { %p9275_p4 = por %p9274_p3, %p9273_p2 }
  0x64   :  { %p9276_p5 = pnand %p9275_p4, %p9269_p1 }
  0x66   :  { %9279 = shalt.err (!%p9276_p5)
}
  0x67   :  { %83 = dma.hbm_to_vmem [thread:$0]  %s9649_s6, 16, %s81_s16, [#allocation11]  }
  0x68   :  { %9280 = dma.done.wait [#allocation3], 43904  }
  0x69   :  { %9281 = vsyncadd [#allocation3], 4294923392 }
  0x6a   :  { %9282 = dma.done.wait [#allocation5], 50288  }
  0x6b   :  { %9283 = vsyncadd [#allocation5], 4294917008 }
  0x6c   :  { %9284 = dma.done.wait [#allocation8], 7280  }
  0x6d   :  { %9285 = vsyncadd [#allocation8], 4294960016 }
  0x6e   :  { %9286 = dma.done.wait [#allocation11], 16  }
  0x6f   :  { %9287 = vsyncadd [#allocation11], 4294967280  ;;  %v8041_v0 = vld [vmem:[#allocation2 + $0x4] ss:$28 sps:$4 sm:$0xff]   ;;  %v8043_v1 = vld [vmem:[#allocation2 + $0xc] ss:$28 sps:$4 sm:$0xff]  }
  0x70   :  { %2321 = vmatprep.subr.bf16.mxu0 %v8041_v0  ;;  %v8045_v2 = vld [vmem:[#allocation2] ss:$28 sps:$4 sm:$0xff]   ;;  %v8046_v3 = vld [vmem:[#allocation2 + $0x8] ss:$28 sps:$4 sm:$0xff]   ;;  %2493 = vmatprep.subr.bf16.mxu1 %v8043_v1  ;;  %v8051_v6 = vld [vmem:[#allocation2 + $0x38] ss:$28 sps:$4 sm:$0xff]  }
  0x71   :  { %v8047_v4 = vld [vmem:[#allocation2 + $0x3c] ss:$28 sps:$4 sm:$0xff]   ;;  %2322 = vmatpush1.bf16.msra.mxu0 %v8045_v2  ;;  %2494 = vmatpush1.bf16.msra.mxu1 %v8046_v3  ;;  %v8049_v5 = vld [vmem:[#allocation2 + $0x44] ss:$28 sps:$4 sm:$0xff]   ;;  %v8053_v8 = vld [vmem:[#allocation2 + $0x74] ss:$28 sps:$4 sm:$0xff]  }
  0x72   :  { %2323 = vmatprep.subr.bf16.mxu0 %v8047_v4  ;;  %v8052_v7 = vld [vmem:[#allocation2 + $0x40] ss:$28 sps:$4 sm:$0xff]   ;;  %2495 = vmatprep.subr.bf16.mxu1 %v8049_v5  ;;  %v8057_v10 = vld [vmem:[#allocation2 + $0x70] ss:$28 sps:$4 sm:$0xff]   ;;  %v8058_v11 = vld [vmem:[#allocation2 + $0x78] ss:$28 sps:$4 sm:$0xff]  }
  0x73   :  { %v8055_v9 = vld [vmem:[#allocation2 + $0x7c] ss:$28 sps:$4 sm:$0xff]   ;;  %v8059_v12 = vld [vmem:[#allocation2 + $0xac] ss:$28 sps:$4 sm:$0xff]   ;;  %v8061_v13 = vld [vmem:[#allocation2 + $0xb4] ss:$28 sps:$4 sm:$0xff]  }
  0x74   :  { %v8063_v14 = vld [vmem:[#allocation2 + $0xa8] ss:$28 sps:$4 sm:$0xff]   ;;  %v8064_v15 = vld [vmem:[#allocation2 + $0xb0] ss:$28 sps:$4 sm:$0xff]   ;;  %v8069_v18 = vld [vmem:[#allocation2 + $0xe0] ss:$28 sps:$4 sm:$0xff]  }
  0x75   :  { %2324 = vmatpush1.bf16.msra.mxu0 %v8051_v6  ;;  %2496 = vmatpush1.bf16.msra.mxu1 %v8052_v7  ;;  %v8065_v16 = vld [vmem:[#allocation2 + $0xe4] ss:$28 sps:$4 sm:$0xff]   ;;  %v8067_v17 = vld [vmem:[#allocation2 + $0xec] ss:$28 sps:$4 sm:$0xff]   ;;  %v8071_v20 = vld [vmem:[#allocation2 + $0x11c] ss:$28 sps:$4 sm:$0xff]  }
  0x76   :  { %2325 = vmatprep.subr.bf16.mxu0 %v8053_v8  ;;  %2497 = vmatprep.subr.bf16.mxu1 %v8055_v9  ;;  %v8070_v19 = vld [vmem:[#allocation2 + $0xe8] ss:$28 sps:$4 sm:$0xff]   ;;  %v8075_v22 = vld [vmem:[#allocation2 + $0x118] ss:$28 sps:$4 sm:$0xff]   ;;  %v8076_v23 = vld [vmem:[#allocation2 + $0x120] ss:$28 sps:$4 sm:$0xff]  }
  0x77   :  { %v8073_v21 = vld [vmem:[#allocation2 + $0x124] ss:$28 sps:$4 sm:$0xff]   ;;  %v8077_v24 = vld [vmem:[#allocation2 + $0x154] ss:$28 sps:$4 sm:$0xff]   ;;  %v8079_v25 = vld [vmem:[#allocation2 + $0x15c] ss:$28 sps:$4 sm:$0xff]  }
  0x78   :  { %v8081_v26 = vld [vmem:[#allocation2 + $0x150] ss:$28 sps:$4 sm:$0xff]   ;;  %v8082_v27 = vld [vmem:[#allocation2 + $0x158] ss:$28 sps:$4 sm:$0xff]   ;;  %v8087_v30 = vld [vmem:[#allocation2 + $0x188] ss:$28 sps:$4 sm:$0xff]  }
  0x79   :  { %2326 = vmatpush1.bf16.msra.mxu0 %v8057_v10  ;;  %2498 = vmatpush1.bf16.msra.mxu1 %v8058_v11  ;;  %v8083_v28 = vld [vmem:[#allocation2 + $0x18c] ss:$28 sps:$4 sm:$0xff]   ;;  %v8085_v29 = vld [vmem:[#allocation2 + $0x194] ss:$28 sps:$4 sm:$0xff]   ;;  %v8089_v32 = vld [vmem:[#allocation2 + $0x1c4] ss:$28 sps:$4 sm:$0xff]  }
  0x7a   :  { %2327 = vmatprep.subr.bf16.mxu0 %v8059_v12  ;;  %2499 = vmatprep.subr.bf16.mxu1 %v8061_v13  ;;  %v8088_v31 = vld [vmem:[#allocation2 + $0x190] ss:$28 sps:$4 sm:$0xff]   ;;  %v8093_v34 = vld [vmem:[#allocation2 + $0x1c0] ss:$28 sps:$4 sm:$0xff]   ;;  %v8094_v35 = vld [vmem:[#allocation2 + $0x1c8] ss:$28 sps:$4 sm:$0xff]  }
  0x7b   :  { %v8091_v33 = vld [vmem:[#allocation2 + $0x1cc] ss:$28 sps:$4 sm:$0xff]   ;;  %v8095_v36 = vld [vmem:[#allocation2 + $0x1fc] ss:$28 sps:$4 sm:$0xff]   ;;  %v8097_v37 = vld [vmem:[#allocation2 + $0x204] ss:$28 sps:$4 sm:$0xff]  }
  0x7c   :  { %v8099_v38 = vld [vmem:[#allocation2 + $0x1f8] ss:$28 sps:$4 sm:$0xff]   ;;  %v8100_v39 = vld [vmem:[#allocation2 + $0x200] ss:$28 sps:$4 sm:$0xff]   ;;  %v8105_v42 = vld [vmem:[#allocation2 + $0x230] ss:$28 sps:$4 sm:$0xff]  }
  0x7d   :  { %2328 = vmatpush1.bf16.msra.mxu0 %v8063_v14  ;;  %2500 = vmatpush1.bf16.msra.mxu1 %v8064_v15  ;;  %v8101_v40 = vld [vmem:[#allocation2 + $0x234] ss:$28 sps:$4 sm:$0xff]   ;;  %v8103_v41 = vld [vmem:[#allocation2 + $0x23c] ss:$28 sps:$4 sm:$0xff]   ;;  %v8107_v44 = vld [vmem:[#allocation2 + $0x26c] ss:$28 sps:$4 sm:$0xff]  }
  0x7e   :  { %2329 = vmatprep.subr.bf16.mxu0 %v8065_v16  ;;  %2501 = vmatprep.subr.bf16.mxu1 %v8067_v17  ;;  %v8106_v43 = vld [vmem:[#allocation2 + $0x238] ss:$28 sps:$4 sm:$0xff]   ;;  %v104_v46 = vld [vmem:[%s9643_s0 + $0x8] sm:$0xff]  ;;  %v111_v47 = vld [vmem:[%s9643_s0 + $0x40] sm:$0xff]  ;;  %vm2317_vm0 = vcmask 130048   ;;  %vm9300_vm1 = vmmov 0  }
  0x7f   :  { %v8109_v45 = vld [vmem:[#allocation2 + $0x274] ss:$28 sps:$4 sm:$0xff]   ;;  %v8111_v48 = vld [vmem:[#allocation2 + $0x268] ss:$28 sps:$4 sm:$0xff]   ;;  %v9419_v50 = vpack.c.bf16 %v111_v47, %v104_v46  ;;  %v8117_v53 = vld [vmem:[#allocation2 + $0x2a0] ss:$28 sps:$4 sm:$0xff]  }
  0x80   :  { %v8112_v49 = vld [vmem:[#allocation2 + $0x270] ss:$28 sps:$4 sm:$0xff]   ;;  %v8113_v51 = vld [vmem:[#allocation2 + $0x2a4] ss:$28 sps:$4 sm:$0xff]   ;;  %v8119_v55 = vld [vmem:[#allocation2 + $0x2dc] ss:$28 sps:$4 sm:$0xff]  }
  0x81   :  { %2330 = vmatpush1.bf16.msra.mxu0 %v8069_v18  ;;  %2502 = vmatpush1.bf16.msra.mxu1 %v8070_v19  ;;  %v8115_v52 = vld [vmem:[#allocation2 + $0x2ac] ss:$28 sps:$4 sm:$0xff]   ;;  %v8121_v56 = vld [vmem:[#allocation2 + $0x2e4] ss:$28 sps:$4 sm:$0xff]   ;;  %v8123_v57 = vld [vmem:[#allocation2 + $0x2d8] ss:$28 sps:$4 sm:$0xff]  }
  0x82   :  { %2331 = vmatprep.subr.bf16.mxu0 %v8071_v20  ;;  %2503 = vmatprep.subr.bf16.mxu1 %v8073_v21  ;;  %v8118_v54 = vld [vmem:[#allocation2 + $0x2a8] ss:$28 sps:$4 sm:$0xff]   ;;  %v8124_v58 = vld [vmem:[#allocation2 + $0x2e0] ss:$28 sps:$4 sm:$0xff]   ;;  %v8125_v59 = vld [vmem:[#allocation2 + $0x314] ss:$28 sps:$4 sm:$0xff]  }
  0x83   :  { %2353 = vmatprep.mubr.bf16.mxu0 %v9419_v50  ;;  %2525 = vmatprep.mubr.bf16.mxu1 %v9419_v50  ;;  %v8127_v60 = vld [vmem:[#allocation2 + $0x31c] ss:$28 sps:$4 sm:$0xff]   ;;  %v8129_v61 = vld [vmem:[#allocation2 + $0x310] ss:$28 sps:$4 sm:$0xff]   ;;  %v8135_v1 = vld [vmem:[#allocation2 + $0x348] ss:$28 sps:$4 sm:$0xff]  }
  0x84   :  { %v8130_v62 = vld [vmem:[#allocation2 + $0x318] ss:$28 sps:$4 sm:$0xff]   ;;  %v8131_v63 = vld [vmem:[#allocation2 + $0x34c] ss:$28 sps:$4 sm:$0xff]   ;;  %v8139_v3 = vld [vmem:[#allocation2 + $0x384] ss:$28 sps:$4 sm:$0xff]  }
  0x85   :  { %2332 = vmatpush1.bf16.msra.mxu0 %v8075_v22  ;;  %2504 = vmatpush1.bf16.msra.mxu1 %v8076_v23  ;;  %v8133_v0 = vld [vmem:[#allocation2 + $0x354] ss:$28 sps:$4 sm:$0xff]   ;;  %v103_v4 = vld [vmem:[%s9643_s0] sm:$0xff]  ;;  %v110_v5 = vld [vmem:[%s9643_s0 + $0x38] sm:$0xff] }
  0x86   :  { %2333 = vmatprep.subr.bf16.mxu0 %v8077_v24  ;;  %2505 = vmatprep.subr.bf16.mxu1 %v8079_v25  ;;  %v8136_v2 = vld [vmem:[#allocation2 + $0x350] ss:$28 sps:$4 sm:$0xff]   ;;  %v8137_v7 = vld [vmem:[#allocation2 + $0x380] ss:$28 sps:$4 sm:$0xff]   ;;  %v8140_v8 = vld [vmem:[#allocation2 + $0x388] ss:$28 sps:$4 sm:$0xff]   ;;  %v9429_v9 = vpack.c.bf16 %v110_v5, %v103_v4 }
  0x87   :  { %v8142_v6 = vld [vmem:[#allocation2 + $0x38c] ss:$28 sps:$4 sm:$0xff]   ;;  %v8145_v10 = vld [vmem:[#allocation2 + $0x3bc] ss:$28 sps:$4 sm:$0xff]   ;;  %v8148_v11 = vld [vmem:[#allocation2 + $0x3c4] ss:$28 sps:$4 sm:$0xff]  }
  0x88   :  { %v8143_v12 = vld [vmem:[#allocation2 + $0x3b8] ss:$28 sps:$4 sm:$0xff]   ;;  %v8146_v13 = vld [vmem:[#allocation2 + $0x3c0] ss:$28 sps:$4 sm:$0xff]   ;;  %v8149_v16 = vld [vmem:[#allocation2 + $0x3f0] ss:$28 sps:$4 sm:$0xff]  }
  0x89   :  { %2334 = vmatpush1.bf16.msra.mxu0 %v8081_v26  ;;  %2506 = vmatpush1.bf16.msra.mxu1 %v8082_v27  ;;  %v8151_v14 = vld [vmem:[#allocation2 + $0x3f4] ss:$28 sps:$4 sm:$0xff]   ;;  %v8154_v15 = vld [vmem:[#allocation2 + $0x3fc] ss:$28 sps:$4 sm:$0xff]   ;;  %v8157_v18 = vld [vmem:[#allocation2 + $0x42c] ss:$28 sps:$4 sm:$0xff]  }
  0x8a   :  { %2335 = vmatprep.subr.bf16.mxu0 %v8083_v28  ;;  %2507 = vmatprep.subr.bf16.mxu1 %v8085_v29  ;;  %v8152_v17 = vld [vmem:[#allocation2 + $0x3f8] ss:$28 sps:$4 sm:$0xff]   ;;  %v8155_v20 = vld [vmem:[#allocation2 + $0x428] ss:$28 sps:$4 sm:$0xff]   ;;  %v8158_v21 = vld [vmem:[#allocation2 + $0x430] ss:$28 sps:$4 sm:$0xff]  }
  0x8b   :  { %v8160_v19 = vld [vmem:[#allocation2 + $0x434] ss:$28 sps:$4 sm:$0xff]   ;;  %v8163_v22 = vld [vmem:[#allocation2 + $0x464] ss:$28 sps:$4 sm:$0xff]   ;;  %v8166_v23 = vld [vmem:[#allocation2 + $0x46c] ss:$28 sps:$4 sm:$0xff]  }
  0x8c   :  { %v8161_v24 = vld [vmem:[#allocation2 + $0x460] ss:$28 sps:$4 sm:$0xff]   ;;  %v8164_v25 = vld [vmem:[#allocation2 + $0x468] ss:$28 sps:$4 sm:$0xff]   ;;  %v8167_v28 = vld [vmem:[#allocation2 + $0x498] ss:$28 sps:$4 sm:$0xff]  }
  0x8d   :  { %2336 = vmatpush1.bf16.msra.mxu0 %v8087_v30  ;;  %2508 = vmatpush1.bf16.msra.mxu1 %v8088_v31  ;;  %v8169_v26 = vld [vmem:[#allocation2 + $0x49c] ss:$28 sps:$4 sm:$0xff]   ;;  %v8172_v27 = vld [vmem:[#allocation2 + $0x4a4] ss:$28 sps:$4 sm:$0xff]   ;;  %v8175_v30 = vld [vmem:[#allocation2 + $0x4d4] ss:$28 sps:$4 sm:$0xff]  }
  0x8e   :  { %2337 = vmatprep.subr.bf16.mxu0 %v8089_v32  ;;  %2509 = vmatprep.subr.bf16.mxu1 %v8091_v33  ;;  %v8170_v29 = vld [vmem:[#allocation2 + $0x4a0] ss:$28 sps:$4 sm:$0xff]   ;;  %v113_v33 = vld [vmem:[%s9643_s0 + $0x50] sm:$0xff] }
  0x8f   :  { %v8178_v31 = vld [vmem:[#allocation2 + $0x4dc] ss:$28 sps:$4 sm:$0xff]   ;;  %v8196_v46 = vld [vmem:[#allocation2 + $0x584] ss:$28 sps:$4 sm:$0xff]   ;;  %v8221_v4 = vld [vmem:[#allocation2 + $0x690] ss:$28 sps:$4 sm:$0xff]  }
  0x90   :  { %v106_v32 = vld [vmem:[%s9643_s0 + $0x18] sm:$0xff] }
  0x91   :  { %2338 = vmatpush1.bf16.msra.mxu0 %v8093_v34  ;;  %2510 = vmatpush1.bf16.msra.mxu1 %v8094_v35  ;;  %v8173_v34 = vld [vmem:[#allocation2 + $0x4d0] ss:$28 sps:$4 sm:$0xff]   ;;  %v8176_v35 = vld [vmem:[#allocation2 + $0x4d8] ss:$28 sps:$4 sm:$0xff]  }
  0x92   :  { %2339 = vmatprep.subr.bf16.mxu0 %v8095_v36  ;;  %2511 = vmatprep.subr.bf16.mxu1 %v8097_v37  ;;  %v9439_v36 = vpack.c.bf16 %v113_v33, %v106_v32  ;;  %v8181_v37 = vld [vmem:[#allocation2 + $0x50c] ss:$28 sps:$4 sm:$0xff]   ;;  %v8191_v47 = vld [vmem:[#allocation2 + $0x578] ss:$28 sps:$4 sm:$0xff]   ;;  %v8259_v33 = vld [vmem:[#allocation2 + $0x7e4] ss:$28 sps:$4 sm:$0xff]  }
  0x93   :  { %v8224_v5 = vld [vmem:[#allocation2 + $0x698] ss:$28 sps:$4 sm:$0xff]   ;;  %v8254_v32 = vld [vmem:[#allocation2 + $0x7b0] ss:$28 sps:$4 sm:$0xff]  }
  0x95   :  { %2340 = vmatpush1.bf16.msra.mxu0 %v8099_v38  ;;  %2512 = vmatpush1.bf16.msra.mxu1 %v8100_v39  ;;  %v8184_v38 = vld [vmem:[#allocation2 + $0x514] ss:$28 sps:$4 sm:$0xff]   ;;  %v8179_v39 = vld [vmem:[#allocation2 + $0x508] ss:$28 sps:$4 sm:$0xff]  }
  0x96   :  { %2341 = vmatprep.subr.bf16.mxu0 %v8101_v40  ;;  %2513 = vmatprep.subr.bf16.mxu1 %v8103_v41  ;;  %v8182_v40 = vld [vmem:[#allocation2 + $0x510] ss:$28 sps:$4 sm:$0xff]   ;;  %v8187_v41 = vld [vmem:[#allocation2 + $0x544] ss:$28 sps:$4 sm:$0xff]  }
  0x99   :  { %2342 = vmatpush1.bf16.msra.mxu0 %v8105_v42  ;;  %2514 = vmatpush1.bf16.msra.mxu1 %v8106_v43  ;;  %v8190_v42 = vld [vmem:[#allocation2 + $0x54c] ss:$28 sps:$4 sm:$0xff]   ;;  %v8185_v43 = vld [vmem:[#allocation2 + $0x540] ss:$28 sps:$4 sm:$0xff]  }
  0x9a   :  { %2343 = vmatprep.subr.bf16.mxu0 %v8107_v44  ;;  %2515 = vmatprep.subr.bf16.mxu1 %v8109_v45  ;;  %v8188_v44 = vld [vmem:[#allocation2 + $0x548] ss:$28 sps:$4 sm:$0xff]   ;;  %v8193_v45 = vld [vmem:[#allocation2 + $0x57c] ss:$28 sps:$4 sm:$0xff]  }
  0x9d   :  { %2344 = vmatpush1.bf16.msra.mxu0 %v8111_v48  ;;  %2516 = vmatpush1.bf16.msra.mxu1 %v8112_v49  ;;  %v8194_v48 = vld [vmem:[#allocation2 + $0x580] ss:$28 sps:$4 sm:$0xff]   ;;  %v8199_v49 = vld [vmem:[#allocation2 + $0x5b4] ss:$28 sps:$4 sm:$0xff]  }
  0x9e   :  { %2345 = vmatprep.subr.bf16.mxu0 %v8113_v51  ;;  %2517 = vmatprep.subr.bf16.mxu1 %v8115_v52  ;;  %v8202_v51 = vld [vmem:[#allocation2 + $0x5bc] ss:$28 sps:$4 sm:$0xff]   ;;  %v8197_v52 = vld [vmem:[#allocation2 + $0x5b0] ss:$28 sps:$4 sm:$0xff]  }
  0xa1   :  { %2346 = vmatpush1.bf16.msra.mxu0 %v8117_v53  ;;  %2518 = vmatpush1.bf16.msra.mxu1 %v8118_v54  ;;  %v8200_v53 = vld [vmem:[#allocation2 + $0x5b8] ss:$28 sps:$4 sm:$0xff]   ;;  %v8205_v54 = vld [vmem:[#allocation2 + $0x5ec] ss:$28 sps:$4 sm:$0xff]  }
  0xa2   :  { %2347 = vmatprep.subr.bf16.mxu0 %v8119_v55  ;;  %2519 = vmatprep.subr.bf16.mxu1 %v8121_v56  ;;  %v8208_v55 = vld [vmem:[#allocation2 + $0x5f4] ss:$28 sps:$4 sm:$0xff]   ;;  %v8203_v56 = vld [vmem:[#allocation2 + $0x5e8] ss:$28 sps:$4 sm:$0xff]  }
  0xa5   :  { %2348 = vmatpush1.bf16.msra.mxu0 %v8123_v57  ;;  %2520 = vmatpush1.bf16.msra.mxu1 %v8124_v58  ;;  %v8206_v57 = vld [vmem:[#allocation2 + $0x5f0] ss:$28 sps:$4 sm:$0xff]   ;;  %v8211_v58 = vld [vmem:[#allocation2 + $0x624] ss:$28 sps:$4 sm:$0xff]  }
  0xa6   :  { %2349 = vmatprep.subr.bf16.mxu0 %v8125_v59  ;;  %2521 = vmatprep.subr.bf16.mxu1 %v8127_v60  ;;  %v8214_v59 = vld [vmem:[#allocation2 + $0x62c] ss:$28 sps:$4 sm:$0xff]   ;;  %v8209_v60 = vld [vmem:[#allocation2 + $0x620] ss:$28 sps:$4 sm:$0xff]  }
  0xa9   :  { %2350 = vmatpush1.bf16.msra.mxu0 %v8129_v61  ;;  %2522 = vmatpush1.bf16.msra.mxu1 %v8130_v62  ;;  %v8212_v61 = vld [vmem:[#allocation2 + $0x628] ss:$28 sps:$4 sm:$0xff]   ;;  %v8217_v62 = vld [vmem:[#allocation2 + $0x65c] ss:$28 sps:$4 sm:$0xff]  }
  0xaa   :  { %2351 = vmatprep.subr.bf16.mxu0 %v8131_v63  ;;  %2523 = vmatprep.subr.bf16.mxu1 %v8133_v0  ;;  %v8220_v63 = vld [vmem:[#allocation2 + $0x664] ss:$28 sps:$4 sm:$0xff]   ;;  %v8215_v0 = vld [vmem:[#allocation2 + $0x658] ss:$28 sps:$4 sm:$0xff]  }
  0xad   :  { %2352 = vmatpush1.bf16.msra.mxu0 %v8135_v1  ;;  %2524 = vmatpush1.bf16.msra.mxu1 %v8136_v2  ;;  %v8218_v1 = vld [vmem:[#allocation2 + $0x660] ss:$28 sps:$4 sm:$0xff]   ;;  %v8223_v2 = vld [vmem:[#allocation2 + $0x694] ss:$28 sps:$4 sm:$0xff]  }
  0xae   :  { %2364 = vmatprep.subr.bf16.mxu0 %v8139_v3  ;;  %2536 = vmatprep.subr.bf16.mxu1 %v8142_v6  ;;  %v8226_v3 = vld [vmem:[#allocation2 + $0x69c] ss:$28 sps:$4 sm:$0xff]   ;;  %v8229_v6 = vld [vmem:[#allocation2 + $0x6cc] ss:$28 sps:$4 sm:$0xff]  }
  0xb0   :  { %2354 = vmatmul.mubr.bf16.vlgmr.msra.gmra.mrb[0].mxu0 %v9429_v9  ;;  %2526 = vmatmul.mubr.bf16.vlgmr.msra.gmra.mrb[0].mxu1 %v9429_v9 }
  0xb1   :  { %2365 = vmatpush1.bf16.msra.mxu0 %v8137_v7  ;;  %2537 = vmatpush1.bf16.msra.mxu1 %v8140_v8  ;;  %v8232_v7 = vld [vmem:[#allocation2 + $0x6d4] ss:$28 sps:$4 sm:$0xff]   ;;  %v8227_v8 = vld [vmem:[#allocation2 + $0x6c8] ss:$28 sps:$4 sm:$0xff]  }
  0xb2   :  { %2366 = vmatprep.subr.bf16.mxu0 %v8145_v10  ;;  %2538 = vmatprep.subr.bf16.mxu1 %v8148_v11  ;;  %v8230_v10 = vld [vmem:[#allocation2 + $0x6d0] ss:$28 sps:$4 sm:$0xff]   ;;  %v8235_v11 = vld [vmem:[#allocation2 + $0x704] ss:$28 sps:$4 sm:$0xff]  }
  0xb3   :  { %2396 = vmatprep.mubr.bf16.mxu0 %v9439_v36  ;;  %2568 = vmatprep.mubr.bf16.mxu1 %v9439_v36 }
  0xb5   :  { %2367 = vmatpush1.bf16.msra.mxu0 %v8143_v12  ;;  %2539 = vmatpush1.bf16.msra.mxu1 %v8146_v13  ;;  %v105_v12 = vld [vmem:[%s9643_s0 + $0x10] sm:$0xff]  ;;  %v112_v13 = vld [vmem:[%s9643_s0 + $0x48] sm:$0xff] }
  0xb6   :  { %2368 = vmatprep.subr.bf16.mxu0 %v8151_v14  ;;  %2540 = vmatprep.subr.bf16.mxu1 %v8154_v15  ;;  %v8238_v14 = vld [vmem:[#allocation2 + $0x70c] ss:$28 sps:$4 sm:$0xff]   ;;  %v8233_v15 = vld [vmem:[#allocation2 + $0x700] ss:$28 sps:$4 sm:$0xff]  }
  0xb9   :  { %2369 = vmatpush1.bf16.msra.mxu0 %v8149_v16  ;;  %2541 = vmatpush1.bf16.msra.mxu1 %v8152_v17  ;;  %v8236_v16 = vld [vmem:[#allocation2 + $0x708] ss:$28 sps:$4 sm:$0xff]   ;;  %v9449_v17 = vpack.c.bf16 %v112_v13, %v105_v12  ;;  %v8319_v12 = vld [vmem:[#allocation2 + $0xa14] ss:$28 sps:$4 sm:$0xff]   ;;  %v8322_v13 = vld [vmem:[#allocation2 + $0xa1c] ss:$28 sps:$4 sm:$0xff]  }
  0xba   :  { %2370 = vmatprep.subr.bf16.mxu0 %v8157_v18  ;;  %2542 = vmatprep.subr.bf16.mxu1 %v8160_v19  ;;  %v8241_v18 = vld [vmem:[#allocation2 + $0x73c] ss:$28 sps:$4 sm:$0xff]   ;;  %v8244_v19 = vld [vmem:[#allocation2 + $0x744] ss:$28 sps:$4 sm:$0xff]  }
  0xbd   :  { %2371 = vmatpush1.bf16.msra.mxu0 %v8155_v20  ;;  %2543 = vmatpush1.bf16.msra.mxu1 %v8158_v21  ;;  %v108_v20 = vld [vmem:[%s9643_s0 + $0x28] sm:$0xff]  ;;  %v8239_v21 = vld [vmem:[#allocation2 + $0x738] ss:$28 sps:$4 sm:$0xff]  }
  0xbe   :  { %2372 = vmatprep.subr.bf16.mxu0 %v8163_v22  ;;  %2544 = vmatprep.subr.bf16.mxu1 %v8166_v23  ;;  %v8242_v22 = vld [vmem:[#allocation2 + $0x740] ss:$28 sps:$4 sm:$0xff]  }
  0xbf   :  { %v115_v23 = vld [vmem:[%s9643_s0 + $0x60] sm:$0xff] }
  0xc1   :  { %2373 = vmatpush1.bf16.msra.mxu0 %v8161_v24  ;;  %2545 = vmatpush1.bf16.msra.mxu1 %v8164_v25  ;;  %v8247_v24 = vld [vmem:[#allocation2 + $0x774] ss:$28 sps:$4 sm:$0xff]   ;;  %v9459_v25 = vpack.c.bf16 %v115_v23, %v108_v20  ;;  %v8331_v23 = vld [vmem:[#allocation2 + $0xa84] ss:$28 sps:$4 sm:$0xff]  }
  0xc2   :  { %2374 = vmatprep.subr.bf16.mxu0 %v8169_v26  ;;  %2546 = vmatprep.subr.bf16.mxu1 %v8172_v27  ;;  %v8250_v26 = vld [vmem:[#allocation2 + $0x77c] ss:$28 sps:$4 sm:$0xff]   ;;  %v8245_v27 = vld [vmem:[#allocation2 + $0x770] ss:$28 sps:$4 sm:$0xff]  }
  0xc3   :  { %v8326_v20 = vld [vmem:[#allocation2 + $0xa50] ss:$28 sps:$4 sm:$0xff]  }
  0xc5   :  { %2375 = vmatpush1.bf16.msra.mxu0 %v8167_v28  ;;  %2547 = vmatpush1.bf16.msra.mxu1 %v8170_v29  ;;  %v8248_v28 = vld [vmem:[#allocation2 + $0x778] ss:$28 sps:$4 sm:$0xff]   ;;  %v8253_v29 = vld [vmem:[#allocation2 + $0x7ac] ss:$28 sps:$4 sm:$0xff]  }
  0xc6   :  { %2376 = vmatprep.subr.bf16.mxu0 %v8175_v30  ;;  %2548 = vmatprep.subr.bf16.mxu1 %v8178_v31  ;;  %v8256_v30 = vld [vmem:[#allocation2 + $0x7b4] ss:$28 sps:$4 sm:$0xff]   ;;  %v8251_v31 = vld [vmem:[#allocation2 + $0x7a8] ss:$28 sps:$4 sm:$0xff]  }
  0xc9   :  { %2377 = vmatpush1.bf16.msra.mxu0 %v8173_v34  ;;  %2549 = vmatpush1.bf16.msra.mxu1 %v8176_v35  ;;  %v8262_v34 = vld [vmem:[#allocation2 + $0x7ec] ss:$28 sps:$4 sm:$0xff]   ;;  %v8257_v35 = vld [vmem:[#allocation2 + $0x7e0] ss:$28 sps:$4 sm:$0xff]  }
  0xca   :  { %2378 = vmatprep.subr.bf16.mxu0 %v8181_v37  ;;  %2550 = vmatprep.subr.bf16.mxu1 %v8184_v38  ;;  %v8260_v37 = vld [vmem:[#allocation2 + $0x7e8] ss:$28 sps:$4 sm:$0xff]   ;;  %v8265_v38 = vld [vmem:[#allocation2 + $0x81c] ss:$28 sps:$4 sm:$0xff]  }
  0xcd   :  { %2379 = vmatpush1.bf16.msra.mxu0 %v8179_v39  ;;  %2551 = vmatpush1.bf16.msra.mxu1 %v8182_v40  ;;  %v8268_v39 = vld [vmem:[#allocation2 + $0x824] ss:$28 sps:$4 sm:$0xff]   ;;  %v8263_v40 = vld [vmem:[#allocation2 + $0x818] ss:$28 sps:$4 sm:$0xff]  }
  0xce   :  { %2380 = vmatprep.subr.bf16.mxu0 %v8187_v41  ;;  %2552 = vmatprep.subr.bf16.mxu1 %v8190_v42  ;;  %v8266_v41 = vld [vmem:[#allocation2 + $0x820] ss:$28 sps:$4 sm:$0xff]   ;;  %v8271_v42 = vld [vmem:[#allocation2 + $0x854] ss:$28 sps:$4 sm:$0xff]  }
  0xd1   :  { %2381 = vmatpush1.bf16.msra.mxu0 %v8185_v43  ;;  %2553 = vmatpush1.bf16.msra.mxu1 %v8188_v44  ;;  %v8274_v43 = vld [vmem:[#allocation2 + $0x85c] ss:$28 sps:$4 sm:$0xff]   ;;  %v8269_v44 = vld [vmem:[#allocation2 + $0x850] ss:$28 sps:$4 sm:$0xff]  }
  0xd2   :  { %2382 = vmatprep.subr.bf16.mxu0 %v8193_v45  ;;  %2554 = vmatprep.subr.bf16.mxu1 %v8196_v46  ;;  %v8272_v45 = vld [vmem:[#allocation2 + $0x858] ss:$28 sps:$4 sm:$0xff]   ;;  %v8277_v46 = vld [vmem:[#allocation2 + $0x88c] ss:$28 sps:$4 sm:$0xff]  }
  0xd5   :  { %2383 = vmatpush1.bf16.msra.mxu0 %v8191_v47  ;;  %2555 = vmatpush1.bf16.msra.mxu1 %v8194_v48  ;;  %v8280_v47 = vld [vmem:[#allocation2 + $0x894] ss:$28 sps:$4 sm:$0xff]   ;;  %v8275_v48 = vld [vmem:[#allocation2 + $0x888] ss:$28 sps:$4 sm:$0xff]  }
  0xd6   :  { %2384 = vmatprep.subr.bf16.mxu0 %v8199_v49  ;;  %2556 = vmatprep.subr.bf16.mxu1 %v8202_v51  ;;  %v8278_v49 = vld [vmem:[#allocation2 + $0x890] ss:$28 sps:$4 sm:$0xff]   ;;  %v8283_v51 = vld [vmem:[#allocation2 + $0x8c4] ss:$28 sps:$4 sm:$0xff]  }
  0xd9   :  { %2385 = vmatpush1.bf16.msra.mxu0 %v8197_v52  ;;  %2557 = vmatpush1.bf16.msra.mxu1 %v8200_v53  ;;  %v8286_v52 = vld [vmem:[#allocation2 + $0x8cc] ss:$28 sps:$4 sm:$0xff]   ;;  %v8281_v53 = vld [vmem:[#allocation2 + $0x8c0] ss:$28 sps:$4 sm:$0xff]  }
  0xda   :  { %2386 = vmatprep.subr.bf16.mxu0 %v8205_v54  ;;  %2558 = vmatprep.subr.bf16.mxu1 %v8208_v55  ;;  %v8284_v54 = vld [vmem:[#allocation2 + $0x8c8] ss:$28 sps:$4 sm:$0xff]   ;;  %v8289_v55 = vld [vmem:[#allocation2 + $0x8fc] ss:$28 sps:$4 sm:$0xff]  }
  0xdd   :  { %2387 = vmatpush1.bf16.msra.mxu0 %v8203_v56  ;;  %2559 = vmatpush1.bf16.msra.mxu1 %v8206_v57  ;;  %v8292_v56 = vld [vmem:[#allocation2 + $0x904] ss:$28 sps:$4 sm:$0xff]   ;;  %v8287_v57 = vld [vmem:[#allocation2 + $0x8f8] ss:$28 sps:$4 sm:$0xff]  }
  0xde   :  { %2388 = vmatprep.subr.bf16.mxu0 %v8211_v58  ;;  %2560 = vmatprep.subr.bf16.mxu1 %v8214_v59  ;;  %v8290_v58 = vld [vmem:[#allocation2 + $0x900] ss:$28 sps:$4 sm:$0xff]   ;;  %v8295_v59 = vld [vmem:[#allocation2 + $0x934] ss:$28 sps:$4 sm:$0xff]  }
  0xe1   :  { %2389 = vmatpush1.bf16.msra.mxu0 %v8209_v60  ;;  %2561 = vmatpush1.bf16.msra.mxu1 %v8212_v61  ;;  %v8298_v60 = vld [vmem:[#allocation2 + $0x93c] ss:$28 sps:$4 sm:$0xff]   ;;  %v8293_v61 = vld [vmem:[#allocation2 + $0x930] ss:$28 sps:$4 sm:$0xff]  }
  0xe2   :  { %2390 = vmatprep.subr.bf16.mxu0 %v8217_v62  ;;  %2562 = vmatprep.subr.bf16.mxu1 %v8220_v63  ;;  %v8296_v62 = vld [vmem:[#allocation2 + $0x938] ss:$28 sps:$4 sm:$0xff]   ;;  %v8301_v63 = vld [vmem:[#allocation2 + $0x96c] ss:$28 sps:$4 sm:$0xff]  }
  0xe5   :  { %2391 = vmatpush1.bf16.msra.mxu0 %v8215_v0  ;;  %2563 = vmatpush1.bf16.msra.mxu1 %v8218_v1  ;;  %v8304_v0 = vld [vmem:[#allocation2 + $0x974] ss:$28 sps:$4 sm:$0xff]   ;;  %v8299_v1 = vld [vmem:[#allocation2 + $0x968] ss:$28 sps:$4 sm:$0xff]  }
  0xe6   :  { %2392 = vmatprep.subr.bf16.mxu0 %v8223_v2  ;;  %2564 = vmatprep.subr.bf16.mxu1 %v8226_v3  ;;  %v8302_v2 = vld [vmem:[#allocation2 + $0x970] ss:$28 sps:$4 sm:$0xff]   ;;  %v8307_v3 = vld [vmem:[#allocation2 + $0x9a4] ss:$28 sps:$4 sm:$0xff]  }
  0xe9   :  { %2393 = vmatpush1.bf16.msra.mxu0 %v8221_v4  ;;  %2565 = vmatpush1.bf16.msra.mxu1 %v8224_v5  ;;  %v8310_v4 = vld [vmem:[#allocation2 + $0x9ac] ss:$28 sps:$4 sm:$0xff]   ;;  %v8305_v5 = vld [vmem:[#allocation2 + $0x9a0] ss:$28 sps:$4 sm:$0xff]  }
  0xea   :  { %2394 = vmatprep.subr.bf16.mxu0 %v8229_v6  ;;  %2566 = vmatprep.subr.bf16.mxu1 %v8232_v7  ;;  %v8308_v6 = vld [vmem:[#allocation2 + $0x9a8] ss:$28 sps:$4 sm:$0xff]   ;;  %v8313_v7 = vld [vmem:[#allocation2 + $0x9dc] ss:$28 sps:$4 sm:$0xff]  }
  0xed   :  { %2395 = vmatpush1.bf16.msra.mxu0 %v8227_v8  ;;  %2567 = vmatpush1.bf16.msra.mxu1 %v8230_v10  ;;  %v8316_v8 = vld [vmem:[#allocation2 + $0x9e4] ss:$28 sps:$4 sm:$0xff]   ;;  %v8311_v10 = vld [vmem:[#allocation2 + $0x9d8] ss:$28 sps:$4 sm:$0xff]  }
  0xee   :  { %2407 = vmatprep.subr.bf16.mxu0 %v8235_v11  ;;  %2579 = vmatprep.subr.bf16.mxu1 %v8238_v14  ;;  %v8314_v11 = vld [vmem:[#allocation2 + $0x9e0] ss:$28 sps:$4 sm:$0xff]   ;;  %v8317_v14 = vld [vmem:[#allocation2 + $0xa10] ss:$28 sps:$4 sm:$0xff]  }
  0xf0   :  { %2397 = vmatmul.mubr.bf16.vlgmr.msra.gmra.mrb[0].mxu0 %v9449_v17  ;;  %2569 = vmatmul.mubr.bf16.vlgmr.msra.gmra.mrb[0].mxu1 %v9449_v17 }
  0xf1   :  { %2408 = vmatpush1.bf16.msra.mxu0 %v8233_v15  ;;  %2580 = vmatpush1.bf16.msra.mxu1 %v8236_v16  ;;  %v8320_v15 = vld [vmem:[#allocation2 + $0xa18] ss:$28 sps:$4 sm:$0xff]   ;;  %v8325_v16 = vld [vmem:[#allocation2 + $0xa4c] ss:$28 sps:$4 sm:$0xff]  }
  0xf2   :  { %2409 = vmatprep.subr.bf16.mxu0 %v8241_v18  ;;  %2581 = vmatprep.subr.bf16.mxu1 %v8244_v19  ;;  %v8328_v18 = vld [vmem:[#allocation2 + $0xa54] ss:$28 sps:$4 sm:$0xff]   ;;  %v8323_v19 = vld [vmem:[#allocation2 + $0xa48] ss:$28 sps:$4 sm:$0xff]  }
  0xf3   :  { %2439 = vmatprep.mubr.bf16.mxu0 %v9459_v25  ;;  %2611 = vmatprep.mubr.bf16.mxu1 %v9459_v25 }
  0xf5   :  { %2410 = vmatpush1.bf16.msra.mxu0 %v8239_v21  ;;  %2582 = vmatpush1.bf16.msra.mxu1 %v8242_v22  ;;  %v107_v21 = vld [vmem:[%s9643_s0 + $0x20] sm:$0xff]  ;;  %v114_v22 = vld [vmem:[%s9643_s0 + $0x58] sm:$0xff] }
  0xf6   :  { %2411 = vmatprep.subr.bf16.mxu0 %v8247_v24  ;;  %2583 = vmatprep.subr.bf16.mxu1 %v8250_v26  ;;  %v8334_v24 = vld [vmem:[#allocation2 + $0xa8c] ss:$28 sps:$4 sm:$0xff]   ;;  %v9469_v26 = vpack.c.bf16 %v114_v22, %v107_v21  ;;  %v8437_v21 = vld [vmem:[#allocation2 + $0x638] ss:$28 sps:$4 sm:$0xff]  }
  0xf7   :  { %v8371_v22 = vld [vmem:[#allocation2 + $0x2b0] ss:$28 sps:$4 sm:$0xff]  }
  0xf9   :  { %2412 = vmatpush1.bf16.msra.mxu0 %v8245_v27  ;;  %2584 = vmatpush1.bf16.msra.mxu1 %v8248_v28  ;;  %v8329_v27 = vld [vmem:[#allocation2 + $0xa80] ss:$28 sps:$4 sm:$0xff]   ;;  %v8332_v28 = vld [vmem:[#allocation2 + $0xa88] ss:$28 sps:$4 sm:$0xff]  }
  0xfa   :  { %2413 = vmatprep.subr.bf16.mxu0 %v8253_v29  ;;  %2585 = vmatprep.subr.bf16.mxu1 %v8256_v30  ;;  %v8337_v29 = vld [vmem:[#allocation2 + $0x14] ss:$28 sps:$4 sm:$0xff]  }
  0xfb   :  { %v8377_v30 = vld [vmem:[#allocation2 + $0x1d8] ss:$28 sps:$4 sm:$0xff]  }
  0xfd   :  { %2414 = vmatpush1.bf16.msra.mxu0 %v8251_v31  ;;  %2586 = vmatpush1.bf16.msra.mxu1 %v8254_v32  ;;  %v9298_v31 = vmov 0   ;;  %v109_v32 = vld [vmem:[%s9643_s0 + $0x30] sm:$0xff] }
  0xfe   :  { %2415 = vmatprep.subr.bf16.mxu0 %v8259_v33  ;;  %2587 = vmatprep.subr.bf16.mxu1 %v8262_v34  ;;  %v116_v33 = vld [vmem:[%s9643_s0 + $0x68] sm:$0xff] }
  0xff   :  { %v8335_v34 = vld [vmem:[#allocation2 + $0x10] ss:$28 sps:$4 sm:$0xff]  }
 0x101   :  { %2416 = vmatpush1.bf16.msra.mxu0 %v8257_v35  ;;  %2588 = vmatpush1.bf16.msra.mxu1 %v8260_v37  ;;  %v9481_v35 = vpack.c.bf16 %v116_v33, %v109_v32  ;;  %v8340_v37 = vld [vmem:[#allocation2 + $0x4c] ss:$28 sps:$4 sm:$0xff]   ;;  %v8378_v33 = vld [vmem:[#allocation2 + $0x320] ss:$28 sps:$4 sm:$0xff]  }
 0x102   :  { %2417 = vmatprep.subr.bf16.mxu0 %v8265_v38  ;;  %2589 = vmatprep.subr.bf16.mxu1 %v8268_v39  ;;  %v8381_v38 = vld [vmem:[#allocation2 + $0x18] ss:$28 sps:$4 sm:$0xff]   ;;  %v8382_v39 = vld [vmem:[#allocation2 + $0x210] ss:$28 sps:$4 sm:$0xff]   ;;  %v8447_v32 = vld [vmem:[#allocation2 + $0x6a8] ss:$28 sps:$4 sm:$0xff]  }
 0x105   :  { %2418 = vmatpush1.bf16.msra.mxu0 %v8263_v40  ;;  %2590 = vmatpush1.bf16.msra.mxu1 %v8266_v41  ;;  %v8338_v40 = vld [vmem:[#allocation2 + $0x48] ss:$28 sps:$4 sm:$0xff]   ;;  %v8386_v41 = vld [vmem:[#allocation2 + $0x50] ss:$28 sps:$4 sm:$0xff]  }
 0x106   :  { %2419 = vmatprep.subr.bf16.mxu0 %v8271_v42  ;;  %2591 = vmatprep.subr.bf16.mxu1 %v8274_v43  ;;  %v8343_v42 = vld [vmem:[#allocation2 + $0x84] ss:$28 sps:$4 sm:$0xff]  }
 0x107   :  { %v8387_v43 = vld [vmem:[#allocation2 + $0x248] ss:$28 sps:$4 sm:$0xff]  }
 0x109   :  { %2420 = vmatpush1.bf16.msra.mxu0 %v8269_v44  ;;  %2592 = vmatpush1.bf16.msra.mxu1 %v8272_v45  ;;  %v8341_v44 = vld [vmem:[#allocation2 + $0x80] ss:$28 sps:$4 sm:$0xff]  }
 0x10a   :  { %2421 = vmatprep.subr.bf16.mxu0 %v8277_v46  ;;  %2593 = vmatprep.subr.bf16.mxu1 %v8280_v47  ;;  %v8346_v45 = vld [vmem:[#allocation2 + $0xbc] ss:$28 sps:$4 sm:$0xff]   ;;  %v8391_v46 = vld [vmem:[#allocation2 + $0x88] ss:$28 sps:$4 sm:$0xff]  }
 0x10b   :  { %v8392_v47 = vld [vmem:[#allocation2 + $0x280] ss:$28 sps:$4 sm:$0xff]  }
 0x10d   :  { %2422 = vmatpush1.bf16.msra.mxu0 %v8275_v48  ;;  %2594 = vmatpush1.bf16.msra.mxu1 %v8278_v49  ;;  %v8344_v48 = vld [vmem:[#allocation2 + $0xb8] ss:$28 sps:$4 sm:$0xff]  }
 0x10e   :  { %2423 = vmatprep.subr.bf16.mxu0 %v8283_v51  ;;  %2595 = vmatprep.subr.bf16.mxu1 %v8286_v52  ;;  %v8349_v49 = vld [vmem:[#allocation2 + $0xf4] ss:$28 sps:$4 sm:$0xff]   ;;  %v8396_v51 = vld [vmem:[#allocation2 + $0xc0] ss:$28 sps:$4 sm:$0xff]  }
 0x10f   :  { %v8397_v52 = vld [vmem:[#allocation2 + $0x2b8] ss:$28 sps:$4 sm:$0xff]  }
 0x111   :  { %2424 = vmatpush1.bf16.msra.mxu0 %v8281_v53  ;;  %2596 = vmatpush1.bf16.msra.mxu1 %v8284_v54  ;;  %v8347_v53 = vld [vmem:[#allocation2 + $0xf0] ss:$28 sps:$4 sm:$0xff]  }
 0x112   :  { %2425 = vmatprep.subr.bf16.mxu0 %v8289_v55  ;;  %2597 = vmatprep.subr.bf16.mxu1 %v8292_v56  ;;  %v8352_v54 = vld [vmem:[#allocation2 + $0x12c] ss:$28 sps:$4 sm:$0xff]  }
 0x113   :  { %v8402_v55 = vld [vmem:[#allocation2 + $0x2f0] ss:$28 sps:$4 sm:$0xff]   ;;  %v8350_v56 = vld [vmem:[#allocation2 + $0x128] ss:$28 sps:$4 sm:$0xff]  }
 0x115   :  { %2426 = vmatpush1.bf16.msra.mxu0 %v8287_v57  ;;  %2598 = vmatpush1.bf16.msra.mxu1 %v8290_v58  ;;  %v8355_v57 = vld [vmem:[#allocation2 + $0x164] ss:$28 sps:$4 sm:$0xff]   ;;  %v8406_v58 = vld [vmem:[#allocation2 + $0x130] ss:$28 sps:$4 sm:$0xff]  }
 0x116   :  { %2427 = vmatprep.subr.bf16.mxu0 %v8295_v59  ;;  %2599 = vmatprep.subr.bf16.mxu1 %v8298_v60  ;;  %v8407_v59 = vld [vmem:[#allocation2 + $0x328] ss:$28 sps:$4 sm:$0xff]   ;;  %v8353_v60 = vld [vmem:[#allocation2 + $0x160] ss:$28 sps:$4 sm:$0xff]  }
 0x119   :  { %2428 = vmatpush1.bf16.msra.mxu0 %v8293_v61  ;;  %2600 = vmatpush1.bf16.msra.mxu1 %v8296_v62  ;;  %v8411_v61 = vld [vmem:[#allocation2 + $0x168] ss:$28 sps:$4 sm:$0xff]   ;;  %v8358_v62 = vld [vmem:[#allocation2 + $0x19c] ss:$28 sps:$4 sm:$0xff]  }
 0x11a   :  { %2429 = vmatprep.subr.bf16.mxu0 %v8301_v63  ;;  %2601 = vmatprep.subr.bf16.mxu1 %v8304_v0  ;;  %v8412_v63 = vld [vmem:[#allocation2 + $0x360] ss:$28 sps:$4 sm:$0xff]   ;;  %v8356_v0 = vld [vmem:[#allocation2 + $0x198] ss:$28 sps:$4 sm:$0xff]  }
 0x11d   :  { %2430 = vmatpush1.bf16.msra.mxu0 %v8299_v1  ;;  %2602 = vmatpush1.bf16.msra.mxu1 %v8302_v2  ;;  %v8361_v1 = vld [vmem:[#allocation2 + $0x1d4] ss:$28 sps:$4 sm:$0xff]   ;;  %v8416_v2 = vld [vmem:[#allocation2 + $0x1a0] ss:$28 sps:$4 sm:$0xff]  }
 0x11e   :  { %2431 = vmatprep.subr.bf16.mxu0 %v8307_v3  ;;  %2603 = vmatprep.subr.bf16.mxu1 %v8310_v4  ;;  %v8417_v3 = vld [vmem:[#allocation2 + $0x558] ss:$28 sps:$4 sm:$0xff]   ;;  %v8359_v4 = vld [vmem:[#allocation2 + $0x1d0] ss:$28 sps:$4 sm:$0xff]  }
 0x121   :  { %2432 = vmatpush1.bf16.msra.mxu0 %v8305_v5  ;;  %2604 = vmatpush1.bf16.msra.mxu1 %v8308_v6  ;;  %v8421_v5 = vld [vmem:[#allocation2 + $0x398] ss:$28 sps:$4 sm:$0xff]   ;;  %v8364_v6 = vld [vmem:[#allocation2 + $0x20c] ss:$28 sps:$4 sm:$0xff]  }
 0x122   :  { %2433 = vmatprep.subr.bf16.mxu0 %v8313_v7  ;;  %2605 = vmatprep.subr.bf16.mxu1 %v8316_v8  ;;  %v8422_v7 = vld [vmem:[#allocation2 + $0x590] ss:$28 sps:$4 sm:$0xff]   ;;  %v8362_v8 = vld [vmem:[#allocation2 + $0x208] ss:$28 sps:$4 sm:$0xff]  }
 0x125   :  { %2434 = vmatpush1.bf16.msra.mxu0 %v8311_v10  ;;  %2606 = vmatpush1.bf16.msra.mxu1 %v8314_v11  ;;  %v8426_v10 = vld [vmem:[#allocation2 + $0x3d0] ss:$28 sps:$4 sm:$0xff]   ;;  %v8367_v11 = vld [vmem:[#allocation2 + $0x244] ss:$28 sps:$4 sm:$0xff]  }
 0x126   :  { %2435 = vmatprep.subr.bf16.mxu0 %v8319_v12  ;;  %2607 = vmatprep.subr.bf16.mxu1 %v8322_v13  ;;  %v8427_v12 = vld [vmem:[#allocation2 + $0x5c8] ss:$28 sps:$4 sm:$0xff]   ;;  %v8365_v13 = vld [vmem:[#allocation2 + $0x240] ss:$28 sps:$4 sm:$0xff]  }
 0x129   :  { %2436 = vmatpush1.bf16.msra.mxu0 %v8317_v14  ;;  %2608 = vmatpush1.bf16.msra.mxu1 %v8320_v15  ;;  %v8431_v14 = vld [vmem:[#allocation2 + $0x408] ss:$28 sps:$4 sm:$0xff]   ;;  %v8370_v15 = vld [vmem:[#allocation2 + $0x27c] ss:$28 sps:$4 sm:$0xff]  }
 0x12a   :  { %2437 = vmatprep.subr.bf16.mxu0 %v8325_v16  ;;  %2609 = vmatprep.subr.bf16.mxu1 %v8328_v18  ;;  %v8432_v16 = vld [vmem:[#allocation2 + $0x600] ss:$28 sps:$4 sm:$0xff]   ;;  %v8368_v18 = vld [vmem:[#allocation2 + $0x278] ss:$28 sps:$4 sm:$0xff]  }
 0x12d   :  { %2438 = vmatpush1.bf16.msra.mxu0 %v8323_v19  ;;  %2610 = vmatpush1.bf16.msra.mxu1 %v8326_v20  ;;  %v8373_v19 = vld [vmem:[#allocation2 + $0x2b4] ss:$28 sps:$4 sm:$0xff]   ;;  %v8436_v20 = vld [vmem:[#allocation2 + $0x440] ss:$28 sps:$4 sm:$0xff]  }
 0x12e   :  { %2450 = vmatprep.subr.bf16.mxu0 %v8331_v23  ;;  %2622 = vmatprep.subr.bf16.mxu1 %v8334_v24  ;;  %v8376_v23 = vld [vmem:[#allocation2 + $0x2ec] ss:$28 sps:$4 sm:$0xff]   ;;  %v8441_v24 = vld [vmem:[#allocation2 + $0x478] ss:$28 sps:$4 sm:$0xff]  }
 0x130   :  { %2440 = vmatmul.mubr.bf16.vlgmr.msra.gmra.mrb[0].mxu0 %v9469_v26  ;;  %2612 = vmatmul.mubr.bf16.vlgmr.msra.gmra.mrb[0].mxu1 %v9469_v26 }
 0x131   :  { %2451 = vmatpush1.bf16.msra.mxu0 %v8329_v27  ;;  %2623 = vmatpush1.bf16.msra.mxu1 %v8332_v28  ;;  %v8442_v27 = vld [vmem:[#allocation2 + $0x670] ss:$28 sps:$4 sm:$0xff]   ;;  %v8374_v28 = vld [vmem:[#allocation2 + $0x2e8] ss:$28 sps:$4 sm:$0xff]  }
 0x132   :  { %2482 = vmatprep.mubr.bf16.mxu0 %v9298_v31  ;;  %2654 = vmatprep.mubr.bf16.mxu1 %v9298_v31 }
 0x133   :  { %2665 = vmatprep.subr.bf16.mxu0 %v8337_v29  ;;  %7668 = vmatprep.subr.bf16.mxu1 %v8377_v30  ;;  %v8380_v29 = vld [vmem:[#allocation2 + $0x324] ss:$28 sps:$4 sm:$0xff]   ;;  %v8446_v30 = vld [vmem:[#allocation2 + $0x4b0] ss:$28 sps:$4 sm:$0xff]  }
 0x13c   :  { %7206 = vmatmul.mubr.msk.bf16.vlgmr.msra.gmra.mrb[0].mxu0 %vm2317_vm0, %v9481_v35  ;;  %7207 = vmatmul.mubr.msk.bf16.vlgmr.msra.gmra.mrb[0].mxu1 %vm2317_vm0, %v9481_v35 }
 0x13d   :  { %2666 = vmatpush1.bf16.msra.mxu0 %v8335_v34  ;;  %7669 = vmatpush3.bf16.msra.mxu1 %v8381_v38  ;;  %v8385_v34 = vld [vmem:[#allocation2 + $0x35c] ss:$28 sps:$4 sm:$0xff]  }
 0x13e   :  { %2667 = vmatprep.subr.bf16.mxu0 %v8340_v37  ;;  %7670 = vmatprep.subr.bf16.mxu1 %v8382_v39  ;;  %v8451_v37 = vld [vmem:[#allocation2 + $0x4e8] ss:$28 sps:$4 sm:$0xff]   ;;  %v8452_v38 = vld [vmem:[#allocation2 + $0x6e0] ss:$28 sps:$4 sm:$0xff]   ;;  %v8383_v39 = vld [vmem:[#allocation2 + $0x358] ss:$28 sps:$4 sm:$0xff]  }
 0x13f   :  { %2697 = vmatprep.mubr.bf16.mxu0 %v9419_v50  ;;  %2869 = vmatprep.mubr.bf16.mxu1 %v9419_v50  ;;  %v8401_v50 = vld [vmem:[#allocation2 + $0xf8] ss:$28 sps:$4 sm:$0xff]  }
 0x141   :  { %2668 = vmatpush1.bf16.msra.mxu0 %v8338_v40  ;;  %7671 = vmatpush3.bf16.msra.mxu1 %v8386_v41  ;;  %v8390_v40 = vld [vmem:[#allocation2 + $0x394] ss:$28 sps:$4 sm:$0xff]   ;;  %v8456_v41 = vld [vmem:[#allocation2 + $0x520] ss:$28 sps:$4 sm:$0xff]  }
 0x142   :  { %2669 = vmatprep.subr.bf16.mxu0 %v8343_v42  ;;  %7672 = vmatprep.subr.bf16.mxu1 %v8387_v43  ;;  %v8457_v42 = vld [vmem:[#allocation2 + $0x8d8] ss:$28 sps:$4 sm:$0xff]   ;;  %v8388_v43 = vld [vmem:[#allocation2 + $0x390] ss:$28 sps:$4 sm:$0xff]  }
 0x145   :  { %2670 = vmatpush1.bf16.msra.mxu0 %v8341_v44  ;;  %7673 = vmatpush3.bf16.msra.mxu1 %v8391_v46  ;;  %v8395_v44 = vld [vmem:[#allocation2 + $0x3cc] ss:$28 sps:$4 sm:$0xff]  }
 0x146   :  { %2671 = vmatprep.subr.bf16.mxu0 %v8346_v45  ;;  %7674 = vmatprep.subr.bf16.mxu1 %v8392_v47  ;;  %v8461_v45 = vld [vmem:[#allocation2 + $0x718] ss:$28 sps:$4 sm:$0xff]   ;;  %v8462_v46 = vld [vmem:[#allocation2 + $0x910] ss:$28 sps:$4 sm:$0xff]   ;;  %v8393_v47 = vld [vmem:[#allocation2 + $0x3c8] ss:$28 sps:$4 sm:$0xff]  }
 0x149   :  { %2672 = vmatpush1.bf16.msra.mxu0 %v8344_v48  ;;  %7675 = vmatpush3.bf16.msra.mxu1 %v8396_v51  ;;  %v8466_v48 = vld [vmem:[#allocation2 + $0x750] ss:$28 sps:$4 sm:$0xff]   ;;  %v8467_v51 = vld [vmem:[#allocation2 + $0x948] ss:$28 sps:$4 sm:$0xff]  }
 0x14a   :  { %2673 = vmatprep.subr.bf16.mxu0 %v8349_v49  ;;  %7676 = vmatprep.subr.bf16.mxu1 %v8397_v52  ;;  %v8400_v49 = vld [vmem:[#allocation2 + $0x404] ss:$28 sps:$4 sm:$0xff]  }
 0x14b   :  { %v8398_v52 = vld [vmem:[#allocation2 + $0x400] ss:$28 sps:$4 sm:$0xff]  }
 0x14d   :  { %2674 = vmatpush1.bf16.msra.mxu0 %v8347_v53  ;;  %7677 = vmatpush3.bf16.msra.mxu1 %v8401_v50  ;;  %v8471_v53 = vld [vmem:[#allocation2 + $0x788] ss:$28 sps:$4 sm:$0xff]   ;;  %v8472_v50 = vld [vmem:[#allocation2 + $0x980] ss:$28 sps:$4 sm:$0xff]  }
 0x14e   :  { %2675 = vmatprep.subr.bf16.mxu0 %v8352_v54  ;;  %7678 = vmatprep.subr.bf16.mxu1 %v8402_v55  ;;  %v8405_v54 = vld [vmem:[#allocation2 + $0x43c] ss:$28 sps:$4 sm:$0xff]  }
 0x14f   :  { %v8476_v55 = vld [vmem:[#allocation2 + $0x7c0] ss:$28 sps:$4 sm:$0xff]  }
 0x151   :  { %2676 = vmatpush1.bf16.msra.mxu0 %v8350_v56  ;;  %7679 = vmatpush3.bf16.msra.mxu1 %v8406_v58  ;;  %v8410_v56 = vld [vmem:[#allocation2 + $0x474] ss:$28 sps:$4 sm:$0xff]  }
 0x152   :  { %2677 = vmatprep.subr.bf16.mxu0 %v8355_v57  ;;  %7680 = vmatprep.subr.bf16.mxu1 %v8407_v59  ;;  %v8477_v57 = vld [vmem:[#allocation2 + $0x9b8] ss:$28 sps:$4 sm:$0xff]   ;;  %v8408_v58 = vld [vmem:[#allocation2 + $0x470] ss:$28 sps:$4 sm:$0xff]  }
 0x153   :  { %v8481_v59 = vld [vmem:[#allocation2 + $0x7f8] ss:$28 sps:$4 sm:$0xff]  }
 0x155   :  { %2678 = vmatpush1.bf16.msra.mxu0 %v8353_v60  ;;  %7681 = vmatpush3.bf16.msra.mxu1 %v8411_v61  ;;  %v8482_v60 = vld [vmem:[#allocation2 + $0x9f0] ss:$28 sps:$4 sm:$0xff]   ;;  %v8413_v61 = vld [vmem:[#allocation2 + $0x4a8] ss:$28 sps:$4 sm:$0xff]  }
 0x156   :  { %2679 = vmatprep.subr.bf16.mxu0 %v8358_v62  ;;  %7682 = vmatprep.subr.bf16.mxu1 %v8412_v63  ;;  %v8486_v62 = vld [vmem:[#allocation2 + $0x830] ss:$28 sps:$4 sm:$0xff]   ;;  %v8420_v63 = vld [vmem:[#allocation2 + $0x4e4] ss:$28 sps:$4 sm:$0xff]  }
 0x159   :  { %2680 = vmatpush1.bf16.msra.mxu0 %v8356_v0  ;;  %7683 = vmatpush3.bf16.msra.mxu1 %v8416_v2  ;;  %v8487_v0 = vld [vmem:[#allocation2 + $0xa28] ss:$28 sps:$4 sm:$0xff]  }
 0x15a   :  { %2681 = vmatprep.subr.bf16.mxu0 %v8361_v1  ;;  %7690 = vmatprep.subr.bf16.mxu1 %v8417_v3  ;;  %v8418_v1 = vld [vmem:[#allocation2 + $0x4e0] ss:$28 sps:$4 sm:$0xff]   ;;  %v8491_v2 = vld [vmem:[#allocation2 + $0x868] ss:$28 sps:$4 sm:$0xff]  }
 0x15b   :  { %v8425_v3 = vld [vmem:[#allocation2 + $0x51c] ss:$28 sps:$4 sm:$0xff]  }
 0x15c   :  { %2870 = vmatmul.mubr.bf16.vlgmr.msra.gmra.mrb[4].mxu1 %v9429_v9 }
 0x15d   :  { %2682 = vmatpush1.bf16.msra.mxu0 %v8359_v4  ;;  %7691 = vmatpush3.bf16.msra.mxu1 %v8421_v5  ;;  %v8492_v4 = vld [vmem:[#allocation2 + $0xa60] ss:$28 sps:$4 sm:$0xff]   ;;  %v8423_v5 = vld [vmem:[#allocation2 + $0x518] ss:$28 sps:$4 sm:$0xff]  }
 0x15e   :  { %2683 = vmatprep.subr.bf16.mxu0 %v8364_v6  ;;  %7692 = vmatprep.subr.bf16.mxu1 %v8422_v7  ;;  %v8496_v6 = vld [vmem:[#allocation2 + $0x8a0] ss:$28 sps:$4 sm:$0xff]   ;;  %v8430_v7 = vld [vmem:[#allocation2 + $0x554] ss:$28 sps:$4 sm:$0xff]  }
 0x15f   :  { %2910 = vmatprep.mubr.bf16.mxu1 %v9439_v36 }
 0x161   :  { %2684 = vmatpush1.bf16.msra.mxu0 %v8362_v8  ;;  %7693 = vmatpush3.bf16.msra.mxu1 %v8426_v10  ;;  %v8428_v8 = vld [vmem:[#allocation2 + $0x550] ss:$28 sps:$4 sm:$0xff]   ;;  %v8500_v10 = vld [vmem:[#allocation2 + $0xa98] ss:$28 sps:$4 sm:$0xff]  }
 0x162   :  { %2685 = vmatprep.subr.bf16.mxu0 %v8367_v11  ;;  %7694 = vmatprep.subr.bf16.mxu1 %v8427_v12  ;;  %v8435_v11 = vld [vmem:[#allocation2 + $0x58c] ss:$28 sps:$4 sm:$0xff]   ;;  %v9299_v12 = vmov 0.0  }
 0x165   :  { %2686 = vmatpush1.bf16.msra.mxu0 %v8365_v13  ;;  %7695 = vmatpush3.bf16.msra.mxu1 %v8431_v14  ;;  %v8506_v13 = vld [vmem:[#allocation6 + $0x4] ss:$28 sps:$4 sm:$0xff]  }
 0x166   :  { %2687 = vmatprep.subr.bf16.mxu0 %v8370_v15  ;;  %7696 = vmatprep.subr.bf16.mxu1 %v8432_v16  ;;  %v8433_v14 = vld [vmem:[#allocation2 + $0x588] ss:$28 sps:$4 sm:$0xff]   ;;  %v8438_v16 = vld [vmem:[#allocation2 + $0x5c0] ss:$28 sps:$4 sm:$0xff]  }
 0x167   :  { %v8440_v15 = vld [vmem:[#allocation2 + $0x5c4] ss:$28 sps:$4 sm:$0xff]  }
 0x169   :  { %2688 = vmatpush1.bf16.msra.mxu0 %v8368_v18  ;;  %7697 = vmatpush3.bf16.msra.mxu1 %v8436_v20  ;;  %v8445_v18 = vld [vmem:[#allocation2 + $0x5fc] ss:$28 sps:$4 sm:$0xff]  }
 0x16a   :  { %2689 = vmatprep.subr.bf16.mxu0 %v8373_v19  ;;  %7698 = vmatprep.subr.bf16.mxu1 %v8437_v21  ;;  %v8504_v19 = vld [vmem:[#allocation6] ss:$28 sps:$4 sm:$0xff]   ;;  %v8443_v21 = vld [vmem:[#allocation2 + $0x5f8] ss:$28 sps:$4 sm:$0xff]  }
 0x16b   :  { %v8512_v20 = vld [vmem:[#allocation6 + $0x3c] ss:$28 sps:$4 sm:$0xff]  }
 0x16d   :  { %2690 = vmatpush1.bf16.msra.mxu0 %v8371_v22  ;;  %7699 = vmatpush3.bf16.msra.mxu1 %v8441_v24  ;;  %v8450_v22 = vld [vmem:[#allocation2 + $0x634] ss:$28 sps:$4 sm:$0xff]  }
 0x16e   :  { %2691 = vmatprep.subr.bf16.mxu0 %v8376_v23  ;;  %7700 = vmatprep.subr.bf16.mxu1 %v8442_v27  ;;  %v8510_v23 = vld [vmem:[#allocation6 + $0x38] ss:$28 sps:$4 sm:$0xff]   ;;  %v8448_v27 = vld [vmem:[#allocation2 + $0x630] ss:$28 sps:$4 sm:$0xff]  }
 0x16f   :  { %v8518_v24 = vld [vmem:[#allocation6 + $0x74] ss:$28 sps:$4 sm:$0xff]  }
 0x171   :  { %2692 = vmatpush1.bf16.msra.mxu0 %v8374_v28  ;;  %7701 = vmatpush3.bf16.msra.mxu1 %v8446_v30  ;;  %v8455_v28 = vld [vmem:[#allocation2 + $0x66c] ss:$28 sps:$4 sm:$0xff]  }
 0x172   :  { %2693 = vmatprep.subr.bf16.mxu0 %v8380_v29  ;;  %7702 = vmatprep.subr.bf16.mxu1 %v8447_v32  ;;  %v8516_v29 = vld [vmem:[#allocation6 + $0x70] ss:$28 sps:$4 sm:$0xff]   ;;  %v8453_v32 = vld [vmem:[#allocation2 + $0x668] ss:$28 sps:$4 sm:$0xff]  }
 0x173   :  { %v8524_v30 = vld [vmem:[#allocation6 + $0xac] ss:$28 sps:$4 sm:$0xff]  }
 0x175   :  { %2694 = vmatpush1.bf16.msra.mxu0 %v8378_v33  ;;  %7703 = vmatpush3.bf16.msra.mxu1 %v8451_v37  ;;  %v8460_v33 = vld [vmem:[#allocation2 + $0x6a4] ss:$28 sps:$4 sm:$0xff]  }
 0x176   :  { %2695 = vmatprep.subr.bf16.mxu0 %v8385_v34  ;;  %7704 = vmatprep.subr.bf16.mxu1 %v8452_v38  ;;  %v8522_v34 = vld [vmem:[#allocation6 + $0xa8] ss:$28 sps:$4 sm:$0xff]   ;;  %v8458_v38 = vld [vmem:[#allocation2 + $0x6a0] ss:$28 sps:$4 sm:$0xff]  }
 0x177   :  { %v8530_v37 = vld [vmem:[#allocation6 + $0xe4] ss:$28 sps:$4 sm:$0xff]  }
 0x179   :  { %2696 = vmatpush1.bf16.msra.mxu0 %v8383_v39  ;;  %7705 = vmatpush3.bf16.msra.mxu1 %v8456_v41  ;;  %v8465_v39 = vld [vmem:[#allocation2 + $0x6dc] ss:$28 sps:$4 sm:$0xff]  }
 0x17a   :  { %2708 = vmatprep.subr.bf16.mxu0 %v8390_v40  ;;  %7712 = vmatprep.subr.bf16.mxu1 %v8457_v42  ;;  %v8528_v40 = vld [vmem:[#allocation6 + $0xe0] ss:$28 sps:$4 sm:$0xff]   ;;  %v8463_v42 = vld [vmem:[#allocation2 + $0x6d8] ss:$28 sps:$4 sm:$0xff]  }
 0x17b   :  { %v8536_v41 = vld [vmem:[#allocation6 + $0x11c] ss:$28 sps:$4 sm:$0xff]  }
 0x17c   :  { %2698 = vmatmul.mubr.bf16.vlgmr.msra.gmra.mrb[4].mxu0 %v9429_v9  ;;  %2911 = vmatmul.mubr.bf16.vlgmr.msra.gmra.mrb[8].mxu1 %v9449_v17  ;;  %v8403_v9 = vld [vmem:[#allocation2 + $0x438] ss:$28 sps:$4 sm:$0xff]  }
 0x17d   :  { %2709 = vmatpush1.bf16.msra.mxu0 %v8388_v43  ;;  %7713 = vmatpush3.bf16.msra.mxu1 %v8461_v45  ;;  %v8470_v43 = vld [vmem:[#allocation2 + $0x714] ss:$28 sps:$4 sm:$0xff]  }
 0x17e   :  { %2710 = vmatprep.subr.bf16.mxu0 %v8395_v44  ;;  %7714 = vmatprep.subr.bf16.mxu1 %v8462_v46  ;;  %v8534_v44 = vld [vmem:[#allocation6 + $0x118] ss:$28 sps:$4 sm:$0xff]   ;;  %v8468_v46 = vld [vmem:[#allocation2 + $0x710] ss:$28 sps:$4 sm:$0xff]  }
 0x17f   :  { %2740 = vmatprep.mubr.bf16.mxu0 %v9439_v36  ;;  %2951 = vmatprep.mubr.bf16.mxu1 %v9459_v25  ;;  %v8415_v36 = vld [vmem:[#allocation2 + $0x4ac] ss:$28 sps:$4 sm:$0xff]   ;;  %v8542_v45 = vld [vmem:[#allocation6 + $0x154] ss:$28 sps:$4 sm:$0xff]  }
 0x181   :  { %2711 = vmatpush1.bf16.msra.mxu0 %v8393_v47  ;;  %7715 = vmatpush3.bf16.msra.mxu1 %v8466_v48  ;;  %v8475_v47 = vld [vmem:[#allocation2 + $0x74c] ss:$28 sps:$4 sm:$0xff]  }
 0x182   :  { %2712 = vmatprep.subr.bf16.mxu0 %v8400_v49  ;;  %7716 = vmatprep.subr.bf16.mxu1 %v8467_v51  ;;  %v8540_v48 = vld [vmem:[#allocation6 + $0x150] ss:$28 sps:$4 sm:$0xff]   ;;  %v8473_v51 = vld [vmem:[#allocation2 + $0x748] ss:$28 sps:$4 sm:$0xff]  }
 0x183   :  { %v8548_v49 = vld [vmem:[#allocation6 + $0x18c] ss:$28 sps:$4 sm:$0xff]  }
 0x185   :  { %2713 = vmatpush1.bf16.msra.mxu0 %v8398_v52  ;;  %7717 = vmatpush3.bf16.msra.mxu1 %v8471_v53  ;;  %v8480_v52 = vld [vmem:[#allocation2 + $0x784] ss:$28 sps:$4 sm:$0xff]  }
 0x186   :  { %2714 = vmatprep.subr.bf16.mxu0 %v8405_v54  ;;  %7718 = vmatprep.subr.bf16.mxu1 %v8472_v50  ;;  %v8546_v53 = vld [vmem:[#allocation6 + $0x188] ss:$28 sps:$4 sm:$0xff]   ;;  %v8478_v50 = vld [vmem:[#allocation2 + $0x780] ss:$28 sps:$4 sm:$0xff]  }
 0x187   :  { %v8554_v54 = vld [vmem:[#allocation6 + $0x1c4] ss:$28 sps:$4 sm:$0xff]  }
 0x189   :  { %2715 = vmatpush1.bf16.msra.mxu0 %v8403_v9  ;;  %7719 = vmatpush3.bf16.msra.mxu1 %v8476_v55  ;;  %v8485_v9 = vld [vmem:[#allocation2 + $0x7bc] ss:$28 sps:$4 sm:$0xff]  }
 0x18a   :  { %2716 = vmatprep.subr.bf16.mxu0 %v8410_v56  ;;  %7720 = vmatprep.subr.bf16.mxu1 %v8477_v57  ;;  %v8552_v55 = vld [vmem:[#allocation6 + $0x1c0] ss:$28 sps:$4 sm:$0xff]   ;;  %v8483_v57 = vld [vmem:[#allocation2 + $0x7b8] ss:$28 sps:$4 sm:$0xff]  }
 0x18b   :  { %v8560_v56 = vld [vmem:[#allocation6 + $0x1fc] ss:$28 sps:$4 sm:$0xff]  }
 0x18d   :  { %2717 = vmatpush1.bf16.msra.mxu0 %v8408_v58  ;;  %7721 = vmatpush3.bf16.msra.mxu1 %v8481_v59  ;;  %v8558_v58 = vld [vmem:[#allocation6 + $0x1f8] ss:$28 sps:$4 sm:$0xff]   ;;  %v8488_v59 = vld [vmem:[#allocation2 + $0x7f0] ss:$28 sps:$4 sm:$0xff]  }
 0x18e   :  { %2718 = vmatprep.subr.bf16.mxu0 %v8415_v36  ;;  %7722 = vmatprep.subr.bf16.mxu1 %v8482_v60  ;;  %v8563_v36 = vld [vmem:[#allocation6 + $0x234] ss:$28 sps:$4 sm:$0xff]   ;;  %v8495_v60 = vld [vmem:[#allocation2 + $0x82c] ss:$28 sps:$4 sm:$0xff]  }
 0x191   :  { %2719 = vmatpush1.bf16.msra.mxu0 %v8413_v61  ;;  %7723 = vmatpush3.bf16.msra.mxu1 %v8486_v62  ;;  %v8566_v61 = vld [vmem:[#allocation6 + $0x26c] ss:$28 sps:$4 sm:$0xff]  }
 0x192   :  { %2720 = vmatprep.subr.bf16.mxu0 %v8420_v63  ;;  %7724 = vmatprep.subr.bf16.mxu1 %v8487_v0  ;;  %v8493_v62 = vld [vmem:[#allocation2 + $0x828] ss:$28 sps:$4 sm:$0xff]  }
 0x193   :  { %v8499_v63 = vld [vmem:[#allocation2 + $0x864] ss:$28 sps:$4 sm:$0xff]  }
 0x194   :  { %v8564_v0 = vld [vmem:[#allocation6 + $0x268] ss:$28 sps:$4 sm:$0xff]  }
 0x195   :  { %2721 = vmatpush1.bf16.msra.mxu0 %v8418_v1  ;;  %7725 = vmatpush3.bf16.msra.mxu1 %v8491_v2  ;;  %v8572_v1 = vld [vmem:[#allocation6 + $0x2a4] ss:$28 sps:$4 sm:$0xff]  }
 0x196   :  { %2722 = vmatprep.subr.bf16.mxu0 %v8425_v3  ;;  %7726 = vmatprep.subr.bf16.mxu1 %v8492_v4  ;;  %v8497_v2 = vld [vmem:[#allocation2 + $0x860] ss:$28 sps:$4 sm:$0xff]  }
 0x197   :  { %v8503_v3 = vld [vmem:[#allocation2 + $0x89c] ss:$28 sps:$4 sm:$0xff]  }
 0x198   :  { %v8570_v4 = vld [vmem:[#allocation6 + $0x2a0] ss:$28 sps:$4 sm:$0xff]  }
 0x199   :  { %2723 = vmatpush1.bf16.msra.mxu0 %v8423_v5  ;;  %7727 = vmatpush3.bf16.msra.mxu1 %v8496_v6  ;;  %v8578_v5 = vld [vmem:[#allocation6 + $0x2dc] ss:$28 sps:$4 sm:$0xff]  }
 0x19a   :  { %2724 = vmatprep.subr.bf16.mxu0 %v8430_v7  ;;  %7886 = vmatprep.subr.bf16.mxu1 %v9299_v12  ;;  %v8501_v6 = vld [vmem:[#allocation2 + $0x898] ss:$28 sps:$4 sm:$0xff]  }
 0x19b   :  { %v8509_v7 = vld [vmem:[#allocation2 + $0x8d4] ss:$28 sps:$4 sm:$0xff]  }
 0x19c   :  { %2952 = vmatmul.mubr.bf16.vlgmr.msra.gmra.mrb[12].mxu1 %v9469_v26 }
 0x19d   :  { %2725 = vmatpush1.bf16.msra.mxu0 %v8428_v8  ;;  %7887 = vmatpush3.bf16.msra.mxu1 %v8500_v10  ;;  %v8576_v8 = vld [vmem:[#allocation6 + $0x2d8] ss:$28 sps:$4 sm:$0xff]  }
 0x19e   :  { %2726 = vmatprep.subr.bf16.mxu0 %v8435_v11  ;;  %7888 = vmatprep.mubr.msk.bf16.mxu1 %vm9300_vm1, %v9299_v12  ;;  %v8584_v10 = vld [vmem:[#allocation6 + $0x314] ss:$28 sps:$4 sm:$0xff]  }
 0x19f   :  { %5523 = vmatprep.subr.bf16.mxu1 %v8506_v13  ;;  %v8507_v11 = vld [vmem:[#allocation2 + $0x8d0] ss:$28 sps:$4 sm:$0xff]  }
 0x1a0   :  { %v8582_v13 = vld [vmem:[#allocation6 + $0x310] ss:$28 sps:$4 sm:$0xff]  }
 0x1a1   :  { %2727 = vmatpush1.bf16.msra.mxu0 %v8433_v14  ;;  %v8515_v14 = vld [vmem:[#allocation2 + $0x90c] ss:$28 sps:$4 sm:$0xff]  }
 0x1a2   :  { %2728 = vmatprep.subr.bf16.mxu0 %v8440_v15  ;;  %v8590_v15 = vld [vmem:[#allocation6 + $0x34c] ss:$28 sps:$4 sm:$0xff]  }
 0x1a4   :  { %7889 = vmatmul.mubr.msk.bf16.vlgmr.msra.gmra.mrb[16].mxu1 %vm2317_vm0, %v9481_v35 }
 0x1a5   :  { %2729 = vmatpush1.bf16.msra.mxu0 %v8438_v16  ;;  %5524 = vmatpush1.bf16.msra.mxu1 %v8504_v19  ;;  %v8513_v16 = vld [vmem:[#allocation2 + $0x908] ss:$28 sps:$4 sm:$0xff]  }
 0x1a6   :  { %2730 = vmatprep.subr.bf16.mxu0 %v8445_v18  ;;  %5525 = vmatprep.subr.bf16.mxu1 %v8512_v20  ;;  %v8521_v18 = vld [vmem:[#allocation2 + $0x944] ss:$28 sps:$4 sm:$0xff]  }
 0x1a7   :  { %v8588_v19 = vld [vmem:[#allocation6 + $0x348] ss:$28 sps:$4 sm:$0xff]  }
 0x1a8   :  { %v8596_v20 = vld [vmem:[#allocation6 + $0x384] ss:$28 sps:$4 sm:$0xff]  }
 0x1a9   :  { %2731 = vmatpush1.bf16.msra.mxu0 %v8443_v21  ;;  %5526 = vmatpush1.bf16.msra.mxu1 %v8510_v23  ;;  %v8519_v21 = vld [vmem:[#allocation2 + $0x940] ss:$28 sps:$4 sm:$0xff]   ;;  %v8525_v23 = vld [vmem:[#allocation2 + $0x978] ss:$28 sps:$4 sm:$0xff]  }
 0x1aa   :  { %2732 = vmatprep.subr.bf16.mxu0 %v8450_v22  ;;  %5527 = vmatprep.subr.bf16.mxu1 %v8518_v24  ;;  %v8527_v22 = vld [vmem:[#allocation2 + $0x97c] ss:$28 sps:$4 sm:$0xff]   ;;  %v8533_v24 = vld [vmem:[#allocation2 + $0x9b4] ss:$28 sps:$4 sm:$0xff]  }
 0x1ad   :  { %2733 = vmatpush1.bf16.msra.mxu0 %v8448_v27  ;;  %5528 = vmatpush1.bf16.msra.mxu1 %v8516_v29  ;;  %v8531_v27 = vld [vmem:[#allocation2 + $0x9b0] ss:$28 sps:$4 sm:$0xff]   ;;  %v8537_v29 = vld [vmem:[#allocation2 + $0x9e8] ss:$28 sps:$4 sm:$0xff]  }
 0x1ae   :  { %2734 = vmatprep.subr.bf16.mxu0 %v8455_v28  ;;  %5529 = vmatprep.subr.bf16.mxu1 %v8524_v30  ;;  %v8539_v28 = vld [vmem:[#allocation2 + $0x9ec] ss:$28 sps:$4 sm:$0xff]   ;;  %v8545_v30 = vld [vmem:[#allocation2 + $0xa24] ss:$28 sps:$4 sm:$0xff]  }
 0x1b1   :  { %2735 = vmatpush1.bf16.msra.mxu0 %v8453_v32  ;;  %5530 = vmatpush1.bf16.msra.mxu1 %v8522_v34  ;;  %v8543_v32 = vld [vmem:[#allocation2 + $0xa20] ss:$28 sps:$4 sm:$0xff]   ;;  %v8549_v34 = vld [vmem:[#allocation2 + $0xa58] ss:$28 sps:$4 sm:$0xff]  }
 0x1b2   :  { %2736 = vmatprep.subr.bf16.mxu0 %v8460_v33  ;;  %5531 = vmatprep.subr.bf16.mxu1 %v8530_v37  ;;  %v8551_v33 = vld [vmem:[#allocation2 + $0xa5c] ss:$28 sps:$4 sm:$0xff]   ;;  %v8557_v37 = vld [vmem:[#allocation2 + $0xa94] ss:$28 sps:$4 sm:$0xff]  }
 0x1b5   :  { %2737 = vmatpush1.bf16.msra.mxu0 %v8458_v38  ;;  %5532 = vmatpush1.bf16.msra.mxu1 %v8528_v40  ;;  %v8555_v38 = vld [vmem:[#allocation2 + $0xa90] ss:$28 sps:$4 sm:$0xff]   ;;  %v518_v40 = vlaneseq }
 0x1b6   :  { %2738 = vmatprep.subr.bf16.mxu0 %v8465_v39  ;;  %5533 = vmatprep.subr.bf16.mxu1 %v8536_v41  ;;  %v8569_v39 = vld [vmem:[#allocation6 + $0xc] ss:$28 sps:$4 sm:$0xff]  }
 0x1b7   :  { %v8567_v41 = vld [vmem:[#allocation6 + $0x8] ss:$28 sps:$4 sm:$0xff]  }
 0x1b9   :  { %2739 = vmatpush1.bf16.msra.mxu0 %v8463_v42  ;;  %5534 = vmatpush1.bf16.msra.mxu1 %v8534_v44  ;;  %v8575_v42 = vld [vmem:[#allocation6 + $0x44] ss:$28 sps:$4 sm:$0xff]  }
 0x1ba   :  { %2751 = vmatprep.subr.bf16.mxu0 %v8470_v43  ;;  %5535 = vmatprep.subr.bf16.mxu1 %v8542_v45  ;;  %v9505_v43 = vshrl.u32 %v518_v40, 7  ;;  %v8620_v40 = vld [vmem:[#allocation6 + $0x464] ss:$28 sps:$4 sm:$0xff]  }
 0x1bc   :  { %2741 = vmatmul.mubr.bf16.vlgmr.msra.gmra.mrb[4].mxu0 %v9449_v17  ;;  %v8490_v17 = vld [vmem:[#allocation2 + $0x7f4] ss:$28 sps:$4 sm:$0xff]   ;;  %v520_v44 = vsub.s32 0, %v9505_v43  ;;  %v528_v45 = vsub.s32 2, %v9505_v43 }
 0x1bd   :  { %2752 = vmatpush1.bf16.msra.mxu0 %v8468_v46  ;;  %5536 = vmatpush1.bf16.msra.mxu1 %v8540_v48  ;;  %v8573_v46 = vld [vmem:[#allocation6 + $0x40] ss:$28 sps:$4 sm:$0xff]   ;;  %v532_v48 = vsub.s32 3, %v9505_v43 }
 0x1be   :  { %2753 = vmatprep.subr.bf16.mxu0 %v8475_v47  ;;  %5537 = vmatprep.subr.bf16.mxu1 %v8548_v49  ;;  %v9511_v47 = vld [vmem:[#allocation4] sm:$0xff] }
 0x1bf   :  { %2783 = vmatprep.mubr.bf16.mxu0 %v9459_v25  ;;  %v8561_v25 = vld [vmem:[#allocation6 + $0x230] ss:$28 sps:$4 sm:$0xff]   ;;  %v8581_v49 = vld [vmem:[#allocation6 + $0x7c] ss:$28 sps:$4 sm:$0xff]  }
 0x1c1   :  { %2754 = vmatpush1.bf16.msra.mxu0 %v8473_v51  ;;  %5538 = vmatpush1.bf16.msra.mxu1 %v8546_v53  ;;  %v521_v51 = vrot.slane %v9511_v47, %v520_v44 }
 0x1c2   :  { %2755 = vmatprep.subr.bf16.mxu0 %v8480_v52  ;;  %5539 = vmatprep.subr.bf16.mxu1 %v8554_v54  ;;  %v8579_v52 = vld [vmem:[#allocation6 + $0x78] ss:$28 sps:$4 sm:$0xff]   ;;  %v533_v54 = vrot.slane %v9511_v47, %v532_v48 }
 0x1c5   :  { %2756 = vmatpush1.bf16.msra.mxu0 %v8478_v50  ;;  %5540 = vmatpush1.bf16.msra.mxu1 %v8552_v55  ;;  %v8587_v50 = vld [vmem:[#allocation6 + $0xb4] ss:$28 sps:$4 sm:$0xff]  }
 0x1c6   :  { %2757 = vmatprep.subr.bf16.mxu0 %v8485_v9  ;;  %5541 = vmatprep.subr.bf16.mxu1 %v8560_v56 }
 0x1c9   :  { %2758 = vmatpush1.bf16.msra.mxu0 %v8483_v57  ;;  %5542 = vmatpush1.bf16.msra.mxu1 %v8558_v58 }
 0x1ca   :  { %2759 = vmatprep.subr.bf16.mxu0 %v8490_v17  ;;  %5543 = vmatprep.subr.bf16.mxu1 %v8563_v36 }
 0x1cd   :  { %2760 = vmatpush1.bf16.msra.mxu0 %v8488_v59  ;;  %5544 = vmatpush1.bf16.msra.mxu1 %v8561_v25 }
 0x1ce   :  { %2761 = vmatprep.subr.bf16.mxu0 %v8495_v60  ;;  %5545 = vmatprep.subr.bf16.mxu1 %v8566_v61  ;;  %v8585_v61 = vld [vmem:[#allocation6 + $0xb0] ss:$28 sps:$4 sm:$0xff]  }
 0x1d1   :  { %2762 = vmatpush1.bf16.msra.mxu0 %v8493_v62  ;;  %5546 = vmatpush1.bf16.msra.mxu1 %v8564_v0 }
 0x1d2   :  { %2763 = vmatprep.subr.bf16.mxu0 %v8499_v63  ;;  %5547 = vmatprep.subr.bf16.mxu1 %v8572_v1 }
 0x1d5   :  { %2764 = vmatpush1.bf16.msra.mxu0 %v8497_v2  ;;  %5548 = vmatpush1.bf16.msra.mxu1 %v8570_v4  ;;  %v8593_v2 = vld [vmem:[#allocation6 + $0xec] ss:$28 sps:$4 sm:$0xff]  }
 0x1d6   :  { %2765 = vmatprep.subr.bf16.mxu0 %v8503_v3  ;;  %5549 = vmatprep.subr.bf16.mxu1 %v8578_v5 }
 0x1d9   :  { %2766 = vmatpush1.bf16.msra.mxu0 %v8501_v6  ;;  %5550 = vmatpush1.bf16.msra.mxu1 %v8576_v8 }
 0x1da   :  { %2767 = vmatprep.subr.bf16.mxu0 %v8509_v7  ;;  %5551 = vmatprep.subr.bf16.mxu1 %v8584_v10  ;;  %v8591_v7 = vld [vmem:[#allocation6 + $0xe8] ss:$28 sps:$4 sm:$0xff]  }
 0x1dd   :  { %2768 = vmatpush1.bf16.msra.mxu0 %v8507_v11  ;;  %5552 = vmatpush1.bf16.msra.mxu1 %v8582_v13 }
 0x1de   :  { %2769 = vmatprep.subr.bf16.mxu0 %v8515_v14  ;;  %5553 = vmatprep.subr.bf16.mxu1 %v8590_v15 }
 0x1e1   :  { %2770 = vmatpush1.bf16.msra.mxu0 %v8513_v16  ;;  %5554 = vmatpush1.bf16.msra.mxu1 %v8588_v19  ;;  %v8594_v16 = vld [vmem:[#allocation6 + $0x380] ss:$28 sps:$4 sm:$0xff]  }
 0x1e2   :  { %2771 = vmatprep.subr.bf16.mxu0 %v8521_v18  ;;  %5566 = vmatprep.subr.bf16.mxu1 %v8596_v20  ;;  %v8599_v20 = vld [vmem:[#allocation6 + $0x124] ss:$28 sps:$4 sm:$0xff]  }
 0x1e5   :  { %2772 = vmatpush1.bf16.msra.mxu0 %v8519_v21  ;;  %v8602_v21 = vld [vmem:[#allocation6 + $0x3bc] ss:$28 sps:$4 sm:$0xff]  }
 0x1e6   :  { %2773 = vmatprep.subr.bf16.mxu0 %v8527_v22 }
 0x1e9   :  { %2774 = vmatpush1.bf16.msra.mxu0 %v8525_v23 }
 0x1ea   :  { %2775 = vmatprep.subr.bf16.mxu0 %v8533_v24  ;;  %v8597_v24 = vld [vmem:[#allocation6 + $0x120] ss:$28 sps:$4 sm:$0xff]  }
 0x1ed   :  { %2776 = vmatpush1.bf16.msra.mxu0 %v8531_v27  ;;  %v8600_v27 = vld [vmem:[#allocation6 + $0x3b8] ss:$28 sps:$4 sm:$0xff]  }
 0x1ee   :  { %2777 = vmatprep.subr.bf16.mxu0 %v8539_v28  ;;  %v8605_v28 = vld [vmem:[#allocation6 + $0x15c] ss:$28 sps:$4 sm:$0xff]  }
 0x1f1   :  { %2778 = vmatpush1.bf16.msra.mxu0 %v8537_v29  ;;  %v8608_v29 = vld [vmem:[#allocation6 + $0x3f4] ss:$28 sps:$4 sm:$0xff]  }
 0x1f2   :  { %2779 = vmatprep.subr.bf16.mxu0 %v8545_v30  ;;  %v8603_v30 = vld [vmem:[#allocation6 + $0x158] ss:$28 sps:$4 sm:$0xff]  }
 0x1f5   :  { %2780 = vmatpush1.bf16.msra.mxu0 %v8543_v32  ;;  %v8606_v32 = vld [vmem:[#allocation6 + $0x3f0] ss:$28 sps:$4 sm:$0xff]  }
 0x1f6   :  { %2781 = vmatprep.subr.bf16.mxu0 %v8551_v33  ;;  %v8611_v33 = vld [vmem:[#allocation6 + $0x194] ss:$28 sps:$4 sm:$0xff]  }
 0x1f9   :  { %2782 = vmatpush1.bf16.msra.mxu0 %v8549_v34  ;;  %v8614_v34 = vld [vmem:[#allocation6 + $0x42c] ss:$28 sps:$4 sm:$0xff]  }
 0x1fa   :  { %2794 = vmatprep.subr.bf16.mxu0 %v8557_v37  ;;  %v8609_v37 = vld [vmem:[#allocation6 + $0x190] ss:$28 sps:$4 sm:$0xff]  }
 0x1fc   :  { %2784 = vmatmul.mubr.bf16.vlgmr.msra.gmra.mrb[4].mxu0 %v9469_v26  ;;  %v524_v26 = vsub.s32 1, %v9505_v43 }
 0x1fd   :  { %2795 = vmatpush1.bf16.msra.mxu0 %v8555_v38  ;;  %2826 = vmatprep.mubr.bf16.mxu0 %v9298_v31  ;;  %v8612_v38 = vld [vmem:[#allocation6 + $0x428] ss:$28 sps:$4 sm:$0xff]  }
 0x1fe   :  { %5695 = vmatprep.subr.bf16.mxu0 %v8569_v39  ;;  %v525_v53 = vrot.slane %v9511_v47, %v524_v26  ;;  %v8617_v39 = vld [vmem:[#allocation6 + $0x1cc] ss:$28 sps:$4 sm:$0xff]  }
 0x208   :  { %7208 = vmatmul.mubr.msk.bf16.vlgmr.msra.gmra.mrb[4].mxu0 %vm2317_vm0, %v9481_v35  ;;  %v529_v35 = vrot.slane %v9511_v47, %v528_v45 }
 0x209   :  { %5696 = vmatpush1.bf16.msra.mxu0 %v8567_v41  ;;  %v8615_v41 = vld [vmem:[#allocation6 + $0x1c8] ss:$28 sps:$4 sm:$0xff]  }
 0x20a   :  { %5697 = vmatprep.subr.bf16.mxu0 %v8575_v42  ;;  %v8618_v42 = vld [vmem:[#allocation6 + $0x460] ss:$28 sps:$4 sm:$0xff]  }
 0x20d   :  { %5698 = vmatpush1.bf16.msra.mxu0 %v8573_v46  ;;  %v8623_v46 = vld [vmem:[#allocation6 + $0x204] ss:$28 sps:$4 sm:$0xff]  }
 0x20e   :  { %5699 = vmatprep.subr.bf16.mxu0 %v8581_v49  ;;  %v8626_v49 = vld [vmem:[#allocation6 + $0x49c] ss:$28 sps:$4 sm:$0xff]  }
 0x20f   :  { %v2484_v9 = vpop.f32.mrb[0].mxu0  ;;  %v2656_v55 = vpop.f32.mrb[0].mxu1 }
 0x210   :  { %v7932_v56 = vadd.f32 %v2484_v9, %v521_v51  ;;  %v7936_v57 = vadd.f32 %v2656_v55, %v529_v35  ;;  %v2486_v17 = vpop.f32.mrb[1].mxu0  ;;  %v2658_v58 = vpop.f32.mrb[1].mxu1  ;;  %v8635_v9 = vld [vmem:[#allocation6 + $0x274] ss:$28 sps:$4 sm:$0xff]   ;;  %v8638_v55 = vld [vmem:[#allocation6 + $0x50c] ss:$28 sps:$4 sm:$0xff]  }
 0x211   :  { %5700 = vmatpush1.bf16.msra.mxu0 %v8579_v52  ;;  %v7933_v36 = vadd.f32 %v2486_v17, %v525_v53  ;;  %v7937_v59 = vadd.f32 %v2658_v58, %v533_v54  ;;  %v2488_v60 = vpop.f32.mrb[2].mxu0  ;;  %v2660_v25 = vpop.f32.mrb[2].mxu1  ;;  %v8629_v52 = vld [vmem:[#allocation6 + $0x23c] ss:$28 sps:$4 sm:$0xff]   ;;  %v8633_v17 = vld [vmem:[#allocation6 + $0x270] ss:$28 sps:$4 sm:$0xff]  }
 0x212   :  { %v7934_v62 = vadd.f32 %v2488_v60, %v521_v51  ;;  %v7938_v63 = vadd.f32 %v2660_v25, %v529_v35  ;;  %v2490_v0 = vpop.f32.mrb[3].mxu0  ;;  %v2662_v1 = vpop.f32.mrb[3].mxu1  ;;  %5701 = vmatprep.subr.bf16.mxu0 %v8587_v50  ;;  %v3001_v3 = vmax.f32 %v7932_v56, 0.0  ;;  %v3003_v4 = vmax.f32 %v7936_v57, 0.0  ;;  %v8621_v51 = vld [vmem:[#allocation6 + $0x200] ss:$28 sps:$4 sm:$0xff]  }
 0x213   :  { %v7935_v5 = vadd.f32 %v2490_v0, %v525_v53  ;;  %v7939_v6 = vadd.f32 %v2662_v1, %v533_v54  ;;  %v3002_v11 = vmax.f32 %v7933_v36, 0.0  ;;  %v3004_v13 = vmax.f32 %v7937_v59, 0.0  ;;  %v8624_v35 = vld [vmem:[#allocation6 + $0x498] ss:$28 sps:$4 sm:$0xff]   ;;  %v8630_v50 = vld [vmem:[#allocation6 + $0x4d0] ss:$28 sps:$4 sm:$0xff]  }
 0x214   :  { %v3008_v8 = vmax.f32 %v7934_v62, 0.0  ;;  %v3010_v10 = vmax.f32 %v7938_v63, 0.0  ;;  %v8632_v53 = vld [vmem:[#allocation6 + $0x4d4] ss:$28 sps:$4 sm:$0xff]   ;;  %v8636_v58 = vld [vmem:[#allocation6 + $0x508] ss:$28 sps:$4 sm:$0xff]  }
 0x215   :  { %v3009_v14 = vmax.f32 %v7935_v5, 0.0  ;;  %v3011_v15 = vmax.f32 %v7939_v6, 0.0  ;;  %5702 = vmatpush1.bf16.msra.mxu0 %v8585_v61  ;;  %v8627_v54 = vld [vmem:[#allocation6 + $0x238] ss:$28 sps:$4 sm:$0xff]   ;;  %v8641_v60 = vld [vmem:[#allocation6 + $0x2ac] ss:$28 sps:$4 sm:$0xff]  }
 0x216   :  { %v9527_v18 = vpack.c.bf16 %v3008_v8, %v3001_v3  ;;  %v9529_v19 = vpack.c.bf16 %v3010_v10, %v3003_v4  ;;  %5703 = vmatprep.subr.bf16.mxu0 %v8593_v2  ;;  %v8644_v25 = vld [vmem:[#allocation6 + $0x544] ss:$28 sps:$4 sm:$0xff]   ;;  %v8650_v2 = vld [vmem:[#allocation6 + $0x57c] ss:$28 sps:$4 sm:$0xff]   ;;  %v8656_v6 = vld [vmem:[#allocation6 + $0x5b4] ss:$28 sps:$4 sm:$0xff]  }
 0x217   :  { %v9531_v22 = vpack.c.bf16 %v3009_v14, %v3002_v11  ;;  %v9533_v23 = vpack.c.bf16 %v3011_v15, %v3004_v13  ;;  %v8639_v63 = vld [vmem:[#allocation6 + $0x2a8] ss:$28 sps:$4 sm:$0xff]   ;;  %v8642_v0 = vld [vmem:[#allocation6 + $0x540] ss:$28 sps:$4 sm:$0xff]   ;;  %v8648_v4 = vld [vmem:[#allocation6 + $0x578] ss:$28 sps:$4 sm:$0xff]  }
 0x218   :  { %v8647_v1 = vld [vmem:[#allocation6 + $0x2e4] ss:$28 sps:$4 sm:$0xff]   ;;  %v8653_v5 = vld [vmem:[#allocation6 + $0x31c] ss:$28 sps:$4 sm:$0xff]   ;;  %v8659_v8 = vld [vmem:[#allocation6 + $0x354] ss:$28 sps:$4 sm:$0xff]  }
 0x219   :  { %5704 = vmatpush1.bf16.msra.mxu0 %v8591_v7  ;;  %5555 = vmatprep.mubr.bf16.mxu1 %v9531_v22  ;;  %v8645_v3 = vld [vmem:[#allocation6 + $0x2e0] ss:$28 sps:$4 sm:$0xff]   ;;  %v8651_v7 = vld [vmem:[#allocation6 + $0x318] ss:$28 sps:$4 sm:$0xff]   ;;  %v8654_v10 = vld [vmem:[#allocation6 + $0x5b0] ss:$28 sps:$4 sm:$0xff]  }
 0x21a   :  { %5727 = vmatprep.mubr.bf16.mxu0 %v9531_v22  ;;  %5556 = vmatmul.mubr.bf16.vlgmr.msra.gmra.mrb[20].mxu1 %v9527_v18  ;;  %v8662_v11 = vld [vmem:[#allocation6 + $0x5ec] ss:$28 sps:$4 sm:$0xff]  }
 0x21b   :  { %5567 = vmatpush1.bf16.msra.mxu1 %v8594_v16  ;;  %5705 = vmatprep.subr.bf16.mxu0 %v8599_v20  ;;  %v8657_v13 = vld [vmem:[#allocation6 + $0x350] ss:$28 sps:$4 sm:$0xff]   ;;  %v8660_v15 = vld [vmem:[#allocation6 + $0x5e8] ss:$28 sps:$4 sm:$0xff]  }
 0x21c   :  { %5598 = vmatprep.mubr.bf16.mxu1 %v9533_v23  ;;  %5568 = vmatprep.subr.bf16.mxu1 %v8602_v21  ;;  %v8665_v14 = vld [vmem:[#allocation6 + $0x38c] ss:$28 sps:$4 sm:$0xff]   ;;  %v8668_v16 = vld [vmem:[#allocation6 + $0x624] ss:$28 sps:$4 sm:$0xff]  }
 0x21d   :  { %5706 = vmatpush1.bf16.msra.mxu0 %v8597_v24  ;;  %v8663_v20 = vld [vmem:[#allocation6 + $0x388] ss:$28 sps:$4 sm:$0xff]   ;;  %v8666_v24 = vld [vmem:[#allocation6 + $0x620] ss:$28 sps:$4 sm:$0xff]  }
 0x21e   :  { %5707 = vmatprep.subr.bf16.mxu0 %v8605_v28  ;;  %v8671_v21 = vld [vmem:[#allocation6 + $0x3c4] ss:$28 sps:$4 sm:$0xff]   ;;  %v544_v28 = vsub.s32 6, %v9505_v43 }
 0x21f   :  { %5569 = vmatpush1.bf16.msra.mxu1 %v8600_v27  ;;  %v8674_v27 = vld [vmem:[#allocation6 + $0x65c] ss:$28 sps:$4 sm:$0xff]  }
 0x220   :  { %5570 = vmatprep.subr.bf16.mxu1 %v8608_v29  ;;  %v8669_v29 = vld [vmem:[#allocation6 + $0x3c0] ss:$28 sps:$4 sm:$0xff]  }
 0x221   :  { %5708 = vmatpush1.bf16.msra.mxu0 %v8603_v30  ;;  %v8677_v30 = vld [vmem:[#allocation6 + $0x3fc] ss:$28 sps:$4 sm:$0xff]  }
 0x222   :  { %5709 = vmatprep.subr.bf16.mxu0 %v8611_v33  ;;  %v8680_v33 = vld [vmem:[#allocation6 + $0x694] ss:$28 sps:$4 sm:$0xff]  }
 0x223   :  { %5571 = vmatpush1.bf16.msra.mxu1 %v8606_v32  ;;  %v8672_v32 = vld [vmem:[#allocation6 + $0x658] ss:$28 sps:$4 sm:$0xff]  }
 0x224   :  { %5572 = vmatprep.subr.bf16.mxu1 %v8614_v34  ;;  %v8675_v34 = vld [vmem:[#allocation6 + $0x3f8] ss:$28 sps:$4 sm:$0xff]  }
 0x225   :  { %5710 = vmatpush1.bf16.msra.mxu0 %v8609_v37  ;;  %v545_v37 = vrot.slane %v9511_v47, %v544_v28 }
 0x226   :  { %5711 = vmatprep.subr.bf16.mxu0 %v8617_v39  ;;  %v8678_v39 = vld [vmem:[#allocation6 + $0x690] ss:$28 sps:$4 sm:$0xff]  }
 0x227   :  { %5573 = vmatpush1.bf16.msra.mxu1 %v8612_v38  ;;  %v8683_v38 = vld [vmem:[#allocation6 + $0x434] ss:$28 sps:$4 sm:$0xff]  }
 0x228   :  { %5574 = vmatprep.subr.bf16.mxu1 %v8620_v40  ;;  %v8686_v40 = vld [vmem:[#allocation6 + $0x6cc] ss:$28 sps:$4 sm:$0xff]  }
 0x229   :  { %5712 = vmatpush1.bf16.msra.mxu0 %v8615_v41  ;;  %v8681_v41 = vld [vmem:[#allocation6 + $0x430] ss:$28 sps:$4 sm:$0xff]  }
 0x22a   :  { %5713 = vmatprep.subr.bf16.mxu0 %v8623_v46 }
 0x22b   :  { %5575 = vmatpush1.bf16.msra.mxu1 %v8618_v42 }
 0x22c   :  { %5576 = vmatprep.subr.bf16.mxu1 %v8626_v49  ;;  %v8689_v49 = vld [vmem:[#allocation6 + $0x46c] ss:$28 sps:$4 sm:$0xff]  }
 0x22d   :  { %5714 = vmatpush1.bf16.msra.mxu0 %v8621_v51 }
 0x22e   :  { %5715 = vmatprep.subr.bf16.mxu0 %v8629_v52 }
 0x22f   :  { %5577 = vmatpush1.bf16.msra.mxu1 %v8624_v35  ;;  %v7684_v56 = vpop.f32.mrb[4].mxu1  ;;  %v8684_v35 = vld [vmem:[#allocation6 + $0x6c8] ss:$28 sps:$4 sm:$0xff]  }
 0x230   :  { %5578 = vmatprep.subr.bf16.mxu1 %v8632_v53  ;;  %v7685_v57 = vpop.f32.mrb[5].mxu1 }
 0x231   :  { %5716 = vmatpush1.bf16.msra.mxu0 %v8627_v54  ;;  %v9539_v36 = vadd.f32 %v7685_v57, %v7684_v56  ;;  %v7687_v59 = vpop.f32.mrb[6].mxu1  ;;  %v8725_v54 = vld [vmem:[#allocation6 + $0x704] ss:$28 sps:$4 sm:$0xff]  }
 0x232   :  { %5717 = vmatprep.subr.bf16.mxu0 %v8635_v9  ;;  %v7688_v61 = vpop.f32.mrb[7].mxu1  ;;  %v8687_v9 = vld [vmem:[#allocation6 + $0x468] ss:$28 sps:$4 sm:$0xff]  }
 0x233   :  { %5579 = vmatpush1.bf16.msra.mxu1 %v8630_v50  ;;  %v9541_v62 = vadd.f32 %v7688_v61, %v7687_v59  ;;  %v2872_v42 = vadd.f32 %v9539_v36, %v545_v37  ;;  %v8692_v57 = vld [vmem:[#allocation6 + $0x4a4] ss:$28 sps:$4 sm:$0xff]   ;;  %v8731_v36 = vld [vmem:[#allocation6 + $0x73c] ss:$28 sps:$4 sm:$0xff]  }
 0x234   :  { %5580 = vmatprep.subr.bf16.mxu1 %v8638_v55  ;;  %v8690_v59 = vld [vmem:[#allocation6 + $0x4a0] ss:$28 sps:$4 sm:$0xff]   ;;  %v8693_v61 = vld [vmem:[#allocation6 + $0x4d8] ss:$28 sps:$4 sm:$0xff]  }
 0x235   :  { %5718 = vmatpush1.bf16.msra.mxu0 %v8633_v17  ;;  %v2875_v52 = vadd.f32 %v9541_v62, %v545_v37  ;;  %v8723_v17 = vld [vmem:[#allocation6 + $0x700] ss:$28 sps:$4 sm:$0xff]   ;;  %v8737_v62 = vld [vmem:[#allocation6 + $0x774] ss:$28 sps:$4 sm:$0xff]  }
 0x236   :  { %5719 = vmatprep.subr.bf16.mxu0 %v8641_v60  ;;  %v8695_v60 = vld [vmem:[#allocation6 + $0x4dc] ss:$28 sps:$4 sm:$0xff]  }
 0x237   :  { %5581 = vmatpush1.bf16.msra.mxu1 %v8636_v58 }
 0x238   :  { %5582 = vmatprep.subr.bf16.mxu1 %v8644_v25  ;;  %v8729_v25 = vld [vmem:[#allocation6 + $0x738] ss:$28 sps:$4 sm:$0xff]  }
 0x239   :  { %5720 = vmatpush1.bf16.msra.mxu0 %v8639_v63  ;;  %v8698_v63 = vld [vmem:[#allocation6 + $0x514] ss:$28 sps:$4 sm:$0xff]  }
 0x23a   :  { %5721 = vmatprep.subr.bf16.mxu0 %v8647_v1  ;;  %v8696_v1 = vld [vmem:[#allocation6 + $0x510] ss:$28 sps:$4 sm:$0xff]  }
 0x23b   :  { %5583 = vmatpush1.bf16.msra.mxu1 %v8642_v0  ;;  %v8735_v0 = vld [vmem:[#allocation6 + $0x770] ss:$28 sps:$4 sm:$0xff]  }
 0x23c   :  { %5584 = vmatprep.subr.bf16.mxu1 %v8650_v2  ;;  %v8743_v2 = vld [vmem:[#allocation6 + $0x7ac] ss:$28 sps:$4 sm:$0xff]  }
 0x23d   :  { %5722 = vmatpush1.bf16.msra.mxu0 %v8645_v3  ;;  %v8701_v3 = vld [vmem:[#allocation6 + $0x54c] ss:$28 sps:$4 sm:$0xff]  }
 0x23e   :  { %5723 = vmatprep.subr.bf16.mxu0 %v8653_v5  ;;  %v8749_v5 = vld [vmem:[#allocation6 + $0x7e4] ss:$28 sps:$4 sm:$0xff]  }
 0x23f   :  { %5585 = vmatpush1.bf16.msra.mxu1 %v8648_v4  ;;  %v8741_v4 = vld [vmem:[#allocation6 + $0x7a8] ss:$28 sps:$4 sm:$0xff]  }
 0x240   :  { %5586 = vmatprep.subr.bf16.mxu1 %v8656_v6  ;;  %v8699_v6 = vld [vmem:[#allocation6 + $0x548] ss:$28 sps:$4 sm:$0xff]  }
 0x241   :  { %5724 = vmatpush1.bf16.msra.mxu0 %v8651_v7  ;;  %v8704_v7 = vld [vmem:[#allocation6 + $0x584] ss:$28 sps:$4 sm:$0xff]  }
 0x242   :  { %5725 = vmatprep.subr.bf16.mxu0 %v8659_v8  ;;  %v8747_v8 = vld [vmem:[#allocation6 + $0x7e0] ss:$28 sps:$4 sm:$0xff]  }
 0x243   :  { %5587 = vmatpush1.bf16.msra.mxu1 %v8654_v10  ;;  %v8755_v10 = vld [vmem:[#allocation6 + $0x81c] ss:$28 sps:$4 sm:$0xff]  }
 0x244   :  { %5588 = vmatprep.subr.bf16.mxu1 %v8662_v11  ;;  %v8702_v11 = vld [vmem:[#allocation6 + $0x580] ss:$28 sps:$4 sm:$0xff]  }
 0x245   :  { %5726 = vmatpush1.bf16.msra.mxu0 %v8657_v13  ;;  %v8707_v13 = vld [vmem:[#allocation6 + $0x5bc] ss:$28 sps:$4 sm:$0xff]  }
 0x246   :  { %5738 = vmatprep.subr.bf16.mxu0 %v8665_v14  ;;  %v8753_v14 = vld [vmem:[#allocation6 + $0x818] ss:$28 sps:$4 sm:$0xff]  }
 0x247   :  { %5589 = vmatpush1.bf16.msra.mxu1 %v8660_v15  ;;  %v8761_v15 = vld [vmem:[#allocation6 + $0x854] ss:$28 sps:$4 sm:$0xff]  }
 0x248   :  { %5728 = vmatmul.mubr.bf16.vlgmr.msra.gmra.mrb[8].mxu0 %v9527_v18  ;;  %5590 = vmatprep.subr.bf16.mxu1 %v8668_v16  ;;  %v8705_v16 = vld [vmem:[#allocation6 + $0x5b8] ss:$28 sps:$4 sm:$0xff]  }
 0x249   :  { %5739 = vmatpush1.bf16.msra.mxu0 %v8663_v20  ;;  %5770 = vmatprep.mubr.bf16.mxu0 %v9533_v23  ;;  %v8710_v20 = vld [vmem:[#allocation6 + $0x5f4] ss:$28 sps:$4 sm:$0xff]  }
 0x24a   :  { %5740 = vmatprep.subr.bf16.mxu0 %v8671_v21 }
 0x24b   :  { %5591 = vmatpush1.bf16.msra.mxu1 %v8666_v24  ;;  %v8759_v24 = vld [vmem:[#allocation6 + $0x850] ss:$28 sps:$4 sm:$0xff]  }
 0x24c   :  { %5592 = vmatprep.subr.bf16.mxu1 %v8674_v27 }
 0x24d   :  { %5741 = vmatpush1.bf16.msra.mxu0 %v8669_v29  ;;  %v8767_v29 = vld [vmem:[#allocation6 + $0x88c] ss:$28 sps:$4 sm:$0xff]  }
 0x24e   :  { %5742 = vmatprep.subr.bf16.mxu0 %v8677_v30  ;;  %v8708_v30 = vld [vmem:[#allocation6 + $0x5f0] ss:$28 sps:$4 sm:$0xff]  }
 0x24f   :  { %5593 = vmatpush1.bf16.msra.mxu1 %v8672_v32  ;;  %v7706_v46 = vpop.f32.mrb[8].mxu1 }
 0x250   :  { %5594 = vmatprep.subr.bf16.mxu1 %v8680_v33  ;;  %v7707_v51 = vpop.f32.mrb[9].mxu1 }
 0x251   :  { %5743 = vmatpush1.bf16.msra.mxu0 %v8675_v34  ;;  %v7708_v53 = vadd.f32 %v7707_v51, %v7706_v46  ;;  %v7709_v47 = vpop.f32.mrb[10].mxu1  ;;  %v8713_v34 = vld [vmem:[#allocation6 + $0x62c] ss:$28 sps:$4 sm:$0xff]  }
 0x252   :  { %5744 = vmatprep.subr.bf16.mxu0 %v8683_v38  ;;  %v7710_v50 = vpop.f32.mrb[11].mxu1 }
 0x253   :  { %5595 = vmatpush1.bf16.msra.mxu1 %v8678_v39  ;;  %v9551_v55 = vadd.f32 %v7708_v53, %v2872_v42  ;;  %v7711_v56 = vadd.f32 %v7710_v50, %v7709_v47  ;;  %v8711_v42 = vld [vmem:[#allocation6 + $0x628] ss:$28 sps:$4 sm:$0xff]   ;;  %v8779_v47 = vld [vmem:[#allocation6 + $0x8fc] ss:$28 sps:$4 sm:$0xff]  }
 0x254   :  { %5596 = vmatprep.subr.bf16.mxu1 %v8686_v40  ;;  %v8765_v40 = vld [vmem:[#allocation6 + $0x888] ss:$28 sps:$4 sm:$0xff]  }
 0x255   :  { %5745 = vmatpush1.bf16.msra.mxu0 %v8681_v41  ;;  %v9553_v58 = vadd.f32 %v7711_v56, %v2875_v52  ;;  %v8773_v41 = vld [vmem:[#allocation6 + $0x8c4] ss:$28 sps:$4 sm:$0xff]  }
 0x256   :  { %5746 = vmatprep.subr.bf16.mxu0 %v8689_v49  ;;  %v8716_v49 = vld [vmem:[#allocation6 + $0x664] ss:$28 sps:$4 sm:$0xff]  }
 0x257   :  { %5597 = vmatpush1.bf16.msra.mxu1 %v8684_v35  ;;  %v8771_v35 = vld [vmem:[#allocation6 + $0x8c0] ss:$28 sps:$4 sm:$0xff]  }
 0x258   :  { %5609 = vmatprep.subr.bf16.mxu1 %v8725_v54  ;;  %v8714_v54 = vld [vmem:[#allocation6 + $0x660] ss:$28 sps:$4 sm:$0xff]  }
 0x259   :  { %5747 = vmatpush1.bf16.msra.mxu0 %v8687_v9  ;;  %v8719_v9 = vld [vmem:[#allocation6 + $0x69c] ss:$28 sps:$4 sm:$0xff]  }
 0x25a   :  { %5599 = vmatmul.mubr.bf16.vlgmr.msra.gmra.mrb[20].mxu1 %v9529_v19  ;;  %5748 = vmatprep.subr.bf16.mxu0 %v8692_v57 }
 0x25b   :  { %5610 = vmatpush1.bf16.msra.mxu1 %v8723_v17  ;;  %v8777_v17 = vld [vmem:[#allocation6 + $0x8f8] ss:$28 sps:$4 sm:$0xff]  }
 0x25c   :  { %5611 = vmatprep.subr.bf16.mxu1 %v8731_v36  ;;  %v8785_v36 = vld [vmem:[#allocation6 + $0x934] ss:$28 sps:$4 sm:$0xff]  }
 0x25d   :  { %5749 = vmatpush1.bf16.msra.mxu0 %v8690_v59  ;;  %v8717_v59 = vld [vmem:[#allocation6 + $0x698] ss:$28 sps:$4 sm:$0xff]  }
 0x25e   :  { %5750 = vmatprep.subr.bf16.mxu0 %v8695_v60  ;;  %v8722_v60 = vld [vmem:[#allocation6 + $0x6d4] ss:$28 sps:$4 sm:$0xff]  }
 0x25f   :  { %5612 = vmatpush1.bf16.msra.mxu1 %v8729_v25 }
 0x260   :  { %5613 = vmatprep.subr.bf16.mxu1 %v8737_v62  ;;  %v8791_v62 = vld [vmem:[#allocation6 + $0x96c] ss:$28 sps:$4 sm:$0xff]  }
 0x261   :  { %5751 = vmatpush1.bf16.msra.mxu0 %v8693_v61  ;;  %v8783_v61 = vld [vmem:[#allocation6 + $0x930] ss:$28 sps:$4 sm:$0xff]  }
 0x262   :  { %5752 = vmatprep.subr.bf16.mxu0 %v8698_v63  ;;  %v8720_v63 = vld [vmem:[#allocation6 + $0x6d0] ss:$28 sps:$4 sm:$0xff]  }
 0x263   :  { %5614 = vmatpush1.bf16.msra.mxu1 %v8735_v0  ;;  %v8728_v0 = vld [vmem:[#allocation6 + $0x70c] ss:$28 sps:$4 sm:$0xff]  }
 0x264   :  { %5615 = vmatprep.subr.bf16.mxu1 %v8743_v2  ;;  %v8797_v2 = vld [vmem:[#allocation6 + $0x9a4] ss:$28 sps:$4 sm:$0xff]  }
 0x265   :  { %5753 = vmatpush1.bf16.msra.mxu0 %v8696_v1  ;;  %v8789_v1 = vld [vmem:[#allocation6 + $0x968] ss:$28 sps:$4 sm:$0xff]  }
 0x266   :  { %5754 = vmatprep.subr.bf16.mxu0 %v8701_v3  ;;  %v8726_v3 = vld [vmem:[#allocation6 + $0x708] ss:$28 sps:$4 sm:$0xff]  }
 0x267   :  { %5616 = vmatpush1.bf16.msra.mxu1 %v8741_v4  ;;  %v8734_v4 = vld [vmem:[#allocation6 + $0x744] ss:$28 sps:$4 sm:$0xff]  }
 0x268   :  { %5617 = vmatprep.subr.bf16.mxu1 %v8749_v5  ;;  %v8795_v5 = vld [vmem:[#allocation6 + $0x9a0] ss:$28 sps:$4 sm:$0xff]  }
 0x269   :  { %5755 = vmatpush1.bf16.msra.mxu0 %v8699_v6  ;;  %v8803_v6 = vld [vmem:[#allocation6 + $0x9dc] ss:$28 sps:$4 sm:$0xff]  }
 0x26a   :  { %5756 = vmatprep.subr.bf16.mxu0 %v8704_v7  ;;  %v8732_v7 = vld [vmem:[#allocation6 + $0x740] ss:$28 sps:$4 sm:$0xff]  }
 0x26b   :  { %5618 = vmatpush1.bf16.msra.mxu1 %v8747_v8  ;;  %v8740_v8 = vld [vmem:[#allocation6 + $0x77c] ss:$28 sps:$4 sm:$0xff]  }
 0x26c   :  { %5619 = vmatprep.subr.bf16.mxu1 %v8755_v10  ;;  %v8801_v10 = vld [vmem:[#allocation6 + $0x9d8] ss:$28 sps:$4 sm:$0xff]  }
 0x26d   :  { %5757 = vmatpush1.bf16.msra.mxu0 %v8702_v11  ;;  %v8809_v11 = vld [vmem:[#allocation6 + $0xa14] ss:$28 sps:$4 sm:$0xff]  }
 0x26e   :  { %5758 = vmatprep.subr.bf16.mxu0 %v8707_v13  ;;  %v8738_v13 = vld [vmem:[#allocation6 + $0x778] ss:$28 sps:$4 sm:$0xff]  }
 0x26f   :  { %v7728_v21 = vpop.f32.mrb[12].mxu1  ;;  %5620 = vmatpush1.bf16.msra.mxu1 %v8753_v14  ;;  %v8746_v14 = vld [vmem:[#allocation6 + $0x7b4] ss:$28 sps:$4 sm:$0xff]  }
 0x270   :  { %v7729_v27 = vpop.f32.mrb[13].mxu1  ;;  %5621 = vmatprep.subr.bf16.mxu1 %v8761_v15  ;;  %v8807_v15 = vld [vmem:[#allocation6 + $0xa10] ss:$28 sps:$4 sm:$0xff]  }
 0x271   :  { %5759 = vmatpush1.bf16.msra.mxu0 %v8705_v16  ;;  %v7730_v32 = vadd.f32 %v7729_v27, %v7728_v21  ;;  %v7731_v33 = vpop.f32.mrb[14].mxu1  ;;  %v8815_v16 = vld [vmem:[#allocation6 + $0xa4c] ss:$28 sps:$4 sm:$0xff]   ;;  %v8821_v27 = vld [vmem:[#allocation6 + $0xa84] ss:$28 sps:$4 sm:$0xff]  }
 0x272   :  { %5760 = vmatprep.subr.bf16.mxu0 %v8710_v20  ;;  %v7732_v37 = vpop.f32.mrb[15].mxu1  ;;  %v8744_v20 = vld [vmem:[#allocation6 + $0x7b0] ss:$28 sps:$4 sm:$0xff]  }
 0x273   :  { %v7733_v38 = vadd.f32 %v7732_v37, %v7731_v33  ;;  %v2954_v39 = vadd.f32 %v7730_v32, %v9551_v55  ;;  %5622 = vmatpush1.bf16.msra.mxu1 %v8759_v24  ;;  %v8752_v21 = vld [vmem:[#allocation6 + $0x7ec] ss:$28 sps:$4 sm:$0xff]   ;;  %v8756_v32 = vld [vmem:[#allocation6 + $0x820] ss:$28 sps:$4 sm:$0xff]   ;;  %v8770_v37 = vld [vmem:[#allocation6 + $0x894] ss:$28 sps:$4 sm:$0xff]  }
 0x274   :  { %5623 = vmatprep.subr.bf16.mxu1 %v8767_v29  ;;  %v8813_v24 = vld [vmem:[#allocation6 + $0xa48] ss:$28 sps:$4 sm:$0xff]   ;;  %v8764_v33 = vld [vmem:[#allocation6 + $0x85c] ss:$28 sps:$4 sm:$0xff]  }
 0x275   :  { %5761 = vmatpush1.bf16.msra.mxu0 %v8708_v30  ;;  %v2957_v46 = vadd.f32 %v7733_v38, %v9553_v58  ;;  %v8750_v29 = vld [vmem:[#allocation6 + $0x7e8] ss:$28 sps:$4 sm:$0xff]   ;;  %v8768_v38 = vld [vmem:[#allocation6 + $0x890] ss:$28 sps:$4 sm:$0xff]  }
 0x276   :  { %5762 = vmatprep.subr.bf16.mxu0 %v8713_v34  ;;  %v8758_v30 = vld [vmem:[#allocation6 + $0x824] ss:$28 sps:$4 sm:$0xff]   ;;  %v8762_v34 = vld [vmem:[#allocation6 + $0x858] ss:$28 sps:$4 sm:$0xff]  }
 0x277   :  { %v2994_v51 = vpop.f32.mrb[16].mxu1  ;;  %5624 = vmatpush1.bf16.msra.mxu1 %v8765_v40  ;;  %v8774_v40 = vld [vmem:[#allocation6 + $0x8c8] ss:$28 sps:$4 sm:$0xff]  }
 0x278   :  { %v2995_v52 = vadd.f32 %v2994_v51, %v2954_v39  ;;  %v7890_v53 = vpop.f32.mrb[17].mxu1  ;;  %5625 = vmatprep.subr.bf16.mxu1 %v8773_v41  ;;  %v8776_v39 = vld [vmem:[#allocation6 + $0x8cc] ss:$28 sps:$4 sm:$0xff]   ;;  %v8782_v41 = vld [vmem:[#allocation6 + $0x904] ss:$28 sps:$4 sm:$0xff]  }
 0x279   :  { %5763 = vmatpush1.bf16.msra.mxu0 %v8711_v42  ;;  %v2997_v50 = vpop.f32.mrb[18].mxu1  ;;  %v8780_v42 = vld [vmem:[#allocation6 + $0x900] ss:$28 sps:$4 sm:$0xff]   ;;  %v8794_v51 = vld [vmem:[#allocation6 + $0x974] ss:$28 sps:$4 sm:$0xff]  }
 0x27a   :  { %5764 = vmatprep.subr.bf16.mxu0 %v8716_v49  ;;  %v3007_v55 = vmax.f32 %v2995_v52, 0.0  ;;  %v2998_v56 = vadd.f32 %v2997_v50, %v2957_v46  ;;  %v7891_v57 = vpop.f32.mrb[19].mxu1  ;;  %v8788_v46 = vld [vmem:[#allocation6 + $0x93c] ss:$28 sps:$4 sm:$0xff]   ;;  %v8800_v52 = vld [vmem:[#allocation6 + $0x9ac] ss:$28 sps:$4 sm:$0xff]  }
 0x27b   :  { %5626 = vmatpush1.bf16.msra.mxu1 %v8771_v35  ;;  %v8786_v49 = vld [vmem:[#allocation6 + $0x938] ss:$28 sps:$4 sm:$0xff]   ;;  %v8792_v35 = vld [vmem:[#allocation6 + $0x970] ss:$28 sps:$4 sm:$0xff]   ;;  %v8798_v53 = vld [vmem:[#allocation6 + $0x9a8] ss:$28 sps:$4 sm:$0xff]  }
 0x27c   :  { %v3014_v58 = vmax.f32 %v2998_v56, 0.0  ;;  %5627 = vmatprep.subr.bf16.mxu1 %v8779_v47  ;;  %v8806_v47 = vld [vmem:[#allocation6 + $0x9e4] ss:$28 sps:$4 sm:$0xff]   ;;  %v8812_v50 = vld [vmem:[#allocation6 + $0xa1c] ss:$28 sps:$4 sm:$0xff]  }
 0x27d   :  { %5765 = vmatpush1.bf16.msra.mxu0 %v8714_v54  ;;  %v8804_v54 = vld [vmem:[#allocation6 + $0x9e0] ss:$28 sps:$4 sm:$0xff]   ;;  %v8816_v56 = vld [vmem:[#allocation6 + $0xa50] ss:$28 sps:$4 sm:$0xff]  }
 0x27e   :  { %5766 = vmatprep.subr.bf16.mxu0 %v8719_v9  ;;  %v9558_v25 = vpack.c.bf16 %v3014_v58, %v3007_v55  ;;  %v8810_v9 = vld [vmem:[#allocation6 + $0xa18] ss:$28 sps:$4 sm:$0xff]   ;;  %v8824_v57 = vld [vmem:[#allocation6 + $0xa8c] ss:$28 sps:$4 sm:$0xff]   ;;  %v540_v58 = vsub.s32 5, %v9505_v43 }
 0x27f   :  { %5628 = vmatpush1.bf16.msra.mxu1 %v8777_v17  ;;  %v8818_v55 = vld [vmem:[#allocation6 + $0xa54] ss:$28 sps:$4 sm:$0xff]   ;;  %v536_v17 = vsub.s32 4, %v9505_v43 }
 0x280   :  { %5629 = vmatprep.subr.bf16.mxu1 %v8785_v36  ;;  %v9147_v36 = vld [vmem:[#allocation4] sm:$0xff] }
 0x281   :  { %5767 = vmatpush1.bf16.msra.mxu0 %v8717_v59  ;;  %v537_v59 = vrot.slane %v9147_v36, %v536_v17 }
 0x282   :  { %5768 = vmatprep.subr.bf16.mxu0 %v8722_v60  ;;  %v541_v60 = vrot.slane %v9147_v36, %v540_v58  ;;  %v8867_v36 = vld [vmem:[#allocation6 + $0x10] ss:$28 sps:$4 sm:$0xff]  }
 0x283   :  { %5630 = vmatpush1.bf16.msra.mxu1 %v8783_v61 }
 0x284   :  { %5631 = vmatprep.subr.bf16.mxu1 %v8791_v62 }
 0x285   :  { %5769 = vmatpush1.bf16.msra.mxu0 %v8720_v63 }
 0x286   :  { %5781 = vmatprep.subr.bf16.mxu0 %v8728_v0 }
 0x287   :  { %5632 = vmatpush1.bf16.msra.mxu1 %v8789_v1 }
 0x288   :  { %5771 = vmatmul.mubr.bf16.vlgmr.msra.gmra.mrb[8].mxu0 %v9529_v19  ;;  %5633 = vmatprep.subr.bf16.mxu1 %v8797_v2 }
 0x289   :  { %5782 = vmatpush1.bf16.msra.mxu0 %v8726_v3 }
 0x28a   :  { %5783 = vmatprep.subr.bf16.mxu0 %v8734_v4 }
 0x28b   :  { %5634 = vmatpush1.bf16.msra.mxu1 %v8795_v5 }
 0x28c   :  { %5635 = vmatprep.subr.bf16.mxu1 %v8803_v6 }
 0x28d   :  { %5784 = vmatpush1.bf16.msra.mxu0 %v8732_v7 }
 0x28e   :  { %5785 = vmatprep.subr.bf16.mxu0 %v8740_v8 }
 0x28f   :  { %5636 = vmatpush1.bf16.msra.mxu1 %v8801_v10 }
 0x290   :  { %5637 = vmatprep.subr.bf16.mxu1 %v8809_v11 }
 0x291   :  { %5786 = vmatpush1.bf16.msra.mxu0 %v8738_v13  ;;  %v8819_v13 = vld [vmem:[#allocation6 + $0xa80] ss:$28 sps:$4 sm:$0xff]  }
 0x292   :  { %5787 = vmatprep.subr.bf16.mxu0 %v8746_v14  ;;  %v8822_v14 = vld [vmem:[#allocation6 + $0xa88] ss:$28 sps:$4 sm:$0xff]  }
 0x293   :  { %5638 = vmatpush1.bf16.msra.mxu1 %v8807_v15  ;;  %v8827_v15 = vld [vmem:[#allocation6 + $0xabc] ss:$28 sps:$4 sm:$0xff]  }
 0x294   :  { %5639 = vmatprep.subr.bf16.mxu1 %v8815_v16  ;;  %v8830_v16 = vld [vmem:[#allocation6 + $0xac4] ss:$28 sps:$4 sm:$0xff]  }
 0x295   :  { %5788 = vmatpush1.bf16.msra.mxu0 %v8744_v20  ;;  %v8825_v20 = vld [vmem:[#allocation6 + $0xab8] ss:$28 sps:$4 sm:$0xff]  }
 0x296   :  { %5789 = vmatprep.subr.bf16.mxu0 %v8752_v21  ;;  %v8828_v21 = vld [vmem:[#allocation6 + $0xac0] ss:$28 sps:$4 sm:$0xff]  }
 0x297   :  { %5640 = vmatpush1.bf16.msra.mxu1 %v8813_v24  ;;  %v8833_v24 = vld [vmem:[#allocation6 + $0xaf4] ss:$28 sps:$4 sm:$0xff]  }
 0x298   :  { %5652 = vmatprep.subr.bf16.mxu1 %v8821_v27  ;;  %v8836_v27 = vld [vmem:[#allocation6 + $0xafc] ss:$28 sps:$4 sm:$0xff]  }
 0x299   :  { %5790 = vmatpush1.bf16.msra.mxu0 %v8750_v29  ;;  %v8831_v29 = vld [vmem:[#allocation6 + $0xaf0] ss:$28 sps:$4 sm:$0xff]  }
 0x29a   :  { %5791 = vmatprep.subr.bf16.mxu0 %v8758_v30  ;;  %v8834_v30 = vld [vmem:[#allocation6 + $0xaf8] ss:$28 sps:$4 sm:$0xff]  }
 0x29d   :  { %5792 = vmatpush1.bf16.msra.mxu0 %v8756_v32  ;;  %v8839_v32 = vld [vmem:[#allocation6 + $0xb2c] ss:$28 sps:$4 sm:$0xff]  }
 0x29e   :  { %5793 = vmatprep.subr.bf16.mxu0 %v8764_v33  ;;  %v8842_v33 = vld [vmem:[#allocation6 + $0xb34] ss:$28 sps:$4 sm:$0xff]  }
 0x2a1   :  { %5794 = vmatpush1.bf16.msra.mxu0 %v8762_v34  ;;  %v8837_v34 = vld [vmem:[#allocation6 + $0xb28] ss:$28 sps:$4 sm:$0xff]  }
 0x2a2   :  { %5795 = vmatprep.subr.bf16.mxu0 %v8770_v37  ;;  %v8840_v37 = vld [vmem:[#allocation6 + $0xb30] ss:$28 sps:$4 sm:$0xff]  }
 0x2a5   :  { %5796 = vmatpush1.bf16.msra.mxu0 %v8768_v38  ;;  %v8845_v38 = vld [vmem:[#allocation6 + $0xb64] ss:$28 sps:$4 sm:$0xff]  }
 0x2a6   :  { %5797 = vmatprep.subr.bf16.mxu0 %v8776_v39  ;;  %v8848_v39 = vld [vmem:[#allocation6 + $0xb6c] ss:$28 sps:$4 sm:$0xff]  }
 0x2a9   :  { %5798 = vmatpush1.bf16.msra.mxu0 %v8774_v40  ;;  %v8843_v40 = vld [vmem:[#allocation6 + $0xb60] ss:$28 sps:$4 sm:$0xff]  }
 0x2aa   :  { %5799 = vmatprep.subr.bf16.mxu0 %v8782_v41  ;;  %v8846_v41 = vld [vmem:[#allocation6 + $0xb68] ss:$28 sps:$4 sm:$0xff]  }
 0x2ad   :  { %5800 = vmatpush1.bf16.msra.mxu0 %v8780_v42  ;;  %v8851_v42 = vld [vmem:[#allocation6 + $0xb9c] ss:$28 sps:$4 sm:$0xff]  }
 0x2ae   :  { %5801 = vmatprep.subr.bf16.mxu0 %v8788_v46  ;;  %v8854_v46 = vld [vmem:[#allocation6 + $0xba4] ss:$28 sps:$4 sm:$0xff]  }
 0x2b1   :  { %5802 = vmatpush1.bf16.msra.mxu0 %v8786_v49  ;;  %v8849_v49 = vld [vmem:[#allocation6 + $0xb98] ss:$28 sps:$4 sm:$0xff]  }
 0x2b2   :  { %5803 = vmatprep.subr.bf16.mxu0 %v8794_v51  ;;  %v8852_v51 = vld [vmem:[#allocation6 + $0xba0] ss:$28 sps:$4 sm:$0xff]  }
 0x2b5   :  { %5804 = vmatpush1.bf16.msra.mxu0 %v8792_v35  ;;  %v8857_v35 = vld [vmem:[#allocation6 + $0xbd4] ss:$28 sps:$4 sm:$0xff]  }
 0x2b6   :  { %5805 = vmatprep.subr.bf16.mxu0 %v8800_v52  ;;  %v8860_v52 = vld [vmem:[#allocation6 + $0xbdc] ss:$28 sps:$4 sm:$0xff]  }
 0x2b9   :  { %5806 = vmatpush1.bf16.msra.mxu0 %v8798_v53  ;;  %v8855_v53 = vld [vmem:[#allocation6 + $0xbd0] ss:$28 sps:$4 sm:$0xff]  }
 0x2ba   :  { %5807 = vmatprep.subr.bf16.mxu0 %v8806_v47  ;;  %v8858_v47 = vld [vmem:[#allocation6 + $0xbd8] ss:$28 sps:$4 sm:$0xff]  }
 0x2bd   :  { %5808 = vmatpush1.bf16.msra.mxu0 %v8804_v54  ;;  %v8863_v54 = vld [vmem:[#allocation6 + $0xc0c] ss:$28 sps:$4 sm:$0xff]  }
 0x2be   :  { %5809 = vmatprep.subr.bf16.mxu0 %v8812_v50  ;;  %v8866_v50 = vld [vmem:[#allocation6 + $0xc14] ss:$28 sps:$4 sm:$0xff]  }
 0x2c1   :  { %5810 = vmatpush1.bf16.msra.mxu0 %v8810_v9  ;;  %v8861_v9 = vld [vmem:[#allocation6 + $0xc08] ss:$28 sps:$4 sm:$0xff]  }
 0x2c2   :  { %5811 = vmatprep.subr.bf16.mxu0 %v8818_v55  ;;  %v8864_v55 = vld [vmem:[#allocation6 + $0xc10] ss:$28 sps:$4 sm:$0xff]  }
 0x2c5   :  { %5812 = vmatpush1.bf16.msra.mxu0 %v8816_v56  ;;  %v8869_v56 = vld [vmem:[#allocation6 + $0x14] ss:$28 sps:$4 sm:$0xff]  }
 0x2c6   :  { %5824 = vmatprep.subr.bf16.mxu0 %v8824_v57  ;;  %v8870_v57 = vld [vmem:[#allocation6 + $0x1d8] ss:$28 sps:$4 sm:$0xff]  }
 0x2db   :  { %v2828_v61 = vpop.f32.mrb[4].mxu0 }
 0x2dc   :  { %v7940_v62 = vadd.f32 %v2828_v61, %v537_v59  ;;  %v2830_v63 = vpop.f32.mrb[5].mxu0  ;;  %v8875_v61 = vld [vmem:[#allocation6 + $0x210] ss:$28 sps:$4 sm:$0xff]  }
 0x2dd   :  { %v7941_v0 = vadd.f32 %v2830_v63, %v541_v60  ;;  %v2832_v1 = vpop.f32.mrb[6].mxu0  ;;  %v8876_v63 = vld [vmem:[#allocation6 + $0x50] ss:$28 sps:$4 sm:$0xff]  }
 0x2de   :  { %v7942_v2 = vadd.f32 %v2832_v1, %v537_v59  ;;  %v2834_v3 = vpop.f32.mrb[7].mxu0  ;;  %v3005_v5 = vmax.f32 %v7940_v62, 0.0  ;;  %v8871_v59 = vld [vmem:[#allocation6 + $0x18] ss:$28 sps:$4 sm:$0xff]   ;;  %v8872_v62 = vld [vmem:[#allocation6 + $0x48] ss:$28 sps:$4 sm:$0xff]  }
 0x2df   :  { %v7943_v4 = vadd.f32 %v2834_v3, %v541_v60  ;;  %v3006_v7 = vmax.f32 %v7941_v0, 0.0  ;;  %v8874_v60 = vld [vmem:[#allocation6 + $0x4c] ss:$28 sps:$4 sm:$0xff]   ;;  %v8879_v0 = vld [vmem:[#allocation6 + $0x84] ss:$28 sps:$4 sm:$0xff]  }
 0x2e0   :  { %v3012_v6 = vmax.f32 %v7942_v2, 0.0  ;;  %v8880_v1 = vld [vmem:[#allocation6 + $0x248] ss:$28 sps:$4 sm:$0xff]   ;;  %v8877_v2 = vld [vmem:[#allocation6 + $0x80] ss:$28 sps:$4 sm:$0xff]  }
 0x2e1   :  { %v3013_v8 = vmax.f32 %v7943_v4, 0.0  ;;  %v8881_v3 = vld [vmem:[#allocation6 + $0x88] ss:$28 sps:$4 sm:$0xff]   ;;  %v8884_v4 = vld [vmem:[#allocation6 + $0xbc] ss:$28 sps:$4 sm:$0xff]  }
 0x2e2   :  { %v9567_v10 = vpack.c.bf16 %v3012_v6, %v3005_v5  ;;  %v8885_v5 = vld [vmem:[#allocation6 + $0x280] ss:$28 sps:$4 sm:$0xff]   ;;  %v8882_v6 = vld [vmem:[#allocation6 + $0xb8] ss:$28 sps:$4 sm:$0xff]  }
 0x2e3   :  { %v9569_v11 = vpack.c.bf16 %v3013_v8, %v3006_v7  ;;  %v8886_v7 = vld [vmem:[#allocation6 + $0xc0] ss:$28 sps:$4 sm:$0xff]   ;;  %v8889_v8 = vld [vmem:[#allocation6 + $0xf4] ss:$28 sps:$4 sm:$0xff]  }
 0x2e5   :  { %5641 = vmatprep.mubr.bf16.mxu1 %v9569_v11  ;;  %5813 = vmatprep.mubr.bf16.mxu0 %v9569_v11 }
 0x2e6   :  { %5642 = vmatmul.mubr.bf16.vlgmr.msra.gmra.mrb[20].mxu1 %v9567_v10  ;;  %5814 = vmatmul.mubr.bf16.vlgmr.msra.gmra.mrb[8].mxu0 %v9567_v10 }
 0x2e7   :  { %5653 = vmatpush1.bf16.msra.mxu1 %v8819_v13  ;;  %5825 = vmatpush1.bf16.msra.mxu0 %v8822_v14  ;;  %v8887_v13 = vld [vmem:[#allocation6 + $0xf0] ss:$28 sps:$4 sm:$0xff]   ;;  %v8891_v14 = vld [vmem:[#allocation6 + $0xf8] ss:$28 sps:$4 sm:$0xff]  }
 0x2e8   :  { %5654 = vmatprep.subr.bf16.mxu1 %v8827_v15  ;;  %5826 = vmatprep.subr.bf16.mxu0 %v8830_v16  ;;  %v8894_v15 = vld [vmem:[#allocation6 + $0x12c] ss:$28 sps:$4 sm:$0xff]  }
 0x2e9   :  { %5684 = vmatprep.mubr.bf16.mxu1 %v9298_v31  ;;  %5856 = vmatprep.mubr.bf16.mxu0 %v9298_v31  ;;  %v8895_v16 = vld [vmem:[#allocation6 + $0x2f0] ss:$28 sps:$4 sm:$0xff]  }
 0x2eb   :  { %5655 = vmatpush1.bf16.msra.mxu1 %v8825_v20  ;;  %5827 = vmatpush1.bf16.msra.mxu0 %v8828_v21  ;;  %v8892_v20 = vld [vmem:[#allocation6 + $0x128] ss:$28 sps:$4 sm:$0xff]   ;;  %v8896_v21 = vld [vmem:[#allocation6 + $0x130] ss:$28 sps:$4 sm:$0xff]  }
 0x2ec   :  { %5656 = vmatprep.subr.bf16.mxu1 %v8833_v24  ;;  %5828 = vmatprep.subr.bf16.mxu0 %v8836_v27  ;;  %v8899_v24 = vld [vmem:[#allocation6 + $0x164] ss:$28 sps:$4 sm:$0xff]  }
 0x2ed   :  { %v8900_v27 = vld [vmem:[#allocation6 + $0x328] ss:$28 sps:$4 sm:$0xff]  }
 0x2ef   :  { %5657 = vmatpush1.bf16.msra.mxu1 %v8831_v29  ;;  %5829 = vmatpush1.bf16.msra.mxu0 %v8834_v30  ;;  %v8897_v29 = vld [vmem:[#allocation6 + $0x160] ss:$28 sps:$4 sm:$0xff]   ;;  %v8901_v30 = vld [vmem:[#allocation6 + $0x168] ss:$28 sps:$4 sm:$0xff]  }
 0x2f0   :  { %5658 = vmatprep.subr.bf16.mxu1 %v8839_v32  ;;  %5830 = vmatprep.subr.bf16.mxu0 %v8842_v33  ;;  %v8904_v32 = vld [vmem:[#allocation6 + $0x19c] ss:$28 sps:$4 sm:$0xff]  }
 0x2f1   :  { %v8905_v33 = vld [vmem:[#allocation6 + $0x360] ss:$28 sps:$4 sm:$0xff]  }
 0x2f3   :  { %5659 = vmatpush1.bf16.msra.mxu1 %v8837_v34  ;;  %5831 = vmatpush1.bf16.msra.mxu0 %v8840_v37  ;;  %v8902_v34 = vld [vmem:[#allocation6 + $0x198] ss:$28 sps:$4 sm:$0xff]   ;;  %v8906_v37 = vld [vmem:[#allocation6 + $0x1a0] ss:$28 sps:$4 sm:$0xff]  }
 0x2f4   :  { %5660 = vmatprep.subr.bf16.mxu1 %v8845_v38  ;;  %5832 = vmatprep.subr.bf16.mxu0 %v8848_v39  ;;  %v8909_v38 = vld [vmem:[#allocation6 + $0x1d4] ss:$28 sps:$4 sm:$0xff]  }
 0x2f5   :  { %v8910_v39 = vld [vmem:[#allocation6 + $0x558] ss:$28 sps:$4 sm:$0xff]  }
 0x2f7   :  { %5661 = vmatpush1.bf16.msra.mxu1 %v8843_v40  ;;  %5833 = vmatpush1.bf16.msra.mxu0 %v8846_v41  ;;  %v8907_v40 = vld [vmem:[#allocation6 + $0x1d0] ss:$28 sps:$4 sm:$0xff]   ;;  %v8911_v41 = vld [vmem:[#allocation6 + $0x398] ss:$28 sps:$4 sm:$0xff]  }
 0x2f8   :  { %5662 = vmatprep.subr.bf16.mxu1 %v8851_v42  ;;  %5834 = vmatprep.subr.bf16.mxu0 %v8854_v46  ;;  %v8914_v42 = vld [vmem:[#allocation6 + $0x20c] ss:$28 sps:$4 sm:$0xff]  }
 0x2f9   :  { %v8915_v46 = vld [vmem:[#allocation6 + $0x590] ss:$28 sps:$4 sm:$0xff]  }
 0x2fb   :  { %5663 = vmatpush1.bf16.msra.mxu1 %v8849_v49  ;;  %5835 = vmatpush1.bf16.msra.mxu0 %v8852_v51  ;;  %v8912_v49 = vld [vmem:[#allocation6 + $0x208] ss:$28 sps:$4 sm:$0xff]   ;;  %v8916_v51 = vld [vmem:[#allocation6 + $0x3d0] ss:$28 sps:$4 sm:$0xff]  }
 0x2fc   :  { %5664 = vmatprep.subr.bf16.mxu1 %v8857_v35  ;;  %5836 = vmatprep.subr.bf16.mxu0 %v8860_v52  ;;  %v8919_v35 = vld [vmem:[#allocation6 + $0x244] ss:$28 sps:$4 sm:$0xff]  }
 0x2fd   :  { %v8920_v52 = vld [vmem:[#allocation6 + $0x5c8] ss:$28 sps:$4 sm:$0xff]  }
 0x2ff   :  { %5665 = vmatpush1.bf16.msra.mxu1 %v8855_v53  ;;  %5837 = vmatpush1.bf16.msra.mxu0 %v8858_v47  ;;  %v8917_v53 = vld [vmem:[#allocation6 + $0x240] ss:$28 sps:$4 sm:$0xff]   ;;  %v8921_v47 = vld [vmem:[#allocation6 + $0x408] ss:$28 sps:$4 sm:$0xff]  }
 0x300   :  { %5666 = vmatprep.subr.bf16.mxu1 %v8863_v54  ;;  %5838 = vmatprep.subr.bf16.mxu0 %v8866_v50  ;;  %v8924_v54 = vld [vmem:[#allocation6 + $0x27c] ss:$28 sps:$4 sm:$0xff]  }
 0x301   :  { %v8925_v50 = vld [vmem:[#allocation6 + $0x600] ss:$28 sps:$4 sm:$0xff]  }
 0x303   :  { %5667 = vmatpush1.bf16.msra.mxu1 %v8861_v9  ;;  %5839 = vmatpush1.bf16.msra.mxu0 %v8864_v55  ;;  %v8922_v9 = vld [vmem:[#allocation6 + $0x278] ss:$28 sps:$4 sm:$0xff]   ;;  %v8926_v55 = vld [vmem:[#allocation6 + $0x440] ss:$28 sps:$4 sm:$0xff]  }
 0x304   :  { %5867 = vmatprep.subr.bf16.mxu1 %v8869_v56  ;;  %7736 = vmatprep.subr.bf16.mxu0 %v8870_v57  ;;  %v8929_v56 = vld [vmem:[#allocation6 + $0x2b4] ss:$28 sps:$4 sm:$0xff]  }
 0x305   :  { %v8930_v57 = vld [vmem:[#allocation6 + $0x638] ss:$28 sps:$4 sm:$0xff]  }
 0x306   :  { %5685 = vmatmul.mubr.bf16.vlgmr.msra.gmra.mrb[20].mxu1 %v9558_v25  ;;  %5857 = vmatmul.mubr.bf16.vlgmr.msra.gmra.mrb[8].mxu0 %v9558_v25 }
 0x307   :  { %5868 = vmatpush1.bf16.msra.mxu1 %v8867_v36  ;;  %5899 = vmatprep.mubr.bf16.mxu1 %v9531_v22  ;;  %v8927_v36 = vld [vmem:[#allocation6 + $0x2b0] ss:$28 sps:$4 sm:$0xff]  }
 0x308   :  { %7737 = vmatpush3.bf16.msra.mxu0 %v8871_v59  ;;  %6071 = vmatprep.mubr.bf16.mxu0 %v9531_v22  ;;  %v8890_v22 = vld [vmem:[#allocation6 + $0x2b8] ss:$28 sps:$4 sm:$0xff]  }
 0x309   :  { %5869 = vmatprep.subr.bf16.mxu1 %v8874_v60  ;;  %7738 = vmatprep.subr.bf16.mxu0 %v8875_v61  ;;  %v8931_v59 = vld [vmem:[#allocation6 + $0x478] ss:$28 sps:$4 sm:$0xff]   ;;  %v8934_v60 = vld [vmem:[#allocation6 + $0x2ec] ss:$28 sps:$4 sm:$0xff]  }
 0x30a   :  { %v8935_v61 = vld [vmem:[#allocation6 + $0x670] ss:$28 sps:$4 sm:$0xff]  }
 0x30b   :  { %5870 = vmatpush1.bf16.msra.mxu1 %v8872_v62  ;;  %v8932_v62 = vld [vmem:[#allocation6 + $0x2e8] ss:$28 sps:$4 sm:$0xff]  }
 0x30c   :  { %7739 = vmatpush3.bf16.msra.mxu0 %v8876_v63  ;;  %5871 = vmatprep.subr.bf16.mxu1 %v8879_v0  ;;  %v8936_v63 = vld [vmem:[#allocation6 + $0x4b0] ss:$28 sps:$4 sm:$0xff]   ;;  %v8939_v0 = vld [vmem:[#allocation6 + $0x324] ss:$28 sps:$4 sm:$0xff]  }
 0x30d   :  { %7740 = vmatprep.subr.bf16.mxu0 %v8880_v1  ;;  %v8940_v1 = vld [vmem:[#allocation6 + $0x6a8] ss:$28 sps:$4 sm:$0xff]  }
 0x30f   :  { %5872 = vmatpush1.bf16.msra.mxu1 %v8877_v2  ;;  %v8937_v2 = vld [vmem:[#allocation6 + $0x320] ss:$28 sps:$4 sm:$0xff]  }
 0x310   :  { %7741 = vmatpush3.bf16.msra.mxu0 %v8881_v3  ;;  %5873 = vmatprep.subr.bf16.mxu1 %v8884_v4  ;;  %v8941_v3 = vld [vmem:[#allocation6 + $0x4e8] ss:$28 sps:$4 sm:$0xff]   ;;  %v8944_v4 = vld [vmem:[#allocation6 + $0x35c] ss:$28 sps:$4 sm:$0xff]  }
 0x311   :  { %7742 = vmatprep.subr.bf16.mxu0 %v8885_v5  ;;  %v8945_v5 = vld [vmem:[#allocation6 + $0x6e0] ss:$28 sps:$4 sm:$0xff]  }
 0x313   :  { %5874 = vmatpush1.bf16.msra.mxu1 %v8882_v6  ;;  %v8942_v6 = vld [vmem:[#allocation6 + $0x358] ss:$28 sps:$4 sm:$0xff]  }
 0x314   :  { %7743 = vmatpush3.bf16.msra.mxu0 %v8886_v7  ;;  %5875 = vmatprep.subr.bf16.mxu1 %v8889_v8  ;;  %v8946_v7 = vld [vmem:[#allocation6 + $0x520] ss:$28 sps:$4 sm:$0xff]   ;;  %v8949_v8 = vld [vmem:[#allocation6 + $0x394] ss:$28 sps:$4 sm:$0xff]  }
 0x315   :  { %7744 = vmatprep.subr.bf16.mxu0 %v8890_v22  ;;  %v8950_v22 = vld [vmem:[#allocation6 + $0x8d8] ss:$28 sps:$4 sm:$0xff]  }
 0x317   :  { %5876 = vmatpush1.bf16.msra.mxu1 %v8887_v13  ;;  %v8947_v13 = vld [vmem:[#allocation6 + $0x390] ss:$28 sps:$4 sm:$0xff]  }
 0x318   :  { %7745 = vmatpush3.bf16.msra.mxu0 %v8891_v14  ;;  %5877 = vmatprep.subr.bf16.mxu1 %v8894_v15  ;;  %v8951_v14 = vld [vmem:[#allocation6 + $0x718] ss:$28 sps:$4 sm:$0xff]   ;;  %v8954_v15 = vld [vmem:[#allocation6 + $0x3cc] ss:$28 sps:$4 sm:$0xff]  }
 0x319   :  { %7746 = vmatprep.subr.bf16.mxu0 %v8895_v16  ;;  %v8955_v16 = vld [vmem:[#allocation6 + $0x910] ss:$28 sps:$4 sm:$0xff]  }
 0x31b   :  { %5878 = vmatpush1.bf16.msra.mxu1 %v8892_v20  ;;  %v8952_v20 = vld [vmem:[#allocation6 + $0x3c8] ss:$28 sps:$4 sm:$0xff]  }
 0x31c   :  { %7747 = vmatpush3.bf16.msra.mxu0 %v8896_v21  ;;  %5879 = vmatprep.subr.bf16.mxu1 %v8899_v24  ;;  %v8956_v21 = vld [vmem:[#allocation6 + $0x750] ss:$28 sps:$4 sm:$0xff]   ;;  %v8959_v24 = vld [vmem:[#allocation6 + $0x404] ss:$28 sps:$4 sm:$0xff]  }
 0x31d   :  { %7748 = vmatprep.subr.bf16.mxu0 %v8900_v27  ;;  %v8960_v27 = vld [vmem:[#allocation6 + $0x948] ss:$28 sps:$4 sm:$0xff]  }
 0x31f   :  { %5880 = vmatpush1.bf16.msra.mxu1 %v8897_v29  ;;  %v8957_v29 = vld [vmem:[#allocation6 + $0x400] ss:$28 sps:$4 sm:$0xff]  }
 0x320   :  { %7749 = vmatpush3.bf16.msra.mxu0 %v8901_v30  ;;  %5881 = vmatprep.subr.bf16.mxu1 %v8904_v32  ;;  %v8964_v30 = vld [vmem:[#allocation6 + $0x43c] ss:$28 sps:$4 sm:$0xff]  }
 0x321   :  { %7750 = vmatprep.subr.bf16.mxu0 %v8905_v33  ;;  %v8965_v32 = vld [vmem:[#allocation6 + $0x980] ss:$28 sps:$4 sm:$0xff]   ;;  %v8962_v33 = vld [vmem:[#allocation6 + $0x438] ss:$28 sps:$4 sm:$0xff]  }
 0x323   :  { %5882 = vmatpush1.bf16.msra.mxu1 %v8902_v34  ;;  %v8969_v34 = vld [vmem:[#allocation6 + $0x474] ss:$28 sps:$4 sm:$0xff]  }
 0x324   :  { %7751 = vmatpush3.bf16.msra.mxu0 %v8906_v37  ;;  %5883 = vmatprep.subr.bf16.mxu1 %v8909_v38  ;;  %v8970_v37 = vld [vmem:[#allocation6 + $0x9b8] ss:$28 sps:$4 sm:$0xff]   ;;  %v8967_v38 = vld [vmem:[#allocation6 + $0x470] ss:$28 sps:$4 sm:$0xff]  }
 0x325   :  { %7758 = vmatprep.subr.bf16.mxu0 %v8910_v39  ;;  %v8971_v39 = vld [vmem:[#allocation6 + $0x7f8] ss:$28 sps:$4 sm:$0xff]  }
 0x327   :  { %6072 = vmatmul.mubr.bf16.vlgmr.msra.gmra.mrb[12].mxu0 %v9527_v18  ;;  %5884 = vmatpush1.bf16.msra.mxu1 %v8907_v40  ;;  %v8974_v40 = vld [vmem:[#allocation6 + $0x4ac] ss:$28 sps:$4 sm:$0xff]  }
 0x328   :  { %7759 = vmatpush3.bf16.msra.mxu0 %v8911_v41  ;;  %6112 = vmatprep.mubr.bf16.mxu0 %v9533_v23  ;;  %v8975_v41 = vld [vmem:[#allocation6 + $0x9f0] ss:$28 sps:$4 sm:$0xff]  }
 0x329   :  { %5885 = vmatprep.subr.bf16.mxu1 %v8914_v42  ;;  %7760 = vmatprep.subr.bf16.mxu0 %v8915_v46  ;;  %v8972_v42 = vld [vmem:[#allocation6 + $0x4a8] ss:$28 sps:$4 sm:$0xff]   ;;  %v8976_v46 = vld [vmem:[#allocation6 + $0x830] ss:$28 sps:$4 sm:$0xff]  }
 0x32b   :  { %5886 = vmatpush1.bf16.msra.mxu1 %v8912_v49  ;;  %v8979_v49 = vld [vmem:[#allocation6 + $0x4e4] ss:$28 sps:$4 sm:$0xff]  }
 0x32c   :  { %7761 = vmatpush3.bf16.msra.mxu0 %v8916_v51  ;;  %5887 = vmatprep.subr.bf16.mxu1 %v8919_v35  ;;  %v8980_v51 = vld [vmem:[#allocation6 + $0xa28] ss:$28 sps:$4 sm:$0xff]   ;;  %v8977_v35 = vld [vmem:[#allocation6 + $0x4e0] ss:$28 sps:$4 sm:$0xff]  }
 0x32d   :  { %7762 = vmatprep.subr.bf16.mxu0 %v8920_v52  ;;  %v8981_v52 = vld [vmem:[#allocation6 + $0x868] ss:$28 sps:$4 sm:$0xff]  }
 0x32f   :  { %5888 = vmatpush1.bf16.msra.mxu1 %v8917_v53  ;;  %v8984_v53 = vld [vmem:[#allocation6 + $0x51c] ss:$28 sps:$4 sm:$0xff]  }
 0x330   :  { %7763 = vmatpush3.bf16.msra.mxu0 %v8921_v47  ;;  %5889 = vmatprep.subr.bf16.mxu1 %v8924_v54  ;;  %v8985_v47 = vld [vmem:[#allocation6 + $0xa60] ss:$28 sps:$4 sm:$0xff]   ;;  %v8982_v54 = vld [vmem:[#allocation6 + $0x518] ss:$28 sps:$4 sm:$0xff]  }
 0x331   :  { %7764 = vmatprep.subr.bf16.mxu0 %v8925_v50  ;;  %v8986_v50 = vld [vmem:[#allocation6 + $0x8a0] ss:$28 sps:$4 sm:$0xff]  }
 0x333   :  { %5890 = vmatpush1.bf16.msra.mxu1 %v8922_v9  ;;  %v8989_v9 = vld [vmem:[#allocation6 + $0x554] ss:$28 sps:$4 sm:$0xff]  }
 0x334   :  { %7765 = vmatpush3.bf16.msra.mxu0 %v8926_v55  ;;  %5891 = vmatprep.subr.bf16.mxu1 %v8929_v56  ;;  %v8987_v55 = vld [vmem:[#allocation6 + $0x550] ss:$28 sps:$4 sm:$0xff]   ;;  %v8990_v56 = vld [vmem:[#allocation6 + $0xa98] ss:$28 sps:$4 sm:$0xff]  }
 0x335   :  { %7766 = vmatprep.subr.bf16.mxu0 %v8930_v57  ;;  %v8993_v57 = vld [vmem:[#allocation6 + $0x58c] ss:$28 sps:$4 sm:$0xff]  }
 0x337   :  { %5892 = vmatpush1.bf16.msra.mxu1 %v8927_v36  ;;  %v8991_v36 = vld [vmem:[#allocation6 + $0x588] ss:$28 sps:$4 sm:$0xff]  }
 0x338   :  { %7767 = vmatpush3.bf16.msra.mxu0 %v8931_v59  ;;  %5893 = vmatprep.subr.bf16.mxu1 %v8934_v60  ;;  %v8994_v59 = vld [vmem:[#allocation6 + $0xad0] ss:$28 sps:$4 sm:$0xff]   ;;  %v8997_v60 = vld [vmem:[#allocation6 + $0x5c4] ss:$28 sps:$4 sm:$0xff]  }
 0x339   :  { %7768 = vmatprep.subr.bf16.mxu0 %v8935_v61  ;;  %v8995_v61 = vld [vmem:[#allocation6 + $0x5c0] ss:$28 sps:$4 sm:$0xff]  }
 0x33b   :  { %5894 = vmatpush1.bf16.msra.mxu1 %v8932_v62  ;;  %v8998_v62 = vld [vmem:[#allocation6 + $0xb08] ss:$28 sps:$4 sm:$0xff]  }
 0x33c   :  { %7769 = vmatpush3.bf16.msra.mxu0 %v8936_v63  ;;  %5895 = vmatprep.subr.bf16.mxu1 %v8939_v0  ;;  %v9001_v63 = vld [vmem:[#allocation6 + $0x5fc] ss:$28 sps:$4 sm:$0xff]  }
 0x33d   :  { %7770 = vmatprep.subr.bf16.mxu0 %v8940_v1  ;;  %v8999_v0 = vld [vmem:[#allocation6 + $0x5f8] ss:$28 sps:$4 sm:$0xff]   ;;  %v9002_v1 = vld [vmem:[#allocation6 + $0xb40] ss:$28 sps:$4 sm:$0xff]  }
 0x33f   :  { %5896 = vmatpush1.bf16.msra.mxu1 %v8937_v2  ;;  %v9005_v2 = vld [vmem:[#allocation6 + $0x634] ss:$28 sps:$4 sm:$0xff]  }
 0x340   :  { %7771 = vmatpush3.bf16.msra.mxu0 %v8941_v3  ;;  %5897 = vmatprep.subr.bf16.mxu1 %v8944_v4  ;;  %v9003_v3 = vld [vmem:[#allocation6 + $0x630] ss:$28 sps:$4 sm:$0xff]   ;;  %v9006_v4 = vld [vmem:[#allocation6 + $0xb78] ss:$28 sps:$4 sm:$0xff]  }
 0x341   :  { %7772 = vmatprep.subr.bf16.mxu0 %v8945_v5  ;;  %v9009_v5 = vld [vmem:[#allocation6 + $0x66c] ss:$28 sps:$4 sm:$0xff]  }
 0x343   :  { %5898 = vmatpush1.bf16.msra.mxu1 %v8942_v6  ;;  %v9007_v6 = vld [vmem:[#allocation6 + $0x668] ss:$28 sps:$4 sm:$0xff]  }
 0x344   :  { %7773 = vmatpush3.bf16.msra.mxu0 %v8946_v7  ;;  %5910 = vmatprep.subr.bf16.mxu1 %v8949_v8  ;;  %v9010_v7 = vld [vmem:[#allocation6 + $0xbb0] ss:$28 sps:$4 sm:$0xff]   ;;  %v9013_v8 = vld [vmem:[#allocation6 + $0x6a4] ss:$28 sps:$4 sm:$0xff]  }
 0x345   :  { %7780 = vmatprep.subr.bf16.mxu0 %v8950_v22  ;;  %v9011_v22 = vld [vmem:[#allocation6 + $0x6a0] ss:$28 sps:$4 sm:$0xff]  }
 0x346   :  { %5900 = vmatmul.mubr.bf16.vlgmr.msra.gmra.mrb[24].mxu1 %v9527_v18  ;;  %v8961_v18 = vld [vmem:[#allocation6 + $0x788] ss:$28 sps:$4 sm:$0xff]  }
 0x347   :  { %6113 = vmatmul.mubr.bf16.vlgmr.msra.gmra.mrb[16].mxu0 %v9529_v19  ;;  %5911 = vmatpush1.bf16.msra.mxu1 %v8947_v13  ;;  %v9014_v13 = vld [vmem:[#allocation6 + $0xbe8] ss:$28 sps:$4 sm:$0xff]  }
 0x348   :  { %5942 = vmatprep.mubr.bf16.mxu1 %v9533_v23  ;;  %7781 = vmatpush3.bf16.msra.mxu0 %v8951_v14  ;;  %v8966_v23 = vld [vmem:[#allocation6 + $0x7c0] ss:$28 sps:$4 sm:$0xff]  }
 0x349   :  { %6153 = vmatprep.mubr.bf16.mxu0 %v9569_v11  ;;  %5912 = vmatprep.subr.bf16.mxu1 %v8954_v15  ;;  %v9017_v14 = vld [vmem:[#allocation6 + $0x6dc] ss:$28 sps:$4 sm:$0xff]  }
 0x34a   :  { %7782 = vmatprep.subr.bf16.mxu0 %v8955_v16  ;;  %v9015_v15 = vld [vmem:[#allocation6 + $0x6d8] ss:$28 sps:$4 sm:$0xff]   ;;  %v9018_v16 = vld [vmem:[#allocation6 + $0xc20] ss:$28 sps:$4 sm:$0xff]  }
 0x34b   :  { %5913 = vmatpush1.bf16.msra.mxu1 %v8952_v20  ;;  %v9021_v20 = vld [vmem:[#allocation6 + $0x714] ss:$28 sps:$4 sm:$0xff]  }
 0x34c   :  { %7783 = vmatpush3.bf16.msra.mxu0 %v8956_v21  ;;  %5914 = vmatprep.subr.bf16.mxu1 %v8959_v24  ;;  %v9067_v21 = vld [vmem:[#allocation9 + $0x40] sm:$0xff]  }
 0x34d   :  { %7784 = vmatprep.subr.bf16.mxu0 %v8960_v27  ;;  %v9019_v24 = vld [vmem:[#allocation6 + $0x710] ss:$28 sps:$4 sm:$0xff]  }
 0x34e   :  { %v9024_v27 = vld [vmem:[#allocation6 + $0x74c] ss:$28 sps:$4 sm:$0xff]  }
 0x34f   :  { %5915 = vmatpush1.bf16.msra.mxu1 %v8957_v29  ;;  %v9068_v29 = vld [vmem:[#allocation9] sm:$0xff]  }
 0x350   :  { %7785 = vmatpush3.bf16.msra.mxu0 %v8961_v18  ;;  %5916 = vmatprep.subr.bf16.mxu1 %v8964_v30  ;;  %v9072_v18 = vld [vmem:[#allocation9 + $0x48] sm:$0xff]   ;;  %v9022_v30 = vld [vmem:[#allocation6 + $0x748] ss:$28 sps:$4 sm:$0xff]  }
 0x351   :  { %7786 = vmatprep.subr.bf16.mxu0 %v8965_v32  ;;  %v9027_v32 = vld [vmem:[#allocation6 + $0x784] ss:$28 sps:$4 sm:$0xff]  }
 0x353   :  { %5917 = vmatpush1.bf16.msra.mxu1 %v8962_v33  ;;  %v9073_v33 = vld [vmem:[#allocation9 + $0x8] sm:$0xff]  }
 0x354   :  { %7787 = vmatpush3.bf16.msra.mxu0 %v8966_v23  ;;  %5918 = vmatprep.subr.bf16.mxu1 %v8969_v34  ;;  %v9077_v23 = vld [vmem:[#allocation9 + $0x50] sm:$0xff]  }
 0x355   :  { %7788 = vmatprep.subr.bf16.mxu0 %v8970_v37  ;;  %v9025_v34 = vld [vmem:[#allocation6 + $0x780] ss:$28 sps:$4 sm:$0xff]  }
 0x356   :  { %v9030_v37 = vld [vmem:[#allocation6 + $0x7bc] ss:$28 sps:$4 sm:$0xff]  }
 0x357   :  { %5919 = vmatpush1.bf16.msra.mxu1 %v8967_v38  ;;  %v9078_v38 = vld [vmem:[#allocation9 + $0x10] sm:$0xff]  }
 0x358   :  { %7789 = vmatpush3.bf16.msra.mxu0 %v8971_v39  ;;  %5920 = vmatprep.subr.bf16.mxu1 %v8974_v40  ;;  %v9028_v39 = vld [vmem:[#allocation6 + $0x7b8] ss:$28 sps:$4 sm:$0xff]  }
 0x359   :  { %7790 = vmatprep.subr.bf16.mxu0 %v8975_v41  ;;  %v9033_v40 = vld [vmem:[#allocation6 + $0x7f4] ss:$28 sps:$4 sm:$0xff]   ;;  %v9087_v41 = vld [vmem:[#allocation9 + $0x60] sm:$0xff]  }
 0x35b   :  { %5921 = vmatpush1.bf16.msra.mxu1 %v8972_v42  ;;  %v9031_v42 = vld [vmem:[#allocation6 + $0x7f0] ss:$28 sps:$4 sm:$0xff]  }
 0x35c   :  { %7791 = vmatpush3.bf16.msra.mxu0 %v8976_v46  ;;  %5922 = vmatprep.subr.bf16.mxu1 %v8979_v49  ;;  %v9036_v46 = vld [vmem:[#allocation6 + $0x82c] ss:$28 sps:$4 sm:$0xff]  }
 0x35d   :  { %7792 = vmatprep.subr.bf16.mxu0 %v8980_v51  ;;  %v9088_v49 = vld [vmem:[#allocation9 + $0x20] sm:$0xff]   ;;  %v9092_v51 = vld [vmem:[#allocation9 + $0x68] sm:$0xff]  }
 0x35f   :  { %5923 = vmatpush1.bf16.msra.mxu1 %v8977_v35  ;;  %v9034_v35 = vld [vmem:[#allocation6 + $0x828] ss:$28 sps:$4 sm:$0xff]  }
 0x360   :  { %7793 = vmatpush3.bf16.msra.mxu0 %v8981_v52  ;;  %5924 = vmatprep.subr.bf16.mxu1 %v8984_v53  ;;  %v9039_v52 = vld [vmem:[#allocation6 + $0x864] ss:$28 sps:$4 sm:$0xff]   ;;  %v9093_v53 = vld [vmem:[#allocation9 + $0x28] sm:$0xff]  }
 0x361   :  { %7794 = vmatprep.subr.bf16.mxu0 %v8985_v47  ;;  %v9097_v47 = vld [vmem:[#allocation9 + $0x70] sm:$0xff]  }
 0x363   :  { %5925 = vmatpush1.bf16.msra.mxu1 %v8982_v54  ;;  %v9037_v54 = vld [vmem:[#allocation6 + $0x860] ss:$28 sps:$4 sm:$0xff]  }
 0x364   :  { %7795 = vmatpush3.bf16.msra.mxu0 %v8986_v50  ;;  %5926 = vmatprep.subr.bf16.mxu1 %v8989_v9  ;;  %v9042_v50 = vld [vmem:[#allocation6 + $0x89c] ss:$28 sps:$4 sm:$0xff]  }
 0x365   :  { %7892 = vmatprep.subr.bf16.mxu0 %v9299_v12  ;;  %v9098_v9 = vld [vmem:[#allocation9 + $0x30] sm:$0xff]  }
 0x367   :  { %6154 = vmatmul.mubr.bf16.vlgmr.msra.gmra.mrb[20].mxu0 %v9567_v10  ;;  %5927 = vmatpush1.bf16.msra.mxu1 %v8987_v55  ;;  %v9102_v55 = vld [vmem:[#allocation9 + $0x78] sm:$0xff]  }
 0x368   :  { %7893 = vmatpush3.bf16.msra.mxu0 %v8990_v56  ;;  %5928 = vmatprep.subr.bf16.mxu1 %v8993_v57  ;;  %v9040_v56 = vld [vmem:[#allocation6 + $0x898] ss:$28 sps:$4 sm:$0xff]  }
 0x369   :  { %7894 = vmatprep.subr.bf16.mxu0 %v9299_v12  ;;  %7908 = vmatprep.mubr.msk.bf16.mxu0 %vm9300_vm1, %v9299_v12  ;;  %v9045_v57 = vld [vmem:[#allocation6 + $0x8d4] ss:$28 sps:$4 sm:$0xff]  }
 0x36b   :  { %5929 = vmatpush1.bf16.msra.mxu1 %v8991_v36  ;;  %v9103_v36 = vld [vmem:[#allocation9 + $0x38] sm:$0xff]  }
 0x36c   :  { %7895 = vmatpush3.bf16.msra.mxu0 %v8994_v59  ;;  %5930 = vmatprep.subr.bf16.mxu1 %v8997_v60  ;;  %v9043_v59 = vld [vmem:[#allocation6 + $0x8d0] ss:$28 sps:$4 sm:$0xff]  }
 0x36d   :  { %7896 = vmatprep.subr.bf16.mxu0 %v9299_v12  ;;  %v9048_v60 = vld [vmem:[#allocation6 + $0x90c] ss:$28 sps:$4 sm:$0xff]  }
 0x36f   :  { %5931 = vmatpush1.bf16.msra.mxu1 %v8995_v61  ;;  %v9046_v61 = vld [vmem:[#allocation6 + $0x908] ss:$28 sps:$4 sm:$0xff]  }
 0x370   :  { %7897 = vmatpush3.bf16.msra.mxu0 %v8998_v62  ;;  %5932 = vmatprep.subr.bf16.mxu1 %v9001_v63  ;;  %v9051_v62 = vld [vmem:[#allocation6 + $0x944] ss:$28 sps:$4 sm:$0xff]  }
 0x371   :  { %7898 = vmatprep.subr.bf16.mxu0 %v9299_v12  ;;  %v9049_v63 = vld [vmem:[#allocation6 + $0x940] ss:$28 sps:$4 sm:$0xff]  }
 0x373   :  { %5933 = vmatpush1.bf16.msra.mxu1 %v8999_v0  ;;  %v9054_v0 = vld [vmem:[#allocation6 + $0x97c] ss:$28 sps:$4 sm:$0xff]  }
 0x374   :  { %7899 = vmatpush3.bf16.msra.mxu0 %v9002_v1  ;;  %5934 = vmatprep.subr.bf16.mxu1 %v9005_v2  ;;  %v9052_v1 = vld [vmem:[#allocation6 + $0x978] ss:$28 sps:$4 sm:$0xff]  }
 0x375   :  { %7900 = vmatprep.subr.bf16.mxu0 %v9299_v12  ;;  %v9057_v2 = vld [vmem:[#allocation6 + $0x9b4] ss:$28 sps:$4 sm:$0xff]  }
 0x377   :  { %5935 = vmatpush1.bf16.msra.mxu1 %v9003_v3  ;;  %v9055_v3 = vld [vmem:[#allocation6 + $0x9b0] ss:$28 sps:$4 sm:$0xff]  }
 0x378   :  { %7901 = vmatpush3.bf16.msra.mxu0 %v9006_v4  ;;  %5936 = vmatprep.subr.bf16.mxu1 %v9009_v5  ;;  %v9060_v4 = vld [vmem:[#allocation6 + $0x9ec] ss:$28 sps:$4 sm:$0xff]  }
 0x379   :  { %7902 = vmatprep.subr.bf16.mxu0 %v9299_v12  ;;  %v9058_v5 = vld [vmem:[#allocation6 + $0x9e8] ss:$28 sps:$4 sm:$0xff]  }
 0x37b   :  { %5937 = vmatpush1.bf16.msra.mxu1 %v9007_v6  ;;  %v9063_v6 = vld [vmem:[#allocation6 + $0xa24] ss:$28 sps:$4 sm:$0xff]  }
 0x37c   :  { %7903 = vmatpush3.bf16.msra.mxu0 %v9010_v7  ;;  %5938 = vmatprep.subr.bf16.mxu1 %v9013_v8  ;;  %v9061_v7 = vld [vmem:[#allocation6 + $0xa20] ss:$28 sps:$4 sm:$0xff]  }
 0x37d   :  { %7904 = vmatprep.subr.bf16.mxu0 %v9299_v12  ;;  %v9066_v8 = vld [vmem:[#allocation6 + $0xa5c] ss:$28 sps:$4 sm:$0xff]  }
 0x37f   :  { %5939 = vmatpush1.bf16.msra.mxu1 %v9011_v22  ;;  %v9064_v22 = vld [vmem:[#allocation6 + $0xa58] ss:$28 sps:$4 sm:$0xff]  }
 0x380   :  { %7905 = vmatpush3.bf16.msra.mxu0 %v9014_v13  ;;  %5940 = vmatprep.subr.bf16.mxu1 %v9017_v14  ;;  %v9071_v13 = vld [vmem:[#allocation6 + $0xa94] ss:$28 sps:$4 sm:$0xff]  }
 0x381   :  { %7906 = vmatprep.subr.bf16.mxu0 %v9299_v12  ;;  %v9069_v14 = vld [vmem:[#allocation6 + $0xa90] ss:$28 sps:$4 sm:$0xff]  }
 0x383   :  { %5941 = vmatpush1.bf16.msra.mxu1 %v9015_v15  ;;  %v9076_v15 = vld [vmem:[#allocation6 + $0xacc] ss:$28 sps:$4 sm:$0xff]  }
 0x384   :  { %7907 = vmatpush3.bf16.msra.mxu0 %v9018_v16  ;;  %5953 = vmatprep.subr.bf16.mxu1 %v9021_v20  ;;  %v9074_v16 = vld [vmem:[#allocation6 + $0xac8] ss:$28 sps:$4 sm:$0xff]  }
 0x385   :  { %7811 = vmatprep.subr.bf16.mxu0 %v9067_v21  ;;  %v9081_v20 = vld [vmem:[#allocation6 + $0xb04] ss:$28 sps:$4 sm:$0xff]  }
 0x386   :  { %5943 = vmatmul.mubr.bf16.vlgmr.msra.gmra.mrb[24].mxu1 %v9529_v19  ;;  %v9082_v19 = vld [vmem:[#allocation9 + $0x58] sm:$0xff]  }
 0x387   :  { %7909 = vmatmul.mubr.bf16.vlgmr.msra.gmra.mrb[24].mxu0 %v9558_v25  ;;  %5954 = vmatpush1.bf16.msra.mxu1 %v9019_v24  ;;  %v9079_v21 = vld [vmem:[#allocation6 + $0xb00] ss:$28 sps:$4 sm:$0xff]  }
 0x388   :  { %5985 = vmatprep.mubr.bf16.mxu1 %v9569_v11  ;;  %5955 = vmatprep.subr.bf16.mxu1 %v9024_v27  ;;  %v9083_v11 = vld [vmem:[#allocation9 + $0x18] sm:$0xff]   ;;  %v9086_v24 = vld [vmem:[#allocation6 + $0xb3c] ss:$28 sps:$4 sm:$0xff]  }
 0x389   :  { %7812 = vmatpush3.bf16.msra.mxu0 %v9068_v29  ;;  %v9084_v27 = vld [vmem:[#allocation6 + $0xb38] ss:$28 sps:$4 sm:$0xff]  }
 0x38a   :  { %7813 = vmatprep.subr.bf16.mxu0 %v9072_v18  ;;  %v9091_v29 = vld [vmem:[#allocation6 + $0xb74] ss:$28 sps:$4 sm:$0xff]  }
 0x38b   :  { %5956 = vmatpush1.bf16.msra.mxu1 %v9022_v30  ;;  %v9089_v18 = vld [vmem:[#allocation6 + $0xb70] ss:$28 sps:$4 sm:$0xff]   ;;  %v9603_v30 = vld [vmem:[#allocation7] sm:$0xff] }
 0x38c   :  { %5957 = vmatprep.subr.bf16.mxu1 %v9027_v32  ;;  %v3483_v32 = vrot.slane %v9603_v30, %v528_v45 }
 0x38d   :  { %7814 = vmatpush3.bf16.msra.mxu0 %v9073_v33  ;;  %v3479_v33 = vrot.slane %v9603_v30, %v524_v26 }
 0x38e   :  { %7815 = vmatprep.subr.bf16.mxu0 %v9077_v23  ;;  %v3487_v23 = vrot.slane %v9603_v30, %v532_v48  ;;  %v9106_v48 = vld [vmem:[#allocation6 + $0xc1c] ss:$28 sps:$4 sm:$0xff]  }
 0x38f   :  { %5958 = vmatpush1.bf16.msra.mxu1 %v9025_v34  ;;  %v9094_v34 = vld [vmem:[#allocation6 + $0xba8] ss:$28 sps:$4 sm:$0xff]  }
 0x390   :  { %5959 = vmatprep.subr.bf16.mxu1 %v9030_v37  ;;  %v9101_v37 = vld [vmem:[#allocation6 + $0xbe4] ss:$28 sps:$4 sm:$0xff]  }
 0x391   :  { %7816 = vmatpush3.bf16.msra.mxu0 %v9078_v38 }
 0x392   :  { %7817 = vmatprep.subr.bf16.mxu0 %v9082_v19 }
 0x393   :  { %5960 = vmatpush1.bf16.msra.mxu1 %v9028_v39 }
 0x394   :  { %5961 = vmatprep.subr.bf16.mxu1 %v9033_v40 }
 0x395   :  { %7818 = vmatpush3.bf16.msra.mxu0 %v9083_v11 }
 0x396   :  { %7819 = vmatprep.subr.bf16.mxu0 %v9087_v41 }
 0x397   :  { %5962 = vmatpush1.bf16.msra.mxu1 %v9031_v42 }
 0x398   :  { %5963 = vmatprep.subr.bf16.mxu1 %v9036_v46 }
 0x399   :  { %7820 = vmatpush3.bf16.msra.mxu0 %v9088_v49  ;;  %v9099_v49 = vld [vmem:[#allocation6 + $0xbe0] ss:$28 sps:$4 sm:$0xff]  }
 0x39a   :  { %7821 = vmatprep.subr.bf16.mxu0 %v9092_v51 }
 0x39b   :  { %5964 = vmatpush1.bf16.msra.mxu1 %v9034_v35 }
 0x39c   :  { %5965 = vmatprep.subr.bf16.mxu1 %v9039_v52 }
 0x39d   :  { %7822 = vmatpush3.bf16.msra.mxu0 %v9093_v53 }
 0x39e   :  { %7823 = vmatprep.subr.bf16.mxu0 %v9097_v47 }
 0x39f   :  { %5966 = vmatpush1.bf16.msra.mxu1 %v9037_v54 }
 0x3a0   :  { %5967 = vmatprep.subr.bf16.mxu1 %v9042_v50 }
 0x3a1   :  { %7824 = vmatpush3.bf16.msra.mxu0 %v9098_v9 }
 0x3a2   :  { %7825 = vmatprep.subr.bf16.mxu0 %v9102_v55 }
 0x3a3   :  { %5968 = vmatpush1.bf16.msra.mxu1 %v9040_v56 }
 0x3a4   :  { %5969 = vmatprep.subr.bf16.mxu1 %v9045_v57 }
 0x3a5   :  { %7826 = vmatpush3.bf16.msra.mxu0 %v9103_v36 }
 0x3a7   :  { %5970 = vmatpush1.bf16.msra.mxu1 %v9043_v59 }
 0x3a8   :  { %5971 = vmatprep.subr.bf16.mxu1 %v9048_v60  ;;  %v9104_v60 = vld [vmem:[#allocation6 + $0xc18] ss:$28 sps:$4 sm:$0xff]  }
 0x3ab   :  { %5972 = vmatpush1.bf16.msra.mxu1 %v9046_v61 }
 0x3ac   :  { %5973 = vmatprep.subr.bf16.mxu1 %v9051_v62 }
 0x3af   :  { %5974 = vmatpush1.bf16.msra.mxu1 %v9049_v63  ;;  %v9107_v63 = vld [vmem:[#allocation9 + $0xc0] sm:$0xff]  }
 0x3b0   :  { %5975 = vmatprep.subr.bf16.mxu1 %v9054_v0 }
 0x3b3   :  { %5976 = vmatpush1.bf16.msra.mxu1 %v9052_v1 }
 0x3b4   :  { %5977 = vmatprep.subr.bf16.mxu1 %v9057_v2  ;;  %v9108_v2 = vld [vmem:[#allocation9 + $0x80] sm:$0xff]  }
 0x3b7   :  { %5978 = vmatpush1.bf16.msra.mxu1 %v9055_v3  ;;  %v9131_v3 = vld [vmem:[#allocation9 + $0x140] sm:$0xff]  }
 0x3b8   :  { %5979 = vmatprep.subr.bf16.mxu1 %v9060_v4  ;;  %v9132_v4 = vld [vmem:[#allocation9 + $0x100] sm:$0xff]   ;;  %7855 = vmatprep.subr.bf16.mxu0 %v9131_v3 }
 0x3bb   :  { %5980 = vmatpush1.bf16.msra.mxu1 %v9058_v5  ;;  %v9109_v5 = vld [vmem:[#allocation9 + $0xc8] sm:$0xff]  }
 0x3bc   :  { %5981 = vmatprep.subr.bf16.mxu1 %v9063_v6  ;;  %v9133_v6 = vld [vmem:[#allocation9 + $0x148] sm:$0xff]  }
 0x3bf   :  { %5982 = vmatpush1.bf16.msra.mxu1 %v9061_v7  ;;  %v9134_v7 = vld [vmem:[#allocation9 + $0x108] sm:$0xff]  }
 0x3c0   :  { %5983 = vmatprep.subr.bf16.mxu1 %v9066_v8  ;;  %v9110_v8 = vld [vmem:[#allocation9 + $0x88] sm:$0xff]  }
 0x3c3   :  { %5984 = vmatpush1.bf16.msra.mxu1 %v9064_v22  ;;  %v9135_v22 = vld [vmem:[#allocation9 + $0x150] sm:$0xff]  }
 0x3c4   :  { %5996 = vmatprep.subr.bf16.mxu1 %v9071_v13  ;;  %v9111_v13 = vld [vmem:[#allocation9 + $0xd0] sm:$0xff]  }
 0x3c6   :  { %5986 = vmatmul.mubr.bf16.vlgmr.msra.gmra.mrb[24].mxu1 %v9567_v10  ;;  %v9096_v10 = vld [vmem:[#allocation6 + $0xbac] ss:$28 sps:$4 sm:$0xff]  }
 0x3c7   :  { %5997 = vmatpush1.bf16.msra.mxu1 %v9069_v14  ;;  %6028 = vmatprep.mubr.bf16.mxu1 %v9298_v31  ;;  %v3475_v31 = vrot.slane %v9603_v30, %v520_v44  ;;  %v9136_v14 = vld [vmem:[#allocation9 + $0x110] sm:$0xff]  }
 0x3c8   :  { %5998 = vmatprep.subr.bf16.mxu1 %v9076_v15  ;;  %v9112_v15 = vld [vmem:[#allocation9 + $0x90] sm:$0xff]  }
 0x3cb   :  { %5999 = vmatpush1.bf16.msra.mxu1 %v9074_v16  ;;  %v9137_v16 = vld [vmem:[#allocation9 + $0x158] sm:$0xff]  }
 0x3cc   :  { %6000 = vmatprep.subr.bf16.mxu1 %v9081_v20  ;;  %v9113_v20 = vld [vmem:[#allocation9 + $0xd8] sm:$0xff]  }
 0x3cf   :  { %6001 = vmatpush1.bf16.msra.mxu1 %v9079_v21  ;;  %v9138_v21 = vld [vmem:[#allocation9 + $0x118] sm:$0xff]  }
 0x3d0   :  { %6002 = vmatprep.subr.bf16.mxu1 %v9086_v24  ;;  %v9139_v24 = vld [vmem:[#allocation9 + $0x160] sm:$0xff]  }
 0x3d3   :  { %6003 = vmatpush1.bf16.msra.mxu1 %v9084_v27  ;;  %v9115_v27 = vld [vmem:[#allocation9 + $0xe0] sm:$0xff]  }
 0x3d4   :  { %6004 = vmatprep.subr.bf16.mxu1 %v9091_v29  ;;  %v9140_v29 = vld [vmem:[#allocation9 + $0x120] sm:$0xff]  }
 0x3d7   :  { %6005 = vmatpush1.bf16.msra.mxu1 %v9089_v18  ;;  %v9116_v18 = vld [vmem:[#allocation9 + $0xa0] sm:$0xff]  }
 0x3d8   :  { %6006 = vmatprep.subr.bf16.mxu1 %v9096_v10  ;;  %v9117_v10 = vld [vmem:[#allocation9 + $0xe8] sm:$0xff]  }
 0x3d9   :  { %v5686_v38 = vpop.f32.mrb[20].mxu1  ;;  %v5858_v19 = vpop.f32.mrb[8].mxu0 }
 0x3da   :  { %v7944_v39 = vadd.f32 %v5686_v38, %v3475_v31  ;;  %v7948_v44 = vadd.f32 %v5858_v19, %v3483_v32  ;;  %v5688_v40 = vpop.f32.mrb[21].mxu1  ;;  %v5860_v11 = vpop.f32.mrb[9].mxu0  ;;  %v9121_v19 = vld [vmem:[#allocation9 + $0xf8] sm:$0xff]  }
 0x3db   :  { %v7945_v41 = vadd.f32 %v5688_v40, %v3479_v33  ;;  %v7949_v45 = vadd.f32 %v5860_v11, %v3487_v23  ;;  %v5690_v42 = vpop.f32.mrb[22].mxu1  ;;  %v5862_v46 = vpop.f32.mrb[10].mxu0  ;;  %6007 = vmatpush1.bf16.msra.mxu1 %v9094_v34  ;;  %v9120_v34 = vld [vmem:[#allocation9 + $0xb0] sm:$0xff]   ;;  %v9122_v40 = vld [vmem:[#allocation9 + $0xb8] sm:$0xff]   ;;  %v9123_v11 = vld [vmem:[#allocation9 + $0x180] sm:$0xff]  }
 0x3dc   :  { %v7946_v26 = vadd.f32 %v5690_v42, %v3475_v31  ;;  %v7950_v51 = vadd.f32 %v5862_v46, %v3483_v32  ;;  %v5692_v35 = vpop.f32.mrb[23].mxu1  ;;  %v5864_v52 = vpop.f32.mrb[11].mxu0  ;;  %6008 = vmatprep.subr.bf16.mxu1 %v9101_v37  ;;  %v6203_v54 = vmax.f32 %v7944_v39, 0.0  ;;  %v6205_v50 = vmax.f32 %v7948_v44, 0.0  ;;  %v9118_v31 = vld [vmem:[#allocation9 + $0xa8] sm:$0xff]   ;;  %v9119_v32 = vld [vmem:[#allocation9 + $0xf0] sm:$0xff]  }
 0x3dd   :  { %v7947_v53 = vadd.f32 %v5692_v35, %v3479_v33  ;;  %v7951_v47 = vadd.f32 %v5864_v52, %v3487_v23  ;;  %v6204_v56 = vmax.f32 %v7945_v41, 0.0  ;;  %v6206_v57 = vmax.f32 %v7949_v45, 0.0  ;;  %v9124_v41 = vld [vmem:[#allocation9 + $0x188] sm:$0xff]   ;;  %v9125_v45 = vld [vmem:[#allocation9 + $0x190] sm:$0xff]   ;;  %v9126_v42 = vld [vmem:[#allocation9 + $0x198] sm:$0xff]  }
 0x3de   :  { %v6210_v9 = vmax.f32 %v7946_v26, 0.0  ;;  %v6212_v55 = vmax.f32 %v7950_v51, 0.0  ;;  %v9127_v46 = vld [vmem:[#allocation9 + $0x1a0] sm:$0xff]   ;;  %v3499_v26 = vrot.slane %v9603_v30, %v544_v28  ;;  %v9129_v52 = vld [vmem:[#allocation9 + $0x1b0] sm:$0xff]   ;;  %v9141_v28 = vld [vmem:[#allocation9 + $0x168] sm:$0xff]  }
 0x3df   :  { %v6211_v36 = vmax.f32 %v7947_v53, 0.0  ;;  %v6213_v59 = vmax.f32 %v7951_v47, 0.0  ;;  %6009 = vmatpush1.bf16.msra.mxu1 %v9099_v49  ;;  %v9128_v49 = vld [vmem:[#allocation9 + $0x1a8] sm:$0xff]  }
 0x3e0   :  { %v6217_v61 = vpack.c.bf16 %v6210_v9, %v6203_v54  ;;  %v9617_v62 = vpack.c.bf16 %v6212_v55, %v6205_v50  ;;  %6010 = vmatprep.subr.bf16.mxu1 %v9106_v48 }
 0x3e1   :  { %v6218_v0 = vpack.c.bf16 %v6211_v36, %v6204_v56  ;;  %v6220_v1 = vpack.c.bf16 %v6213_v59, %v6206_v57  ;;  %v9130_v56 = vld [vmem:[#allocation9 + $0x1b8] sm:$0xff]   ;;  %v9142_v36 = vld [vmem:[#allocation9 + $0x128] sm:$0xff]  }
 0x3e3   :  { %6011 = vmatpush1.bf16.msra.mxu1 %v9104_v60  ;;  %6711 = vmatprep.mubr.bf16.mxu0 %v6218_v0 }
 0x3e4   :  { %6712 = vmatmul.mubr.bf16.vlgmr.msra.gmra.mrb[28].mxu0 %v6217_v61  ;;  %7833 = vmatprep.subr.bf16.mxu1 %v9107_v63  ;;  %v9143_v63 = vld [vmem:[#allocation9 + $0x170] sm:$0xff]  }
 0x3e5   :  { %7856 = vmatpush3.bf16.msra.mxu0 %v9132_v4 }
 0x3e6   :  { %6029 = vmatmul.mubr.bf16.vlgmr.msra.gmra.mrb[24].mxu1 %v9558_v25  ;;  %7857 = vmatprep.subr.bf16.mxu0 %v9133_v6  ;;  %v9114_v25 = vld [vmem:[#allocation9 + $0x98] sm:$0xff]  }
 0x3e7   :  { %7834 = vmatpush3.bf16.msra.mxu1 %v9108_v2  ;;  %6752 = vmatprep.mubr.bf16.mxu1 %v6220_v1  ;;  %v9144_v1 = vld [vmem:[#allocation9 + $0x130] sm:$0xff]   ;;  %v9146_v6 = vld [vmem:[#allocation9 + $0x138] sm:$0xff]  }
 0x3e8   :  { %7835 = vmatprep.subr.bf16.mxu1 %v9109_v5  ;;  %v9145_v5 = vld [vmem:[#allocation9 + $0x178] sm:$0xff]  }
 0x3e9   :  { %7858 = vmatpush3.bf16.msra.mxu0 %v9134_v7 }
 0x3ea   :  { %7859 = vmatprep.subr.bf16.mxu0 %v9135_v22 }
 0x3eb   :  { %7836 = vmatpush3.bf16.msra.mxu1 %v9110_v8 }
 0x3ec   :  { %7837 = vmatprep.subr.bf16.mxu1 %v9111_v13 }
 0x3ed   :  { %7860 = vmatpush3.bf16.msra.mxu0 %v9136_v14 }
 0x3ee   :  { %7861 = vmatprep.subr.bf16.mxu0 %v9137_v16 }
 0x3ef   :  { %7838 = vmatpush3.bf16.msra.mxu1 %v9112_v15 }
 0x3f0   :  { %7839 = vmatprep.subr.bf16.mxu1 %v9113_v20 }
 0x3f1   :  { %7862 = vmatpush3.bf16.msra.mxu0 %v9138_v21  ;;  %v3491_v21 = vrot.slane %v9603_v30, %v536_v17 }
 0x3f2   :  { %7863 = vmatprep.subr.bf16.mxu0 %v9139_v24  ;;  %v3495_v24 = vrot.slane %v9603_v30, %v540_v58  ;;  %v7602_v58 = vld [vmem:[#allocation10] ss:$0 sm:$0xff] }
 0x3f3   :  { %7840 = vmatpush3.bf16.msra.mxu1 %v9114_v25 }
 0x3f4   :  { %7841 = vmatprep.subr.bf16.mxu1 %v9115_v27 }
 0x3f5   :  { %7864 = vmatpush3.bf16.msra.mxu0 %v9140_v29 }
 0x3f6   :  { %7865 = vmatprep.subr.bf16.mxu0 %v9141_v28 }
 0x3f7   :  { %7842 = vmatpush3.bf16.msra.mxu1 %v9116_v18 }
 0x3f8   :  { %7843 = vmatprep.subr.bf16.mxu1 %v9117_v10 }
 0x3f9   :  { %7866 = vmatpush3.bf16.msra.mxu0 %v9142_v36 }
 0x3fa   :  { %v7752_v33 = vpop.f32.mrb[12].mxu0  ;;  %7867 = vmatprep.subr.bf16.mxu0 %v9143_v63 }
 0x3fb   :  { %v7753_v23 = vpop.f32.mrb[13].mxu0  ;;  %7844 = vmatpush3.bf16.msra.mxu1 %v9118_v31 }
 0x3fc   :  { %v7754_v37 = vadd.f32 %v7753_v23, %v7752_v33  ;;  %v7755_v38 = vpop.f32.mrb[14].mxu0  ;;  %7845 = vmatprep.subr.bf16.mxu1 %v9119_v32 }
 0x3fd   :  { %v7756_v39 = vpop.f32.mrb[15].mxu0  ;;  %7868 = vmatpush3.bf16.msra.mxu0 %v9144_v1 }
 0x3fe   :  { %v7757_v44 = vadd.f32 %v7756_v39, %v7755_v38  ;;  %v6074_v48 = vadd.f32 %v7754_v37, %v3499_v26  ;;  %7869 = vmatprep.subr.bf16.mxu0 %v9145_v5 }
 0x3ff   :  { %7846 = vmatpush3.bf16.msra.mxu1 %v9120_v34 }
 0x400   :  { %7847 = vmatprep.subr.bf16.mxu1 %v9121_v19  ;;  %v6077_v50 = vadd.f32 %v7757_v44, %v3499_v26 }
 0x401   :  { %7870 = vmatpush3.bf16.msra.mxu0 %v9146_v6 }
 0x403   :  { %7848 = vmatpush3.bf16.msra.mxu1 %v9122_v40 }
 0x404   :  { %7912 = vmatprep.subr.bf16.mxu1 %v9299_v12 }
 0x406   :  { %6753 = vmatmul.mubr.bf16.vlgmr.msra.gmra.mrb[28].mxu1 %v9617_v62 }
 0x407   :  { %7913 = vmatpush3.bf16.msra.mxu1 %v9123_v11  ;;  %7928 = vmatprep.mubr.msk.bf16.mxu1 %vm9300_vm1, %v9299_v12 }
 0x408   :  { %7914 = vmatprep.subr.bf16.mxu1 %v9299_v12 }
 0x40b   :  { %7915 = vmatpush3.bf16.msra.mxu1 %v9124_v41 }
 0x40c   :  { %7916 = vmatprep.subr.bf16.mxu1 %v9299_v12 }
 0x40f   :  { %7917 = vmatpush3.bf16.msra.mxu1 %v9125_v45 }
 0x410   :  { %7918 = vmatprep.subr.bf16.mxu1 %v9299_v12 }
 0x413   :  { %7919 = vmatpush3.bf16.msra.mxu1 %v9126_v42 }
 0x414   :  { %7920 = vmatprep.subr.bf16.mxu1 %v9299_v12 }
 0x417   :  { %7921 = vmatpush3.bf16.msra.mxu1 %v9127_v46 }
 0x418   :  { %7922 = vmatprep.subr.bf16.mxu1 %v9299_v12 }
 0x41a   :  { %v7774_v51 = vpop.f32.mrb[16].mxu0 }
 0x41b   :  { %v7775_v35 = vpop.f32.mrb[17].mxu0  ;;  %7923 = vmatpush3.bf16.msra.mxu1 %v9128_v49 }
 0x41c   :  { %v7776_v53 = vadd.f32 %v7775_v35, %v7774_v51  ;;  %v7777_v47 = vpop.f32.mrb[18].mxu0  ;;  %7924 = vmatprep.subr.bf16.mxu1 %v9299_v12 }
 0x41d   :  { %v7778_v54 = vpop.f32.mrb[19].mxu0 }
 0x41e   :  { %v6115_v9 = vadd.f32 %v7776_v53, %v6074_v48  ;;  %v7779_v55 = vadd.f32 %v7778_v54, %v7777_v47 }
 0x41f   :  { %7925 = vmatpush3.bf16.msra.mxu1 %v9129_v52 }
 0x420   :  { %v6118_v57 = vadd.f32 %v7779_v55, %v6077_v50  ;;  %7926 = vmatprep.subr.bf16.mxu1 %v9299_v12 }
 0x423   :  { %7927 = vmatpush3.bf16.msra.mxu1 %v9130_v56 }
 0x43a   :  { %v7796_v59 = vpop.f32.mrb[20].mxu0 }
 0x43b   :  { %v7797_v60 = vpop.f32.mrb[21].mxu0 }
 0x43c   :  { %v7798_v61 = vadd.f32 %v7797_v60, %v7796_v59  ;;  %v7799_v62 = vpop.f32.mrb[22].mxu0 }
 0x43d   :  { %v7800_v0 = vpop.f32.mrb[23].mxu0 }
 0x43e   :  { %v7801_v2 = vadd.f32 %v7800_v0, %v7799_v62  ;;  %v6156_v3 = vadd.f32 %v7798_v61, %v6115_v9 }
 0x440   :  { %v6159_v4 = vadd.f32 %v7801_v2, %v6118_v57 }
 0x45a   :  { %v6196_v12 = vpop.f32.mrb[24].mxu0 }
 0x45b   :  { %v6197_v7 = vadd.f32 %v6196_v12, %v6156_v3  ;;  %v7910_v8 = vpop.f32.mrb[25].mxu0 }
 0x45c   :  { %v6199_v22 = vpop.f32.mrb[26].mxu0 }
 0x45d   :  { %v6200_v13 = vadd.f32 %v6199_v22, %v6159_v4  ;;  %v7911_v14 = vpop.f32.mrb[27].mxu0  ;;  %v6209_v15 = vmax.f32 %v6197_v7, 0.0 }
 0x45f   :  { %v6216_v16 = vmax.f32 %v6200_v13, 0.0 }
 0x461   :  { %v6223_v20 = vpack.c.bf16 %v6216_v16, %v6209_v15 }
 0x463   :  { %7929 = vmatmul.mubr.bf16.vlgmr.msra.gmra.mrb[32].mxu1 %v6223_v20 }
 0x4b7   :  { %v7827_v25 = vpop.f32.mrb[28].mxu0 }
 0x4b8   :  { %v7828_v27 = vpop.f32.mrb[29].mxu0 }
 0x4b9   :  { %v7829_v29 = vadd.f32 %v7828_v27, %v7827_v25  ;;  %v6030_v18 = vpop.f32.mrb[24].mxu1  ;;  %v7830_v10 = vpop.f32.mrb[30].mxu0 }
 0x4ba   :  { %v7952_v31 = vadd.f32 %v6030_v18, %v3491_v21  ;;  %v6032_v32 = vpop.f32.mrb[25].mxu1  ;;  %v7831_v33 = vpop.f32.mrb[31].mxu0 }
 0x4bb   :  { %v7953_v23 = vadd.f32 %v6032_v32, %v3495_v24  ;;  %v7832_v34 = vadd.f32 %v7831_v33, %v7830_v10  ;;  %v6034_v37 = vpop.f32.mrb[26].mxu1  ;;  %v6714_v42 = vadd.f32 %v7829_v29, %v7602_v58 }
 0x4bc   :  { %v7954_v38 = vadd.f32 %v6034_v37, %v3491_v21  ;;  %v6036_v19 = vpop.f32.mrb[27].mxu1  ;;  %v6207_v44 = vmax.f32 %v7952_v31, 0.0 }
 0x4bd   :  { %v7955_v39 = vadd.f32 %v6036_v19, %v3495_v24  ;;  %v6208_v40 = vmax.f32 %v7953_v23, 0.0  ;;  %v6717_v51 = vadd.f32 %v7832_v34, %v7602_v58 }
 0x4be   :  { %v6214_v17 = vmax.f32 %v7954_v38, 0.0 }
 0x4bf   :  { %v6215_v11 = vmax.f32 %v7955_v39, 0.0 }
 0x4c0   :  { %v6221_v43 = vpack.c.bf16 %v6214_v17, %v6207_v44 }
 0x4c1   :  { %v6222_v41 = vpack.c.bf16 %v6215_v11, %v6208_v40 }
 0x4c3   :  { %6793 = vmatprep.mubr.bf16.mxu0 %v6222_v41 }
 0x4c4   :  { %6794 = vmatmul.mubr.bf16.vlgmr.msra.gmra.mrb[32].mxu0 %v6221_v43 }
 0x4d9   :  { %v7849_v30 = vpop.f32.mrb[28].mxu1 }
 0x4da   :  { %v7850_v45 = vpop.f32.mrb[29].mxu1 }
 0x4db   :  { %v7851_v46 = vadd.f32 %v7850_v45, %v7849_v30  ;;  %v7852_v49 = vpop.f32.mrb[30].mxu1 }
 0x4dc   :  { %v7853_v26 = vpop.f32.mrb[31].mxu1 }
 0x4dd   :  { %v6755_v35 = vadd.f32 %v7851_v46, %v6714_v42  ;;  %v7854_v52 = vadd.f32 %v7853_v26, %v7852_v49 }
 0x4df   :  { %v6758_v48 = vadd.f32 %v7854_v52, %v6717_v51 }
 0x536   :  { %v6836_v53 = vpop.f32.mrb[32].mxu1 }
 0x537   :  { %v7930_v47 = vpop.f32.mrb[33].mxu1 }
 0x538   :  { %v6839_v54 = vpop.f32.mrb[34].mxu1 }
 0x539   :  { %v7931_v50 = vpop.f32.mrb[35].mxu1 }
 0x597   :  { %v7871_v9 = vpop.f32.mrb[32].mxu0 }
 0x598   :  { %v7872_v55 = vpop.f32.mrb[33].mxu0 }
 0x599   :  { %v7873_v56 = vadd.f32 %v7872_v55, %v7871_v9  ;;  %v7874_v57 = vpop.f32.mrb[34].mxu0 }
 0x59a   :  { %v7875_v28 = vpop.f32.mrb[35].mxu0 }
 0x59b   :  { %v6796_v36 = vadd.f32 %v7873_v56, %v6755_v35  ;;  %v7876_v59 = vadd.f32 %v7875_v28, %v7874_v57 }
 0x59d   :  { %v6837_v60 = vadd.f32 %v6836_v53, %v6796_v36  ;;  %v6799_v61 = vadd.f32 %v7876_v59, %v6758_v48 }
 0x59f   :  { %v6840_v62 = vadd.f32 %v6839_v54, %v6799_v61  ;;  %v6843_v63 = vmax.f32 %v6837_v60, 0.0 }
 0x5a1   :  { %v6844_v0 = vmax.f32 %v6840_v62, 0.0 }
 0x5a3   :  { %v7666_v1 = vpack.c.bf16 %v6844_v0, %v6843_v63 }
 0x5a5   :  { %7667 = vst [vmem:[%s9650_s7] sm:$0xff] %v7666_v1  }
 0x5a6   :  { %6859 = vsyncpa [#allocation3], 1 }
 0x5a7   :  { %6860 = vsyncpa [#allocation5], 1 }
 0x5a8   :  { %6861 = vsyncpa [#allocation8], 1 }
 0x5a9   :  { %6862 = vsyncpa [#allocation11], 1 }

</bundles_post_ra>
